<compile_context>
chip_gen: v7x
topology: tpu7x:2x2x1
jax: 0.10.0
libtpu: 0.0.40
codegen_flags: <defaults>
</compile_context>

<pallas_src>
import functools

import numpy as np
import jax
import jax.numpy as jnp
from jax.experimental import pallas as pl
from jax.experimental.pallas import tpu as pltpu

cfg = {
    'vgg11': [64, 'M', 128, 'M', 256, 256, 'M', 512, 512, 'M', 512, 512, 'M'],
    'vgg13': [64, 64, 'M', 128, 128, 'M', 256, 256, 'M', 512, 512, 'M', 512, 512, 'M'],
    'vgg16': [64, 64, 'M', 128, 128, 'M', 256, 256, 256, 'M', 512, 512, 512, 'M', 512, 512, 512],
    'vgg19': [64, 64, 'M', 128, 128, 'M', 256, 256, 256, 256, 'M', 512, 512, 512, 512, 'M',
              512, 512, 512, 512, 'M'],
    'vgg16_1by8': [8, 8, 'M', 16, 16, 'M', 32, 32, 32, 'M', 64, 64, 64, 'M', 64, 64, 64, 'M'],
    'vgg16_1by16': [4, 4, 'M', 8, 8, 'M', 16, 16, 16, 'M', 32, 32, 32, 'M', 32, 32, 32, 'M'],
    'vgg16_1by32': [2, 2, 'M', 4, 4, 'M', 8, 8, 8, 'M', 16, 16, 16, 'M', 16, 16, 16, 'M'],
}

FINAL_CHANNELS = {'vgg16': None, 'vgg16_1by8': 64, 'vgg16_1by16': 32, 'vgg16_1by32': 16}
EPS = 1e-5
NCLS_PAD = 128          # lane-dense logits store; wrapper slices back to num_classes
HID = 256               # classifier hidden width (matches the PyTorch module)


# ---------------------------------------------------------------------------
# Static plan: per-conv spatial/channel config + packed band-weight row offsets
# ---------------------------------------------------------------------------
def _make_plan(vgg_name, w, h0, w0):
    plan = []
    cin, hh, ww = 3, h0, w0
    for v in cfg[vgg_name]:
        if v == 'M':
            plan[-1]['pool'] = True                     # fuse MaxPool into previous conv
            hh //= 2
            ww //= 2
        else:
            cout = int(w / 16 * v)
            plan.append(dict(h=hh, w=ww, cin=cin, cout=cout, pool=False))
            cin = cout

    row, wmax = 0, 0
    for lp in plan:
        W, ci, co, pool = lp['w'], lp['cin'], lp['cout'], lp['pool']
        k = W * ci                                       # activation lane width (input)
        # output spatial columns per phase: both phases for pooled layers (even/odd w)
        cols = [list(range(0, W, 2)), list(range(1, W, 2))] if pool else [list(range(W))]
        ncols = len(cols[0]) * co
        wrow = []
        for _ph in range(len(cols)):
            offs = []
            for _kh in range(3):
                offs.append(row)
                row += -(-k // 16) * 16                  # slab padded to bf16 row tile
            wrow.append(offs)
        lp.update(k=k, cols=cols, nphase=len(cols), ncols=ncols, wrow=wrow)
        wmax = max(wmax, ncols)
    return plan, row, wmax, hh, ww


# ---------------------------------------------------------------------------
# Parameters: PyTorch-layout init + one-time kernel-layout preparation
# ---------------------------------------------------------------------------
def init_params(key, vgg_name='vgg16_1by32', w=16):
    conv_params = []
    in_channels = 3
    for v in cfg[vgg_name]:
        if v == 'M':
            continue
        out_channels = int(w / 16 * v)
        key, k1, k2, k3, k4, k5 = jax.random.split(key, 6)
        std = (2.0 / (9 * in_channels)) ** 0.5
        wconv = jax.random.normal(k1, (out_channels, in_channels, 3, 3), jnp.float32) * std
        gamma = 1.0 + 0.1 * jax.random.normal(k2, (out_channels,), jnp.float32)
        beta = 0.1 * jax.random.normal(k3, (out_channels,), jnp.float32)
        rmean = 0.1 * jax.random.normal(k4, (out_channels,), jnp.float32)
        rvar = 1.0 + 0.1 * jax.random.uniform(k5, (out_channels,), jnp.float32)
        conv_params.append((wconv, gamma, beta, rmean, rvar))
        in_channels = out_channels

    final_channels = int(512 * w / 16) if vgg_name == 'vgg16' else FINAL_CHANNELS[vgg_name]
    dims = [(final_channels * 2 * 2, HID), (HID, HID), (HID, 10)]
    fc_params = []
    for fin, fout in dims:
        key, kw, kb = jax.random.split(key, 3)
        bound = 1.0 / (fin ** 0.5)
        wl = jax.random.uniform(kw, (fout, fin), jnp.float32, -bound, bound)
        bl = jax.random.uniform(kb, (fout,), jnp.float32, -bound, bound)
        fc_params.append((wl, bl))
    return tuple(conv_params), tuple(fc_params)


def prepare_params(params, vgg_name='vgg16_1by32', w=16, input_hw=32):
    """Fold BN, build banded conv matrices, pack everything into 4 arrays."""
    conv_params, fc_params = params
    plan, nrows, wmax, _fh, _fw = _make_plan(vgg_name, w, input_hw, input_hw)
    assert len(plan) == len(conv_params)

    cw = np.zeros((nrows, wmax), np.float32)
    cb = np.zeros((len(plan), wmax), np.float32)
    for l, (lp, p) in enumerate(zip(plan, conv_params)):
        wc, gamma, beta, rmean, rvar = (np.asarray(a, np.float32) for a in p)
        W, ci, co = lp['w'], lp['cin'], lp['cout']
        assert wc.shape == (co, ci, 3, 3)
        scale = gamma / np.sqrt(rvar + EPS)              # inference-form BN fold
        wfold = wc * scale[:, None, None, None]          # (cout, cin, 3, 3)
        bias = beta - rmean * scale
        for ph, colset in enumerate(lp['cols']):
            for kh in range(3):
                M = np.zeros((W * ci, len(colset) * co), np.float32)
                for j, wo in enumerate(colset):
                    for kw in range(3):
                        wi = wo + kw - 1
                        if 0 <= wi < W:
                            M[wi * ci:(wi + 1) * ci, j * co:(j + 1) * co] = wfold[:, :, kh, kw].T
                r0 = lp['wrow'][ph][kh]
                cw[r0:r0 + W * ci, :M.shape[1]] = M
        cb[l, :lp['ncols']] = np.tile(bias, lp['ncols'] // co)

    (w1, b1), (w2, b2), (w3, b3) = [tuple(np.asarray(a, np.float32) for a in t)
                                    for t in fc_params]
    cf = plan[-1]['cout']
    assert w1.shape == (HID, cf * 4)
    # Fold AdaptiveAvgPool2d((2,2)) on the 1x1 map + NCHW flatten (col = c*4 + pos):
    # all four pooled positions equal the single pixel, so fc1 reduces to (cf, HID).
    w1eff = w1.reshape(HID, cf, 4).sum(axis=2).T         # (cf, HID)
    ncls = w3.shape[0]
    fcw_width = max(HID, NCLS_PAD)
    fw = np.zeros((cf + 2 * HID, fcw_width), np.float32)
    fw[0:cf, :HID] = w1eff
    fw[cf:cf + HID, :HID] = w2.T
    fw[cf + HID:cf + 2 * HID, :ncls] = w3.T
    fb = np.zeros((3, fcw_width), np.float32)
    fb[0, :HID] = b1
    fb[1, :HID] = b2
    fb[2, :ncls] = b3

    return dict(
        conv_w=jnp.asarray(cw, jnp.bfloat16),            # packed band matrices (bf16)
        conv_b=jnp.asarray(cb, jnp.float32),             # folded-BN bias rows
        fc_w=jnp.asarray(fw, jnp.bfloat16),              # fc1(eff) | fc2 | fc3 (padded)
        fc_b=jnp.asarray(fb, jnp.float32),
    )


# ---------------------------------------------------------------------------
# The single fused kernel (per-image grid step)
# ---------------------------------------------------------------------------
def _make_kernel(plan, halo_w):
    cf = plan[-1]['cout']

    def kernel(x_ref, cw_ref, cb_ref, fw_ref, fb_ref, o_ref, halo_ref):
        act = x_ref[0]                                   # (H0, W0*3) f32, w-major/c-minor
        halo_ref[0:1, :] = jnp.zeros((1, halo_w), jnp.float32)   # top halo row (reused)

        for l, lp in enumerate(plan):
            H, L, ncols = lp['h'], lp['k'], lp['ncols']
            # Stage the layer input into the halo scratch; zero ONLY the bottom halo row.
            halo_ref[H + 1:H + 2, :] = jnp.zeros((1, halo_w), jnp.float32)
            halo_ref[1:H + 1, 0:L] = act
            taps = (halo_ref[0:H, 0:L].astype(jnp.bfloat16),       # in[h-1]  (kh = 0)
                    act.astype(jnp.bfloat16),                      # in[h]    (kh = 1)
                    halo_ref[2:H + 2, 0:L].astype(jnp.bfloat16))   # in[h+1]  (kh = 2)

            # Banded-weight matmuls: one per vertical tap (x2 phases when pooling).
            accs = []
            for ph in range(lp['nphase']):
                a = None
                for kh in range(3):
                    r0 = lp['wrow'][ph][kh]
                    wmat = cw_ref[r0:r0 + L, 0:ncols]              # bf16 (L, ncols)
                    d = jnp.dot(taps[kh], wmat, preferred_element_type=jnp.float32)
                    a = d if a is None else a + d
                accs.append(a)
            # Horizontal half of MaxPool2d(2,2): max over even/odd output-column phases.
            acc = accs[0] if lp['nphase'] == 1 else jnp.maximum(accs[0], accs[1])
            y = jnp.maximum(acc + cb_ref[l:l + 1, 0:ncols], 0.0)   # folded-BN bias + ReLU

            if lp['pool']:
                # Vertical half of MaxPool2d(2,2): max of even/odd row selections
                # (exact f32 selection matmuls; reshape-free).
                H2 = H // 2
                r = jax.lax.broadcasted_iota(jnp.int32, (H2, H), 0)
                c = jax.lax.broadcasted_iota(jnp.int32, (H2, H), 1)
                de = (c == 2 * r).astype(jnp.float32)
                do = (c == 2 * r + 1).astype(jnp.float32)
                y = jnp.maximum(jnp.dot(de, y, preferred_element_type=jnp.float32),
                                jnp.dot(do, y, preferred_element_type=jnp.float32))
            act = y

        # AdaptiveAvgPool2d((2,2)) + NCHW flatten folded into fc1 (final map is 1x1).
        feat = act.astype(jnp.bfloat16)                            # (1, cf)
        h1 = jnp.dot(feat, fw_ref[0:cf, 0:HID],
                     preferred_element_type=jnp.float32) + fb_ref[0:1, 0:HID]
        h1 = jnp.maximum(h1, 0.0)
        h2 = jnp.dot(h1.astype(jnp.bfloat16), fw_ref[cf:cf + HID, 0:HID],
                     preferred_element_type=jnp.float32) + fb_ref[1:2, 0:HID]
        h2 = jnp.maximum(h2, 0.0)
        logits = jnp.dot(h2.astype(jnp.bfloat16), fw_ref[cf + HID:cf + 2 * HID, 0:NCLS_PAD],
                         preferred_element_type=jnp.float32) + fb_ref[2:3, 0:NCLS_PAD]
        o_ref[0] = jnp.broadcast_to(logits, (8, NCLS_PAD))         # lane-dense store

    return kernel


# ---------------------------------------------------------------------------
# Forward pass: one pallas_call for the whole network, batch on a parallel grid
# ---------------------------------------------------------------------------
def vgg_forward(x_nchw, kparams, vgg_name='vgg16_1by32', w=16, num_classes=10):
    n, c0, h0, w0 = x_nchw.shape
    assert c0 == 3, "architecture expects RGB input"
    plan, _nrows, _wmax, fin_h, fin_w = _make_plan(vgg_name, w, h0, w0)
    assert fin_h == 1 and fin_w == 1, "kernel folds the adaptive avg-pool for 32x32 inputs"

    # NCHW -> (N, H, W*C) dense-lane layout (w-major, channel-minor within lanes)
    x = jnp.transpose(x_nchw, (0, 2, 3, 1)).astype(jnp.float32).reshape(n, h0, w0 * c0)
    halo_w = max(lp['k'] for lp in plan)

    out = pl.pallas_call(
        _make_kernel(plan, halo_w),
        out_shape=jax.ShapeDtypeStruct((n, 8, NCLS_PAD), jnp.float32),
        grid=(n,),
        in_specs=[
            pl.BlockSpec((1, h0, w0 * c0), lambda b: (b, 0, 0)),
            pl.BlockSpec(kparams['conv_w'].shape, lambda b: (0, 0)),
            pl.BlockSpec(kparams['conv_b'].shape, lambda b: (0, 0)),
            pl.BlockSpec(kparams['fc_w'].shape, lambda b: (0, 0)),
            pl.BlockSpec(kparams['fc_b'].shape, lambda b: (0, 0)),
        ],
        out_specs=pl.BlockSpec((1, 8, NCLS_PAD), lambda b: (b, 0, 0)),
        scratch_shapes=[pltpu.VMEM((h0 + 2, halo_w), jnp.float32)],   # halo scratch
        compiler_params=pltpu.CompilerParams(
            dimension_semantics=("parallel",),
            vmem_limit_bytes=32 * 1024 * 1024,
        ),
    )(x, kparams['conv_w'], kparams['conv_b'], kparams['fc_w'], kparams['fc_b'])
    return out[:, 0, :num_classes]


if __name__ == "__main__":
    key = jax.random.PRNGKey(0)
    kx, kp = jax.random.split(key)
    # PyTorch-style NCHW input; 3 channels and 32x32 spatial are what this architecture
    # requires (5 stride-2 MaxPools -> 1x1 before AdaptiveAvgPool2d((2,2))).
    x = jax.random.normal(kx, (2, 3, 32, 32), jnp.float32)
    params = init_params(kp, vgg_name='vgg16_1by32', w=16)
    kparams = prepare_params(params, vgg_name='vgg16_1by32', w=16, input_hw=32)

    fwd = jax.jit(functools.partial(vgg_forward, vgg_name='vgg16_1by32', w=16,
                                    num_classes=10))
    out = fwd(x, kparams)
    jax.block_until_ready(out)
    assert out.shape == (2, 10) and out.dtype == jnp.float32
    print("KERNEL_OK")
</pallas_src>

<mosaic_0001>
module attributes {stable_mosaic.version = 11 : i64} {
  func.func @kernel(%arg0: i32, %arg1: memref<1x32x96xf32, #tpu.memory_space<vmem>>, %arg2: memref<2880x64xbf16, #tpu.memory_space<vmem>>, %arg3: memref<13x64xf32, #tpu.memory_space<vmem>>, %arg4: memref<528x256xbf16, #tpu.memory_space<vmem>>, %arg5: memref<3x256xf32, #tpu.memory_space<vmem>>, %arg6: memref<1x8x128xf32, #tpu.memory_space<vmem>>, %arg7: memref<34x96xf32, #tpu.memory_space<vmem>>) attributes {dimension_semantics = [#tpu.dimension_semantics<parallel>], iteration_bounds = array<i64: 2>, scalar_prefetch = 0 : i64, scratch_operands = 1 : i64, tpu.core_type = #tpu.core_type<tc>, window_params = [{transform_indices = @transform_0, window_bounds = array<i64: 1, 32, 96>}, {pipeline_mode = #tpu.pipeline_mode<synchronous>, transform_indices = @transform_1, window_bounds = array<i64: 2880, 64>}, {pipeline_mode = #tpu.pipeline_mode<synchronous>, transform_indices = @transform_2, window_bounds = array<i64: 13, 64>}, {pipeline_mode = #tpu.pipeline_mode<synchronous>, transform_indices = @transform_3, window_bounds = array<i64: 528, 256>}, {pipeline_mode = #tpu.pipeline_mode<synchronous>, transform_indices = @transform_4, window_bounds = array<i64: 3, 256>}, {transform_indices = @transform_5, window_bounds = array<i64: 1, 8, 128>}]} {
    %c0 = arith.constant 0 : index
    %c0_0 = arith.constant 0 : index
    %c0_1 = arith.constant 0 : index
    %0 = vector.load %arg1[%c0, %c0_0, %c0_1] : memref<1x32x96xf32, #tpu.memory_space<vmem>>, vector<1x32x96xf32>
    %1 = vector.shape_cast %0 : vector<1x32x96xf32> to vector<32x96xf32>
    %cst = arith.constant 0.000000e+00 : f32
    %2 = vector.broadcast %cst : f32 to vector<1x96xf32>
    %c0_2 = arith.constant 0 : index
    %c0_3 = arith.constant 0 : index
    %3 = vector.load %arg7[%c0_2, %c0_3] : memref<34x96xf32, #tpu.memory_space<vmem>>, vector<1x96xf32>
    tpu.vector_store %arg7[%c0_2, %c0_3], %2 {strides = array<i32>} : memref<34x96xf32, #tpu.memory_space<vmem>>, vector<1x96xf32>,
    %cst_4 = arith.constant 0.000000e+00 : f32
    %4 = vector.broadcast %cst_4 : f32 to vector<1x96xf32>
    %c33 = arith.constant 33 : index
    %c0_5 = arith.constant 0 : index
    %5 = vector.load %arg7[%c33, %c0_5] : memref<34x96xf32, #tpu.memory_space<vmem>>, vector<1x96xf32>
    tpu.vector_store %arg7[%c33, %c0_5], %4 {strides = array<i32>} : memref<34x96xf32, #tpu.memory_space<vmem>>, vector<1x96xf32>,
    %c1 = arith.constant 1 : index
    %c0_6 = arith.constant 0 : index
    %6 = vector.load %arg7[%c1, %c0_6] : memref<34x96xf32, #tpu.memory_space<vmem>>, vector<32x96xf32>
    tpu.vector_store %arg7[%c1, %c0_6], %1 {strides = array<i32>} : memref<34x96xf32, #tpu.memory_space<vmem>>, vector<32x96xf32>,
    %c0_7 = arith.constant 0 : index
    %c0_8 = arith.constant 0 : index
    %7 = vector.load %arg7[%c0_7, %c0_8] : memref<34x96xf32, #tpu.memory_space<vmem>>, vector<32x96xf32>
    %8 = arith.truncf %7 : vector<32x96xf32> to vector<32x96xbf16>
    %9 = arith.truncf %1 : vector<32x96xf32> to vector<32x96xbf16>
    %c2 = arith.constant 2 : index
    %c0_9 = arith.constant 0 : index
    %10 = vector.load %arg7[%c2, %c0_9] : memref<34x96xf32, #tpu.memory_space<vmem>>, vector<32x96xf32>
    %11 = arith.truncf %10 : vector<32x96xf32> to vector<32x96xbf16>
    %c0_10 = arith.constant 0 : index
    %c0_11 = arith.constant 0 : index
    %12 = vector.load %arg2[%c0_10, %c0_11] : memref<2880x64xbf16, #tpu.memory_space<vmem>>, vector<96x64xbf16>
    %cst_12 = arith.constant dense<0.000000e+00> : vector<32x64xf32>
    %13 = tpu.matmul %8, %12, %cst_12 {dimension_numbers = #tpu.dot_dimension_numbers<[1], [0], [0], [1], [0, 0, 1, 1], [], []>} : vector<32x96xbf16>, vector<96x64xbf16>, vector<32x64xf32> -> vector<32x64xf32>
    %c96 = arith.constant 96 : index
    %c0_13 = arith.constant 0 : index
    %14 = vector.load %arg2[%c96, %c0_13] : memref<2880x64xbf16, #tpu.memory_space<vmem>>, vector<96x64xbf16>
    %cst_14 = arith.constant dense<0.000000e+00> : vector<32x64xf32>
    %15 = tpu.matmul %9, %14, %cst_14 {dimension_numbers = #tpu.dot_dimension_numbers<[1], [0], [0], [1], [0, 0, 1, 1], [], []>} : vector<32x96xbf16>, vector<96x64xbf16>, vector<32x64xf32> -> vector<32x64xf32>
    %16 = arith.addf %13, %15 : vector<32x64xf32>
    %c192 = arith.constant 192 : index
    %c0_15 = arith.constant 0 : index
    %17 = vector.load %arg2[%c192, %c0_15] : memref<2880x64xbf16, #tpu.memory_space<vmem>>, vector<96x64xbf16>
    %cst_16 = arith.constant dense<0.000000e+00> : vector<32x64xf32>
    %18 = tpu.matmul %11, %17, %cst_16 {dimension_numbers = #tpu.dot_dimension_numbers<[1], [0], [0], [1], [0, 0, 1, 1], [], []>} : vector<32x96xbf16>, vector<96x64xbf16>, vector<32x64xf32> -> vector<32x64xf32>
    %19 = arith.addf %16, %18 : vector<32x64xf32>
    %c0_17 = arith.constant 0 : index
    %c0_18 = arith.constant 0 : index
    %20 = vector.load %arg3[%c0_17, %c0_18] : memref<13x64xf32, #tpu.memory_space<vmem>>, vector<1x64xf32>
    %21 = vector.broadcast %20 : vector<1x64xf32> to vector<32x64xf32>
    %22 = arith.addf %19, %21 : vector<32x64xf32>
    %cst_19 = arith.constant 0.000000e+00 : f32
    %23 = vector.broadcast %cst_19 : f32 to vector<32x64xf32>
    %24 = arith.maximumf %22, %23 : vector<32x64xf32>
    %cst_20 = arith.constant 0.000000e+00 : f32
    %25 = vector.broadcast %cst_20 : f32 to vector<1x96xf32>
    %c33_21 = arith.constant 33 : index
    %c0_22 = arith.constant 0 : index
    %26 = vector.load %arg7[%c33_21, %c0_22] : memref<34x96xf32, #tpu.memory_space<vmem>>, vector<1x96xf32>
    tpu.vector_store %arg7[%c33_21, %c0_22], %25 {strides = array<i32>} : memref<34x96xf32, #tpu.memory_space<vmem>>, vector<1x96xf32>,
    %c1_23 = arith.constant 1 : index
    %c0_24 = arith.constant 0 : index
    %27 = vector.load %arg7[%c1_23, %c0_24] : memref<34x96xf32, #tpu.memory_space<vmem>>, vector<32x64xf32>
    tpu.vector_store %arg7[%c1_23, %c0_24], %24 {strides = array<i32>} : memref<34x96xf32, #tpu.memory_space<vmem>>, vector<32x64xf32>,
    %c0_25 = arith.constant 0 : index
    %c0_26 = arith.constant 0 : index
    %28 = vector.load %arg7[%c0_25, %c0_26] : memref<34x96xf32, #tpu.memory_space<vmem>>, vector<32x64xf32>
    %29 = arith.truncf %28 : vector<32x64xf32> to vector<32x64xbf16>
    %30 = arith.truncf %24 : vector<32x64xf32> to vector<32x64xbf16>
    %c2_27 = arith.constant 2 : index
    %c0_28 = arith.constant 0 : index
    %31 = vector.load %arg7[%c2_27, %c0_28] : memref<34x96xf32, #tpu.memory_space<vmem>>, vector<32x64xf32>
    %32 = arith.truncf %31 : vector<32x64xf32> to vector<32x64xbf16>
    %c288 = arith.constant 288 : index
    %c0_29 = arith.constant 0 : index
    %33 = vector.load %arg2[%c288, %c0_29] : memref<2880x64xbf16, #tpu.memory_space<vmem>>, vector<64x32xbf16>
    %cst_30 = arith.constant dense<0.000000e+00> : vector<32x32xf32>
    %34 = tpu.matmul %29, %33, %cst_30 {dimension_numbers = #tpu.dot_dimension_numbers<[1], [0], [0], [1], [0, 0, 1, 1], [], []>} : vector<32x64xbf16>, vector<64x32xbf16>, vector<32x32xf32> -> vector<32x32xf32>
    %c352 = arith.constant 352 : index
    %c0_31 = arith.constant 0 : index
    %35 = vector.load %arg2[%c352, %c0_31] : memref<2880x64xbf16, #tpu.memory_space<vmem>>, vector<64x32xbf16>
    %cst_32 = arith.constant dense<0.000000e+00> : vector<32x32xf32>
    %36 = tpu.matmul %30, %35, %cst_32 {dimension_numbers = #tpu.dot_dimension_numbers<[1], [0], [0], [1], [0, 0, 1, 1], [], []>} : vector<32x64xbf16>, vector<64x32xbf16>, vector<32x32xf32> -> vector<32x32xf32>
    %37 = arith.addf %34, %36 : vector<32x32xf32>
    %c416 = arith.constant 416 : index
    %c0_33 = arith.constant 0 : index
    %38 = vector.load %arg2[%c416, %c0_33] : memref<2880x64xbf16, #tpu.memory_space<vmem>>, vector<64x32xbf16>
    %cst_34 = arith.constant dense<0.000000e+00> : vector<32x32xf32>
    %39 = tpu.matmul %32, %38, %cst_34 {dimension_numbers = #tpu.dot_dimension_numbers<[1], [0], [0], [1], [0, 0, 1, 1], [], []>} : vector<32x64xbf16>, vector<64x32xbf16>, vector<32x32xf32> -> vector<32x32xf32>
    %40 = arith.addf %37, %39 : vector<32x32xf32>
    %c480 = arith.constant 480 : index
    %c0_35 = arith.constant 0 : index
    %41 = vector.load %arg2[%c480, %c0_35] : memref<2880x64xbf16, #tpu.memory_space<vmem>>, vector<64x32xbf16>
    %cst_36 = arith.constant dense<0.000000e+00> : vector<32x32xf32>
    %42 = tpu.matmul %29, %41, %cst_36 {dimension_numbers = #tpu.dot_dimension_numbers<[1], [0], [0], [1], [0, 0, 1, 1], [], []>} : vector<32x64xbf16>, vector<64x32xbf16>, vector<32x32xf32> -> vector<32x32xf32>
    %c544 = arith.constant 544 : index
    %c0_37 = arith.constant 0 : index
    %43 = vector.load %arg2[%c544, %c0_37] : memref<2880x64xbf16, #tpu.memory_space<vmem>>, vector<64x32xbf16>
    %cst_38 = arith.constant dense<0.000000e+00> : vector<32x32xf32>
    %44 = tpu.matmul %30, %43, %cst_38 {dimension_numbers = #tpu.dot_dimension_numbers<[1], [0], [0], [1], [0, 0, 1, 1], [], []>} : vector<32x64xbf16>, vector<64x32xbf16>, vector<32x32xf32> -> vector<32x32xf32>
    %45 = arith.addf %42, %44 : vector<32x32xf32>
    %c608 = arith.constant 608 : index
    %c0_39 = arith.constant 0 : index
    %46 = vector.load %arg2[%c608, %c0_39] : memref<2880x64xbf16, #tpu.memory_space<vmem>>, vector<64x32xbf16>
    %cst_40 = arith.constant dense<0.000000e+00> : vector<32x32xf32>
    %47 = tpu.matmul %32, %46, %cst_40 {dimension_numbers = #tpu.dot_dimension_numbers<[1], [0], [0], [1], [0, 0, 1, 1], [], []>} : vector<32x64xbf16>, vector<64x32xbf16>, vector<32x32xf32> -> vector<32x32xf32>
    %48 = arith.addf %45, %47 : vector<32x32xf32>
    %49 = arith.maximumf %40, %48 : vector<32x32xf32>
    %c1_41 = arith.constant 1 : index
    %c0_42 = arith.constant 0 : index
    %50 = vector.load %arg3[%c1_41, %c0_42] : memref<13x64xf32, #tpu.memory_space<vmem>>, vector<1x32xf32>
    %51 = vector.broadcast %50 : vector<1x32xf32> to vector<32x32xf32>
    %52 = arith.addf %49, %51 : vector<32x32xf32>
    %cst_43 = arith.constant 0.000000e+00 : f32
    %53 = vector.broadcast %cst_43 : f32 to vector<32x32xf32>
    %54 = arith.maximumf %52, %53 : vector<32x32xf32>
    %55 = tpu.iota {dimensions = array<i32: 0>} : vector<16x32xi32>
    %56 = tpu.iota {dimensions = array<i32: 1>} : vector<16x32xi32>
    %c2_i32 = arith.constant 2 : i32
    %57 = vector.broadcast %c2_i32 : i32 to vector<16x32xi32>
    %58 = arith.muli %57, %55 : vector<16x32xi32>
    %59 = arith.cmpi eq, %56, %58 : vector<16x32xi32>
    %60 = arith.extui %59 : vector<16x32xi1> to vector<16x32xi32>
    %61 = arith.sitofp %60 : vector<16x32xi32> to vector<16x32xf32>
    %c2_i32_44 = arith.constant 2 : i32
    %62 = vector.broadcast %c2_i32_44 : i32 to vector<16x32xi32>
    %63 = arith.muli %62, %55 : vector<16x32xi32>
    %c1_i32 = arith.constant 1 : i32
    %64 = vector.broadcast %c1_i32 : i32 to vector<16x32xi32>
    %65 = arith.addi %63, %64 : vector<16x32xi32>
    %66 = arith.cmpi eq, %56, %65 : vector<16x32xi32>
    %67 = arith.extui %66 : vector<16x32xi1> to vector<16x32xi32>
    %68 = arith.sitofp %67 : vector<16x32xi32> to vector<16x32xf32>
    %cst_45 = arith.constant dense<0.000000e+00> : vector<16x32xf32>
    %69 = tpu.matmul %61, %54, %cst_45 {dimension_numbers = #tpu.dot_dimension_numbers<[1], [0], [0], [1], [0, 0, 1, 1], [], []>} : vector<16x32xf32>, vector<32x32xf32>, vector<16x32xf32> -> vector<16x32xf32>
    %cst_46 = arith.constant dense<0.000000e+00> : vector<16x32xf32>
    %70 = tpu.matmul %68, %54, %cst_46 {dimension_numbers = #tpu.dot_dimension_numbers<[1], [0], [0], [1], [0, 0, 1, 1], [], []>} : vector<16x32xf32>, vector<32x32xf32>, vector<16x32xf32> -> vector<16x32xf32>
    %71 = arith.maximumf %69, %70 : vector<16x32xf32>
    %cst_47 = arith.constant 0.000000e+00 : f32
    %72 = vector.broadcast %cst_47 : f32 to vector<1x96xf32>
    %c17 = arith.constant 17 : index
    %c0_48 = arith.constant 0 : index
    %73 = vector.load %arg7[%c17, %c0_48] : memref<34x96xf32, #tpu.memory_space<vmem>>, vector<1x96xf32>
    tpu.vector_store %arg7[%c17, %c0_48], %72 {strides = array<i32>} : memref<34x96xf32, #tpu.memory_space<vmem>>, vector<1x96xf32>,
    %c1_49 = arith.constant 1 : index
    %c0_50 = arith.constant 0 : index
    %74 = vector.load %arg7[%c1_49, %c0_50] : memref<34x96xf32, #tpu.memory_space<vmem>>, vector<16x32xf32>
    tpu.vector_store %arg7[%c1_49, %c0_50], %71 {strides = array<i32>} : memref<34x96xf32, #tpu.memory_space<vmem>>, vector<16x32xf32>,
    %c0_51 = arith.constant 0 : index
    %c0_52 = arith.constant 0 : index
    %75 = vector.load %arg7[%c0_51, %c0_52] : memref<34x96xf32, #tpu.memory_space<vmem>>, vector<16x32xf32>
    %76 = arith.truncf %75 : vector<16x32xf32> to vector<16x32xbf16>
    %77 = arith.truncf %71 : vector<16x32xf32> to vector<16x32xbf16>
    %c2_53 = arith.constant 2 : index
    %c0_54 = arith.constant 0 : index
    %78 = vector.load %arg7[%c2_53, %c0_54] : memref<34x96xf32, #tpu.memory_space<vmem>>, vector<16x32xf32>
    %79 = arith.truncf %78 : vector<16x32xf32> to vector<16x32xbf16>
    %c672 = arith.constant 672 : index
    %c0_55 = arith.constant 0 : index
    %80 = vector.load %arg2[%c672, %c0_55] : memref<2880x64xbf16, #tpu.memory_space<vmem>>, vector<32x64xbf16>
    %cst_56 = arith.constant dense<0.000000e+00> : vector<16x64xf32>
    %81 = tpu.matmul %76, %80, %cst_56 {dimension_numbers = #tpu.dot_dimension_numbers<[1], [0], [0], [1], [0, 0, 1, 1], [], []>} : vector<16x32xbf16>, vector<32x64xbf16>, vector<16x64xf32> -> vector<16x64xf32>
    %c704 = arith.constant 704 : index
    %c0_57 = arith.constant 0 : index
    %82 = vector.load %arg2[%c704, %c0_57] : memref<2880x64xbf16, #tpu.memory_space<vmem>>, vector<32x64xbf16>
    %cst_58 = arith.constant dense<0.000000e+00> : vector<16x64xf32>
    %83 = tpu.matmul %77, %82, %cst_58 {dimension_numbers = #tpu.dot_dimension_numbers<[1], [0], [0], [1], [0, 0, 1, 1], [], []>} : vector<16x32xbf16>, vector<32x64xbf16>, vector<16x64xf32> -> vector<16x64xf32>
    %84 = arith.addf %81, %83 : vector<16x64xf32>
    %c736 = arith.constant 736 : index
    %c0_59 = arith.constant 0 : index
    %85 = vector.load %arg2[%c736, %c0_59] : memref<2880x64xbf16, #tpu.memory_space<vmem>>, vector<32x64xbf16>
    %cst_60 = arith.constant dense<0.000000e+00> : vector<16x64xf32>
    %86 = tpu.matmul %79, %85, %cst_60 {dimension_numbers = #tpu.dot_dimension_numbers<[1], [0], [0], [1], [0, 0, 1, 1], [], []>} : vector<16x32xbf16>, vector<32x64xbf16>, vector<16x64xf32> -> vector<16x64xf32>
    %87 = arith.addf %84, %86 : vector<16x64xf32>
    %c2_61 = arith.constant 2 : index
    %c0_62 = arith.constant 0 : index
    %88 = vector.load %arg3[%c2_61, %c0_62] : memref<13x64xf32, #tpu.memory_space<vmem>>, vector<1x64xf32>
    %89 = vector.broadcast %88 : vector<1x64xf32> to vector<16x64xf32>
    %90 = arith.addf %87, %89 : vector<16x64xf32>
    %cst_63 = arith.constant 0.000000e+00 : f32
    %91 = vector.broadcast %cst_63 : f32 to vector<16x64xf32>
    %92 = arith.maximumf %90, %91 : vector<16x64xf32>
    %cst_64 = arith.constant 0.000000e+00 : f32
    %93 = vector.broadcast %cst_64 : f32 to vector<1x96xf32>
    %c17_65 = arith.constant 17 : index
    %c0_66 = arith.constant 0 : index
    %94 = vector.load %arg7[%c17_65, %c0_66] : memref<34x96xf32, #tpu.memory_space<vmem>>, vector<1x96xf32>
    tpu.vector_store %arg7[%c17_65, %c0_66], %93 {strides = array<i32>} : memref<34x96xf32, #tpu.memory_space<vmem>>, vector<1x96xf32>,
    %c1_67 = arith.constant 1 : index
    %c0_68 = arith.constant 0 : index
    %95 = vector.load %arg7[%c1_67, %c0_68] : memref<34x96xf32, #tpu.memory_space<vmem>>, vector<16x64xf32>
    tpu.vector_store %arg7[%c1_67, %c0_68], %92 {strides = array<i32>} : memref<34x96xf32, #tpu.memory_space<vmem>>, vector<16x64xf32>,
    %c0_69 = arith.constant 0 : index
    %c0_70 = arith.constant 0 : index
    %96 = vector.load %arg7[%c0_69, %c0_70] : memref<34x96xf32, #tpu.memory_space<vmem>>, vector<16x64xf32>
    %97 = arith.truncf %96 : vector<16x64xf32> to vector<16x64xbf16>
    %98 = arith.truncf %92 : vector<16x64xf32> to vector<16x64xbf16>
    %c2_71 = arith.constant 2 : index
    %c0_72 = arith.constant 0 : index
    %99 = vector.load %arg7[%c2_71, %c0_72] : memref<34x96xf32, #tpu.memory_space<vmem>>, vector<16x64xf32>
    %100 = arith.truncf %99 : vector<16x64xf32> to vector<16x64xbf16>
    %c768 = arith.constant 768 : index
    %c0_73 = arith.constant 0 : index
    %101 = vector.load %arg2[%c768, %c0_73] : memref<2880x64xbf16, #tpu.memory_space<vmem>>, vector<64x32xbf16>
    %cst_74 = arith.constant dense<0.000000e+00> : vector<16x32xf32>
    %102 = tpu.matmul %97, %101, %cst_74 {dimension_numbers = #tpu.dot_dimension_numbers<[1], [0], [0], [1], [0, 0, 1, 1], [], []>} : vector<16x64xbf16>, vector<64x32xbf16>, vector<16x32xf32> -> vector<16x32xf32>
    %c832 = arith.constant 832 : index
    %c0_75 = arith.constant 0 : index
    %103 = vector.load %arg2[%c832, %c0_75] : memref<2880x64xbf16, #tpu.memory_space<vmem>>, vector<64x32xbf16>
    %cst_76 = arith.constant dense<0.000000e+00> : vector<16x32xf32>
    %104 = tpu.matmul %98, %103, %cst_76 {dimension_numbers = #tpu.dot_dimension_numbers<[1], [0], [0], [1], [0, 0, 1, 1], [], []>} : vector<16x64xbf16>, vector<64x32xbf16>, vector<16x32xf32> -> vector<16x32xf32>
    %105 = arith.addf %102, %104 : vector<16x32xf32>
    %c896 = arith.constant 896 : index
    %c0_77 = arith.constant 0 : index
    %106 = vector.load %arg2[%c896, %c0_77] : memref<2880x64xbf16, #tpu.memory_space<vmem>>, vector<64x32xbf16>
    %cst_78 = arith.constant dense<0.000000e+00> : vector<16x32xf32>
    %107 = tpu.matmul %100, %106, %cst_78 {dimension_numbers = #tpu.dot_dimension_numbers<[1], [0], [0], [1], [0, 0, 1, 1], [], []>} : vector<16x64xbf16>, vector<64x32xbf16>, vector<16x32xf32> -> vector<16x32xf32>
    %108 = arith.addf %105, %107 : vector<16x32xf32>
    %c960 = arith.constant 960 : index
    %c0_79 = arith.constant 0 : index
    %109 = vector.load %arg2[%c960, %c0_79] : memref<2880x64xbf16, #tpu.memory_space<vmem>>, vector<64x32xbf16>
    %cst_80 = arith.constant dense<0.000000e+00> : vector<16x32xf32>
    %110 = tpu.matmul %97, %109, %cst_80 {dimension_numbers = #tpu.dot_dimension_numbers<[1], [0], [0], [1], [0, 0, 1, 1], [], []>} : vector<16x64xbf16>, vector<64x32xbf16>, vector<16x32xf32> -> vector<16x32xf32>
    %c1024 = arith.constant 1024 : index
    %c0_81 = arith.constant 0 : index
    %111 = vector.load %arg2[%c1024, %c0_81] : memref<2880x64xbf16, #tpu.memory_space<vmem>>, vector<64x32xbf16>
    %cst_82 = arith.constant dense<0.000000e+00> : vector<16x32xf32>
    %112 = tpu.matmul %98, %111, %cst_82 {dimension_numbers = #tpu.dot_dimension_numbers<[1], [0], [0], [1], [0, 0, 1, 1], [], []>} : vector<16x64xbf16>, vector<64x32xbf16>, vector<16x32xf32> -> vector<16x32xf32>
    %113 = arith.addf %110, %112 : vector<16x32xf32>
    %c1088 = arith.constant 1088 : index
    %c0_83 = arith.constant 0 : index
    %114 = vector.load %arg2[%c1088, %c0_83] : memref<2880x64xbf16, #tpu.memory_space<vmem>>, vector<64x32xbf16>
    %cst_84 = arith.constant dense<0.000000e+00> : vector<16x32xf32>
    %115 = tpu.matmul %100, %114, %cst_84 {dimension_numbers = #tpu.dot_dimension_numbers<[1], [0], [0], [1], [0, 0, 1, 1], [], []>} : vector<16x64xbf16>, vector<64x32xbf16>, vector<16x32xf32> -> vector<16x32xf32>
    %116 = arith.addf %113, %115 : vector<16x32xf32>
    %117 = arith.maximumf %108, %116 : vector<16x32xf32>
    %c3 = arith.constant 3 : index
    %c0_85 = arith.constant 0 : index
    %118 = vector.load %arg3[%c3, %c0_85] : memref<13x64xf32, #tpu.memory_space<vmem>>, vector<1x32xf32>
    %119 = vector.broadcast %118 : vector<1x32xf32> to vector<16x32xf32>
    %120 = arith.addf %117, %119 : vector<16x32xf32>
    %cst_86 = arith.constant 0.000000e+00 : f32
    %121 = vector.broadcast %cst_86 : f32 to vector<16x32xf32>
    %122 = arith.maximumf %120, %121 : vector<16x32xf32>
    %123 = tpu.iota {dimensions = array<i32: 0>} : vector<8x16xi32>
    %124 = tpu.iota {dimensions = array<i32: 1>} : vector<8x16xi32>
    %c2_i32_87 = arith.constant 2 : i32
    %125 = vector.broadcast %c2_i32_87 : i32 to vector<8x16xi32>
    %126 = arith.muli %125, %123 : vector<8x16xi32>
    %127 = arith.cmpi eq, %124, %126 : vector<8x16xi32>
    %128 = arith.extui %127 : vector<8x16xi1> to vector<8x16xi32>
    %129 = arith.sitofp %128 : vector<8x16xi32> to vector<8x16xf32>
    %c2_i32_88 = arith.constant 2 : i32
    %130 = vector.broadcast %c2_i32_88 : i32 to vector<8x16xi32>
    %131 = arith.muli %130, %123 : vector<8x16xi32>
    %c1_i32_89 = arith.constant 1 : i32
    %132 = vector.broadcast %c1_i32_89 : i32 to vector<8x16xi32>
    %133 = arith.addi %131, %132 : vector<8x16xi32>
    %134 = arith.cmpi eq, %124, %133 : vector<8x16xi32>
    %135 = arith.extui %134 : vector<8x16xi1> to vector<8x16xi32>
    %136 = arith.sitofp %135 : vector<8x16xi32> to vector<8x16xf32>
    %cst_90 = arith.constant dense<0.000000e+00> : vector<8x32xf32>
    %137 = tpu.matmul %129, %122, %cst_90 {dimension_numbers = #tpu.dot_dimension_numbers<[1], [0], [0], [1], [0, 0, 1, 1], [], []>} : vector<8x16xf32>, vector<16x32xf32>, vector<8x32xf32> -> vector<8x32xf32>
    %cst_91 = arith.constant dense<0.000000e+00> : vector<8x32xf32>
    %138 = tpu.matmul %136, %122, %cst_91 {dimension_numbers = #tpu.dot_dimension_numbers<[1], [0], [0], [1], [0, 0, 1, 1], [], []>} : vector<8x16xf32>, vector<16x32xf32>, vector<8x32xf32> -> vector<8x32xf32>
    %139 = arith.maximumf %137, %138 : vector<8x32xf32>
    %cst_92 = arith.constant 0.000000e+00 : f32
    %140 = vector.broadcast %cst_92 : f32 to vector<1x96xf32>
    %c9 = arith.constant 9 : index
    %c0_93 = arith.constant 0 : index
    %141 = vector.load %arg7[%c9, %c0_93] : memref<34x96xf32, #tpu.memory_space<vmem>>, vector<1x96xf32>
    tpu.vector_store %arg7[%c9, %c0_93], %140 {strides = array<i32>} : memref<34x96xf32, #tpu.memory_space<vmem>>, vector<1x96xf32>,
    %c1_94 = arith.constant 1 : index
    %c0_95 = arith.constant 0 : index
    %142 = vector.load %arg7[%c1_94, %c0_95] : memref<34x96xf32, #tpu.memory_space<vmem>>, vector<8x32xf32>
    tpu.vector_store %arg7[%c1_94, %c0_95], %139 {strides = array<i32>} : memref<34x96xf32, #tpu.memory_space<vmem>>, vector<8x32xf32>,
    %c0_96 = arith.constant 0 : index
    %c0_97 = arith.constant 0 : index
    %143 = vector.load %arg7[%c0_96, %c0_97] : memref<34x96xf32, #tpu.memory_space<vmem>>, vector<8x32xf32>
    %144 = arith.truncf %143 : vector<8x32xf32> to vector<8x32xbf16>
    %145 = arith.truncf %139 : vector<8x32xf32> to vector<8x32xbf16>
    %c2_98 = arith.constant 2 : index
    %c0_99 = arith.constant 0 : index
    %146 = vector.load %arg7[%c2_98, %c0_99] : memref<34x96xf32, #tpu.memory_space<vmem>>, vector<8x32xf32>
    %147 = arith.truncf %146 : vector<8x32xf32> to vector<8x32xbf16>
    %c1152 = arith.constant 1152 : index
    %c0_100 = arith.constant 0 : index
    %148 = vector.load %arg2[%c1152, %c0_100] : memref<2880x64xbf16, #tpu.memory_space<vmem>>, vector<32x64xbf16>
    %cst_101 = arith.constant dense<0.000000e+00> : vector<8x64xf32>
    %149 = tpu.matmul %144, %148, %cst_101 {dimension_numbers = #tpu.dot_dimension_numbers<[1], [0], [0], [1], [0, 0, 1, 1], [], []>} : vector<8x32xbf16>, vector<32x64xbf16>, vector<8x64xf32> -> vector<8x64xf32>
    %c1184 = arith.constant 1184 : index
    %c0_102 = arith.constant 0 : index
    %150 = vector.load %arg2[%c1184, %c0_102] : memref<2880x64xbf16, #tpu.memory_space<vmem>>, vector<32x64xbf16>
    %cst_103 = arith.constant dense<0.000000e+00> : vector<8x64xf32>
    %151 = tpu.matmul %145, %150, %cst_103 {dimension_numbers = #tpu.dot_dimension_numbers<[1], [0], [0], [1], [0, 0, 1, 1], [], []>} : vector<8x32xbf16>, vector<32x64xbf16>, vector<8x64xf32> -> vector<8x64xf32>
    %152 = arith.addf %149, %151 : vector<8x64xf32>
    %c1216 = arith.constant 1216 : index
    %c0_104 = arith.constant 0 : index
    %153 = vector.load %arg2[%c1216, %c0_104] : memref<2880x64xbf16, #tpu.memory_space<vmem>>, vector<32x64xbf16>
    %cst_105 = arith.constant dense<0.000000e+00> : vector<8x64xf32>
    %154 = tpu.matmul %147, %153, %cst_105 {dimension_numbers = #tpu.dot_dimension_numbers<[1], [0], [0], [1], [0, 0, 1, 1], [], []>} : vector<8x32xbf16>, vector<32x64xbf16>, vector<8x64xf32> -> vector<8x64xf32>
    %155 = arith.addf %152, %154 : vector<8x64xf32>
    %c4 = arith.constant 4 : index
    %c0_106 = arith.constant 0 : index
    %156 = vector.load %arg3[%c4, %c0_106] : memref<13x64xf32, #tpu.memory_space<vmem>>, vector<1x64xf32>
    %157 = vector.broadcast %156 : vector<1x64xf32> to vector<8x64xf32>
    %158 = arith.addf %155, %157 : vector<8x64xf32>
    %cst_107 = arith.constant 0.000000e+00 : f32
    %159 = vector.broadcast %cst_107 : f32 to vector<8x64xf32>
    %160 = arith.maximumf %158, %159 : vector<8x64xf32>
    %cst_108 = arith.constant 0.000000e+00 : f32
    %161 = vector.broadcast %cst_108 : f32 to vector<1x96xf32>
    %c9_109 = arith.constant 9 : index
    %c0_110 = arith.constant 0 : index
    %162 = vector.load %arg7[%c9_109, %c0_110] : memref<34x96xf32, #tpu.memory_space<vmem>>, vector<1x96xf32>
    tpu.vector_store %arg7[%c9_109, %c0_110], %161 {strides = array<i32>} : memref<34x96xf32, #tpu.memory_space<vmem>>, vector<1x96xf32>,
    %c1_111 = arith.constant 1 : index
    %c0_112 = arith.constant 0 : index
    %163 = vector.load %arg7[%c1_111, %c0_112] : memref<34x96xf32, #tpu.memory_space<vmem>>, vector<8x64xf32>
    tpu.vector_store %arg7[%c1_111, %c0_112], %160 {strides = array<i32>} : memref<34x96xf32, #tpu.memory_space<vmem>>, vector<8x64xf32>,
    %c0_113 = arith.constant 0 : index
    %c0_114 = arith.constant 0 : index
    %164 = vector.load %arg7[%c0_113, %c0_114] : memref<34x96xf32, #tpu.memory_space<vmem>>, vector<8x64xf32>
    %165 = arith.truncf %164 : vector<8x64xf32> to vector<8x64xbf16>
    %166 = arith.truncf %160 : vector<8x64xf32> to vector<8x64xbf16>
    %c2_115 = arith.constant 2 : index
    %c0_116 = arith.constant 0 : index
    %167 = vector.load %arg7[%c2_115, %c0_116] : memref<34x96xf32, #tpu.memory_space<vmem>>, vector<8x64xf32>
    %168 = arith.truncf %167 : vector<8x64xf32> to vector<8x64xbf16>
    %c1248 = arith.constant 1248 : index
    %c0_117 = arith.constant 0 : index
    %169 = vector.load %arg2[%c1248, %c0_117] : memref<2880x64xbf16, #tpu.memory_space<vmem>>, vector<64x64xbf16>
    %cst_118 = arith.constant dense<0.000000e+00> : vector<8x64xf32>
    %170 = tpu.matmul %165, %169, %cst_118 {dimension_numbers = #tpu.dot_dimension_numbers<[1], [0], [0], [1], [0, 0, 1, 1], [], []>} : vector<8x64xbf16>, vector<64x64xbf16>, vector<8x64xf32> -> vector<8x64xf32>
    %c1312 = arith.constant 1312 : index
    %c0_119 = arith.constant 0 : index
    %171 = vector.load %arg2[%c1312, %c0_119] : memref<2880x64xbf16, #tpu.memory_space<vmem>>, vector<64x64xbf16>
    %cst_120 = arith.constant dense<0.000000e+00> : vector<8x64xf32>
    %172 = tpu.matmul %166, %171, %cst_120 {dimension_numbers = #tpu.dot_dimension_numbers<[1], [0], [0], [1], [0, 0, 1, 1], [], []>} : vector<8x64xbf16>, vector<64x64xbf16>, vector<8x64xf32> -> vector<8x64xf32>
    %173 = arith.addf %170, %172 : vector<8x64xf32>
    %c1376 = arith.constant 1376 : index
    %c0_121 = arith.constant 0 : index
    %174 = vector.load %arg2[%c1376, %c0_121] : memref<2880x64xbf16, #tpu.memory_space<vmem>>, vector<64x64xbf16>
    %cst_122 = arith.constant dense<0.000000e+00> : vector<8x64xf32>
    %175 = tpu.matmul %168, %174, %cst_122 {dimension_numbers = #tpu.dot_dimension_numbers<[1], [0], [0], [1], [0, 0, 1, 1], [], []>} : vector<8x64xbf16>, vector<64x64xbf16>, vector<8x64xf32> -> vector<8x64xf32>
    %176 = arith.addf %173, %175 : vector<8x64xf32>
    %c5 = arith.constant 5 : index
    %c0_123 = arith.constant 0 : index
    %177 = vector.load %arg3[%c5, %c0_123] : memref<13x64xf32, #tpu.memory_space<vmem>>, vector<1x64xf32>
    %178 = vector.broadcast %177 : vector<1x64xf32> to vector<8x64xf32>
    %179 = arith.addf %176, %178 : vector<8x64xf32>
    %cst_124 = arith.constant 0.000000e+00 : f32
    %180 = vector.broadcast %cst_124 : f32 to vector<8x64xf32>
    %181 = arith.maximumf %179, %180 : vector<8x64xf32>
    %cst_125 = arith.constant 0.000000e+00 : f32
    %182 = vector.broadcast %cst_125 : f32 to vector<1x96xf32>
    %c9_126 = arith.constant 9 : index
    %c0_127 = arith.constant 0 : index
    %183 = vector.load %arg7[%c9_126, %c0_127] : memref<34x96xf32, #tpu.memory_space<vmem>>, vector<1x96xf32>
    tpu.vector_store %arg7[%c9_126, %c0_127], %182 {strides = array<i32>} : memref<34x96xf32, #tpu.memory_space<vmem>>, vector<1x96xf32>,
    %c1_128 = arith.constant 1 : index
    %c0_129 = arith.constant 0 : index
    %184 = vector.load %arg7[%c1_128, %c0_129] : memref<34x96xf32, #tpu.memory_space<vmem>>, vector<8x64xf32>
    tpu.vector_store %arg7[%c1_128, %c0_129], %181 {strides = array<i32>} : memref<34x96xf32, #tpu.memory_space<vmem>>, vector<8x64xf32>,
    %c0_130 = arith.constant 0 : index
    %c0_131 = arith.constant 0 : index
    %185 = vector.load %arg7[%c0_130, %c0_131] : memref<34x96xf32, #tpu.memory_space<vmem>>, vector<8x64xf32>
    %186 = arith.truncf %185 : vector<8x64xf32> to vector<8x64xbf16>
    %187 = arith.truncf %181 : vector<8x64xf32> to vector<8x64xbf16>
    %c2_132 = arith.constant 2 : index
    %c0_133 = arith.constant 0 : index
    %188 = vector.load %arg7[%c2_132, %c0_133] : memref<34x96xf32, #tpu.memory_space<vmem>>, vector<8x64xf32>
    %189 = arith.truncf %188 : vector<8x64xf32> to vector<8x64xbf16>
    %c1440 = arith.constant 1440 : index
    %c0_134 = arith.constant 0 : index
    %190 = vector.load %arg2[%c1440, %c0_134] : memref<2880x64xbf16, #tpu.memory_space<vmem>>, vector<64x32xbf16>
    %cst_135 = arith.constant dense<0.000000e+00> : vector<8x32xf32>
    %191 = tpu.matmul %186, %190, %cst_135 {dimension_numbers = #tpu.dot_dimension_numbers<[1], [0], [0], [1], [0, 0, 1, 1], [], []>} : vector<8x64xbf16>, vector<64x32xbf16>, vector<8x32xf32> -> vector<8x32xf32>
    %c1504 = arith.constant 1504 : index
    %c0_136 = arith.constant 0 : index
    %192 = vector.load %arg2[%c1504, %c0_136] : memref<2880x64xbf16, #tpu.memory_space<vmem>>, vector<64x32xbf16>
    %cst_137 = arith.constant dense<0.000000e+00> : vector<8x32xf32>
    %193 = tpu.matmul %187, %192, %cst_137 {dimension_numbers = #tpu.dot_dimension_numbers<[1], [0], [0], [1], [0, 0, 1, 1], [], []>} : vector<8x64xbf16>, vector<64x32xbf16>, vector<8x32xf32> -> vector<8x32xf32>
    %194 = arith.addf %191, %193 : vector<8x32xf32>
    %c1568 = arith.constant 1568 : index
    %c0_138 = arith.constant 0 : index
    %195 = vector.load %arg2[%c1568, %c0_138] : memref<2880x64xbf16, #tpu.memory_space<vmem>>, vector<64x32xbf16>
    %cst_139 = arith.constant dense<0.000000e+00> : vector<8x32xf32>
    %196 = tpu.matmul %189, %195, %cst_139 {dimension_numbers = #tpu.dot_dimension_numbers<[1], [0], [0], [1], [0, 0, 1, 1], [], []>} : vector<8x64xbf16>, vector<64x32xbf16>, vector<8x32xf32> -> vector<8x32xf32>
    %197 = arith.addf %194, %196 : vector<8x32xf32>
    %c1632 = arith.constant 1632 : index
    %c0_140 = arith.constant 0 : index
    %198 = vector.load %arg2[%c1632, %c0_140] : memref<2880x64xbf16, #tpu.memory_space<vmem>>, vector<64x32xbf16>
    %cst_141 = arith.constant dense<0.000000e+00> : vector<8x32xf32>
    %199 = tpu.matmul %186, %198, %cst_141 {dimension_numbers = #tpu.dot_dimension_numbers<[1], [0], [0], [1], [0, 0, 1, 1], [], []>} : vector<8x64xbf16>, vector<64x32xbf16>, vector<8x32xf32> -> vector<8x32xf32>
    %c1696 = arith.constant 1696 : index
    %c0_142 = arith.constant 0 : index
    %200 = vector.load %arg2[%c1696, %c0_142] : memref<2880x64xbf16, #tpu.memory_space<vmem>>, vector<64x32xbf16>
    %cst_143 = arith.constant dense<0.000000e+00> : vector<8x32xf32>
    %201 = tpu.matmul %187, %200, %cst_143 {dimension_numbers = #tpu.dot_dimension_numbers<[1], [0], [0], [1], [0, 0, 1, 1], [], []>} : vector<8x64xbf16>, vector<64x32xbf16>, vector<8x32xf32> -> vector<8x32xf32>
    %202 = arith.addf %199, %201 : vector<8x32xf32>
    %c1760 = arith.constant 1760 : index
    %c0_144 = arith.constant 0 : index
    %203 = vector.load %arg2[%c1760, %c0_144] : memref<2880x64xbf16, #tpu.memory_space<vmem>>, vector<64x32xbf16>
    %cst_145 = arith.constant dense<0.000000e+00> : vector<8x32xf32>
    %204 = tpu.matmul %189, %203, %cst_145 {dimension_numbers = #tpu.dot_dimension_numbers<[1], [0], [0], [1], [0, 0, 1, 1], [], []>} : vector<8x64xbf16>, vector<64x32xbf16>, vector<8x32xf32> -> vector<8x32xf32>
    %205 = arith.addf %202, %204 : vector<8x32xf32>
    %206 = arith.maximumf %197, %205 : vector<8x32xf32>
    %c6 = arith.constant 6 : index
    %c0_146 = arith.constant 0 : index
    %207 = vector.load %arg3[%c6, %c0_146] : memref<13x64xf32, #tpu.memory_space<vmem>>, vector<1x32xf32>
    %208 = vector.broadcast %207 : vector<1x32xf32> to vector<8x32xf32>
    %209 = arith.addf %206, %208 : vector<8x32xf32>
    %cst_147 = arith.constant 0.000000e+00 : f32
    %210 = vector.broadcast %cst_147 : f32 to vector<8x32xf32>
    %211 = arith.maximumf %209, %210 : vector<8x32xf32>
    %212 = tpu.iota {dimensions = array<i32: 0>} : vector<4x8xi32>
    %213 = tpu.iota {dimensions = array<i32: 1>} : vector<4x8xi32>
    %c2_i32_148 = arith.constant 2 : i32
    %214 = vector.broadcast %c2_i32_148 : i32 to vector<4x8xi32>
    %215 = arith.muli %214, %212 : vector<4x8xi32>
    %216 = arith.cmpi eq, %213, %215 : vector<4x8xi32>
    %217 = arith.extui %216 : vector<4x8xi1> to vector<4x8xi32>
    %218 = arith.sitofp %217 : vector<4x8xi32> to vector<4x8xf32>
    %c2_i32_149 = arith.constant 2 : i32
    %219 = vector.broadcast %c2_i32_149 : i32 to vector<4x8xi32>
    %220 = arith.muli %219, %212 : vector<4x8xi32>
    %c1_i32_150 = arith.constant 1 : i32
    %221 = vector.broadcast %c1_i32_150 : i32 to vector<4x8xi32>
    %222 = arith.addi %220, %221 : vector<4x8xi32>
    %223 = arith.cmpi eq, %213, %222 : vector<4x8xi32>
    %224 = arith.extui %223 : vector<4x8xi1> to vector<4x8xi32>
    %225 = arith.sitofp %224 : vector<4x8xi32> to vector<4x8xf32>
    %cst_151 = arith.constant dense<0.000000e+00> : vector<4x32xf32>
    %226 = tpu.matmul %218, %211, %cst_151 {dimension_numbers = #tpu.dot_dimension_numbers<[1], [0], [0], [1], [0, 0, 1, 1], [], []>} : vector<4x8xf32>, vector<8x32xf32>, vector<4x32xf32> -> vector<4x32xf32>
    %cst_152 = arith.constant dense<0.000000e+00> : vector<4x32xf32>
    %227 = tpu.matmul %225, %211, %cst_152 {dimension_numbers = #tpu.dot_dimension_numbers<[1], [0], [0], [1], [0, 0, 1, 1], [], []>} : vector<4x8xf32>, vector<8x32xf32>, vector<4x32xf32> -> vector<4x32xf32>
    %228 = arith.maximumf %226, %227 : vector<4x32xf32>
    %cst_153 = arith.constant 0.000000e+00 : f32
    %229 = vector.broadcast %cst_153 : f32 to vector<1x96xf32>
    %c5_154 = arith.constant 5 : index
    %c0_155 = arith.constant 0 : index
    %230 = vector.load %arg7[%c5_154, %c0_155] : memref<34x96xf32, #tpu.memory_space<vmem>>, vector<1x96xf32>
    tpu.vector_store %arg7[%c5_154, %c0_155], %229 {strides = array<i32>} : memref<34x96xf32, #tpu.memory_space<vmem>>, vector<1x96xf32>,
    %c1_156 = arith.constant 1 : index
    %c0_157 = arith.constant 0 : index
    %231 = vector.load %arg7[%c1_156, %c0_157] : memref<34x96xf32, #tpu.memory_space<vmem>>, vector<4x32xf32>
    tpu.vector_store %arg7[%c1_156, %c0_157], %228 {strides = array<i32>} : memref<34x96xf32, #tpu.memory_space<vmem>>, vector<4x32xf32>,
    %c0_158 = arith.constant 0 : index
    %c0_159 = arith.constant 0 : index
    %232 = vector.load %arg7[%c0_158, %c0_159] : memref<34x96xf32, #tpu.memory_space<vmem>>, vector<4x32xf32>
    %233 = arith.truncf %232 : vector<4x32xf32> to vector<4x32xbf16>
    %234 = arith.truncf %228 : vector<4x32xf32> to vector<4x32xbf16>
    %c2_160 = arith.constant 2 : index
    %c0_161 = arith.constant 0 : index
    %235 = vector.load %arg7[%c2_160, %c0_161] : memref<34x96xf32, #tpu.memory_space<vmem>>, vector<4x32xf32>
    %236 = arith.truncf %235 : vector<4x32xf32> to vector<4x32xbf16>
    %c1824 = arith.constant 1824 : index
    %c0_162 = arith.constant 0 : index
    %237 = vector.load %arg2[%c1824, %c0_162] : memref<2880x64xbf16, #tpu.memory_space<vmem>>, vector<32x64xbf16>
    %cst_163 = arith.constant dense<0.000000e+00> : vector<4x64xf32>
    %238 = tpu.matmul %233, %237, %cst_163 {dimension_numbers = #tpu.dot_dimension_numbers<[1], [0], [0], [1], [0, 0, 1, 1], [], []>} : vector<4x32xbf16>, vector<32x64xbf16>, vector<4x64xf32> -> vector<4x64xf32>
    %c1856 = arith.constant 1856 : index
    %c0_164 = arith.constant 0 : index
    %239 = vector.load %arg2[%c1856, %c0_164] : memref<2880x64xbf16, #tpu.memory_space<vmem>>, vector<32x64xbf16>
    %cst_165 = arith.constant dense<0.000000e+00> : vector<4x64xf32>
    %240 = tpu.matmul %234, %239, %cst_165 {dimension_numbers = #tpu.dot_dimension_numbers<[1], [0], [0], [1], [0, 0, 1, 1], [], []>} : vector<4x32xbf16>, vector<32x64xbf16>, vector<4x64xf32> -> vector<4x64xf32>
    %241 = arith.addf %238, %240 : vector<4x64xf32>
    %c1888 = arith.constant 1888 : index
    %c0_166 = arith.constant 0 : index
    %242 = vector.load %arg2[%c1888, %c0_166] : memref<2880x64xbf16, #tpu.memory_space<vmem>>, vector<32x64xbf16>
    %cst_167 = arith.constant dense<0.000000e+00> : vector<4x64xf32>
    %243 = tpu.matmul %236, %242, %cst_167 {dimension_numbers = #tpu.dot_dimension_numbers<[1], [0], [0], [1], [0, 0, 1, 1], [], []>} : vector<4x32xbf16>, vector<32x64xbf16>, vector<4x64xf32> -> vector<4x64xf32>
    %244 = arith.addf %241, %243 : vector<4x64xf32>
    %c7 = arith.constant 7 : index
    %c0_168 = arith.constant 0 : index
    %245 = vector.load %arg3[%c7, %c0_168] : memref<13x64xf32, #tpu.memory_space<vmem>>, vector<1x64xf32>
    %246 = vector.broadcast %245 : vector<1x64xf32> to vector<4x64xf32>
    %247 = arith.addf %244, %246 : vector<4x64xf32>
    %cst_169 = arith.constant 0.000000e+00 : f32
    %248 = vector.broadcast %cst_169 : f32 to vector<4x64xf32>
    %249 = arith.maximumf %247, %248 : vector<4x64xf32>
    %cst_170 = arith.constant 0.000000e+00 : f32
    %250 = vector.broadcast %cst_170 : f32 to vector<1x96xf32>
    %c5_171 = arith.constant 5 : index
    %c0_172 = arith.constant 0 : index
    %251 = vector.load %arg7[%c5_171, %c0_172] : memref<34x96xf32, #tpu.memory_space<vmem>>, vector<1x96xf32>
    tpu.vector_store %arg7[%c5_171, %c0_172], %250 {strides = array<i32>} : memref<34x96xf32, #tpu.memory_space<vmem>>, vector<1x96xf32>,
    %c1_173 = arith.constant 1 : index
    %c0_174 = arith.constant 0 : index
    %252 = vector.load %arg7[%c1_173, %c0_174] : memref<34x96xf32, #tpu.memory_space<vmem>>, vector<4x64xf32>
    tpu.vector_store %arg7[%c1_173, %c0_174], %249 {strides = array<i32>} : memref<34x96xf32, #tpu.memory_space<vmem>>, vector<4x64xf32>,
    %c0_175 = arith.constant 0 : index
    %c0_176 = arith.constant 0 : index
    %253 = vector.load %arg7[%c0_175, %c0_176] : memref<34x96xf32, #tpu.memory_space<vmem>>, vector<4x64xf32>
    %254 = arith.truncf %253 : vector<4x64xf32> to vector<4x64xbf16>
    %255 = arith.truncf %249 : vector<4x64xf32> to vector<4x64xbf16>
    %c2_177 = arith.constant 2 : index
    %c0_178 = arith.constant 0 : index
    %256 = vector.load %arg7[%c2_177, %c0_178] : memref<34x96xf32, #tpu.memory_space<vmem>>, vector<4x64xf32>
    %257 = arith.truncf %256 : vector<4x64xf32> to vector<4x64xbf16>
    %c1920 = arith.constant 1920 : index
    %c0_179 = arith.constant 0 : index
    %258 = vector.load %arg2[%c1920, %c0_179] : memref<2880x64xbf16, #tpu.memory_space<vmem>>, vector<64x64xbf16>
    %cst_180 = arith.constant dense<0.000000e+00> : vector<4x64xf32>
    %259 = tpu.matmul %254, %258, %cst_180 {dimension_numbers = #tpu.dot_dimension_numbers<[1], [0], [0], [1], [0, 0, 1, 1], [], []>} : vector<4x64xbf16>, vector<64x64xbf16>, vector<4x64xf32> -> vector<4x64xf32>
    %c1984 = arith.constant 1984 : index
    %c0_181 = arith.constant 0 : index
    %260 = vector.load %arg2[%c1984, %c0_181] : memref<2880x64xbf16, #tpu.memory_space<vmem>>, vector<64x64xbf16>
    %cst_182 = arith.constant dense<0.000000e+00> : vector<4x64xf32>
    %261 = tpu.matmul %255, %260, %cst_182 {dimension_numbers = #tpu.dot_dimension_numbers<[1], [0], [0], [1], [0, 0, 1, 1], [], []>} : vector<4x64xbf16>, vector<64x64xbf16>, vector<4x64xf32> -> vector<4x64xf32>
    %262 = arith.addf %259, %261 : vector<4x64xf32>
    %c2048 = arith.constant 2048 : index
    %c0_183 = arith.constant 0 : index
    %263 = vector.load %arg2[%c2048, %c0_183] : memref<2880x64xbf16, #tpu.memory_space<vmem>>, vector<64x64xbf16>
    %cst_184 = arith.constant dense<0.000000e+00> : vector<4x64xf32>
    %264 = tpu.matmul %257, %263, %cst_184 {dimension_numbers = #tpu.dot_dimension_numbers<[1], [0], [0], [1], [0, 0, 1, 1], [], []>} : vector<4x64xbf16>, vector<64x64xbf16>, vector<4x64xf32> -> vector<4x64xf32>
    %265 = arith.addf %262, %264 : vector<4x64xf32>
    %c8 = arith.constant 8 : index
    %c0_185 = arith.constant 0 : index
    %266 = vector.load %arg3[%c8, %c0_185] : memref<13x64xf32, #tpu.memory_space<vmem>>, vector<1x64xf32>
    %267 = vector.broadcast %266 : vector<1x64xf32> to vector<4x64xf32>
    %268 = arith.addf %265, %267 : vector<4x64xf32>
    %cst_186 = arith.constant 0.000000e+00 : f32
    %269 = vector.broadcast %cst_186 : f32 to vector<4x64xf32>
    %270 = arith.maximumf %268, %269 : vector<4x64xf32>
    %cst_187 = arith.constant 0.000000e+00 : f32
    %271 = vector.broadcast %cst_187 : f32 to vector<1x96xf32>
    %c5_188 = arith.constant 5 : index
    %c0_189 = arith.constant 0 : index
    %272 = vector.load %arg7[%c5_188, %c0_189] : memref<34x96xf32, #tpu.memory_space<vmem>>, vector<1x96xf32>
    tpu.vector_store %arg7[%c5_188, %c0_189], %271 {strides = array<i32>} : memref<34x96xf32, #tpu.memory_space<vmem>>, vector<1x96xf32>,
    %c1_190 = arith.constant 1 : index
    %c0_191 = arith.constant 0 : index
    %273 = vector.load %arg7[%c1_190, %c0_191] : memref<34x96xf32, #tpu.memory_space<vmem>>, vector<4x64xf32>
    tpu.vector_store %arg7[%c1_190, %c0_191], %270 {strides = array<i32>} : memref<34x96xf32, #tpu.memory_space<vmem>>, vector<4x64xf32>,
    %c0_192 = arith.constant 0 : index
    %c0_193 = arith.constant 0 : index
    %274 = vector.load %arg7[%c0_192, %c0_193] : memref<34x96xf32, #tpu.memory_space<vmem>>, vector<4x64xf32>
    %275 = arith.truncf %274 : vector<4x64xf32> to vector<4x64xbf16>
    %276 = arith.truncf %270 : vector<4x64xf32> to vector<4x64xbf16>
    %c2_194 = arith.constant 2 : index
    %c0_195 = arith.constant 0 : index
    %277 = vector.load %arg7[%c2_194, %c0_195] : memref<34x96xf32, #tpu.memory_space<vmem>>, vector<4x64xf32>
    %278 = arith.truncf %277 : vector<4x64xf32> to vector<4x64xbf16>
    %c2112 = arith.constant 2112 : index
    %c0_196 = arith.constant 0 : index
    %279 = vector.load %arg2[%c2112, %c0_196] : memref<2880x64xbf16, #tpu.memory_space<vmem>>, vector<64x32xbf16>
    %cst_197 = arith.constant dense<0.000000e+00> : vector<4x32xf32>
    %280 = tpu.matmul %275, %279, %cst_197 {dimension_numbers = #tpu.dot_dimension_numbers<[1], [0], [0], [1], [0, 0, 1, 1], [], []>} : vector<4x64xbf16>, vector<64x32xbf16>, vector<4x32xf32> -> vector<4x32xf32>
    %c2176 = arith.constant 2176 : index
    %c0_198 = arith.constant 0 : index
    %281 = vector.load %arg2[%c2176, %c0_198] : memref<2880x64xbf16, #tpu.memory_space<vmem>>, vector<64x32xbf16>
    %cst_199 = arith.constant dense<0.000000e+00> : vector<4x32xf32>
    %282 = tpu.matmul %276, %281, %cst_199 {dimension_numbers = #tpu.dot_dimension_numbers<[1], [0], [0], [1], [0, 0, 1, 1], [], []>} : vector<4x64xbf16>, vector<64x32xbf16>, vector<4x32xf32> -> vector<4x32xf32>
    %283 = arith.addf %280, %282 : vector<4x32xf32>
    %c2240 = arith.constant 2240 : index
    %c0_200 = arith.constant 0 : index
    %284 = vector.load %arg2[%c2240, %c0_200] : memref<2880x64xbf16, #tpu.memory_space<vmem>>, vector<64x32xbf16>
    %cst_201 = arith.constant dense<0.000000e+00> : vector<4x32xf32>
    %285 = tpu.matmul %278, %284, %cst_201 {dimension_numbers = #tpu.dot_dimension_numbers<[1], [0], [0], [1], [0, 0, 1, 1], [], []>} : vector<4x64xbf16>, vector<64x32xbf16>, vector<4x32xf32> -> vector<4x32xf32>
    %286 = arith.addf %283, %285 : vector<4x32xf32>
    %c2304 = arith.constant 2304 : index
    %c0_202 = arith.constant 0 : index
    %287 = vector.load %arg2[%c2304, %c0_202] : memref<2880x64xbf16, #tpu.memory_space<vmem>>, vector<64x32xbf16>
    %cst_203 = arith.constant dense<0.000000e+00> : vector<4x32xf32>
    %288 = tpu.matmul %275, %287, %cst_203 {dimension_numbers = #tpu.dot_dimension_numbers<[1], [0], [0], [1], [0, 0, 1, 1], [], []>} : vector<4x64xbf16>, vector<64x32xbf16>, vector<4x32xf32> -> vector<4x32xf32>
    %c2368 = arith.constant 2368 : index
    %c0_204 = arith.constant 0 : index
    %289 = vector.load %arg2[%c2368, %c0_204] : memref<2880x64xbf16, #tpu.memory_space<vmem>>, vector<64x32xbf16>
    %cst_205 = arith.constant dense<0.000000e+00> : vector<4x32xf32>
    %290 = tpu.matmul %276, %289, %cst_205 {dimension_numbers = #tpu.dot_dimension_numbers<[1], [0], [0], [1], [0, 0, 1, 1], [], []>} : vector<4x64xbf16>, vector<64x32xbf16>, vector<4x32xf32> -> vector<4x32xf32>
    %291 = arith.addf %288, %290 : vector<4x32xf32>
    %c2432 = arith.constant 2432 : index
    %c0_206 = arith.constant 0 : index
    %292 = vector.load %arg2[%c2432, %c0_206] : memref<2880x64xbf16, #tpu.memory_space<vmem>>, vector<64x32xbf16>
    %cst_207 = arith.constant dense<0.000000e+00> : vector<4x32xf32>
    %293 = tpu.matmul %278, %292, %cst_207 {dimension_numbers = #tpu.dot_dimension_numbers<[1], [0], [0], [1], [0, 0, 1, 1], [], []>} : vector<4x64xbf16>, vector<64x32xbf16>, vector<4x32xf32> -> vector<4x32xf32>
    %294 = arith.addf %291, %293 : vector<4x32xf32>
    %295 = arith.maximumf %286, %294 : vector<4x32xf32>
    %c9_208 = arith.constant 9 : index
    %c0_209 = arith.constant 0 : index
    %296 = vector.load %arg3[%c9_208, %c0_209] : memref<13x64xf32, #tpu.memory_space<vmem>>, vector<1x32xf32>
    %297 = vector.broadcast %296 : vector<1x32xf32> to vector<4x32xf32>
    %298 = arith.addf %295, %297 : vector<4x32xf32>
    %cst_210 = arith.constant 0.000000e+00 : f32
    %299 = vector.broadcast %cst_210 : f32 to vector<4x32xf32>
    %300 = arith.maximumf %298, %299 : vector<4x32xf32>
    %301 = tpu.iota {dimensions = array<i32: 0>} : vector<2x4xi32>
    %302 = tpu.iota {dimensions = array<i32: 1>} : vector<2x4xi32>
    %c2_i32_211 = arith.constant 2 : i32
    %303 = vector.broadcast %c2_i32_211 : i32 to vector<2x4xi32>
    %304 = arith.muli %303, %301 : vector<2x4xi32>
    %305 = arith.cmpi eq, %302, %304 : vector<2x4xi32>
    %306 = arith.extui %305 : vector<2x4xi1> to vector<2x4xi32>
    %307 = arith.sitofp %306 : vector<2x4xi32> to vector<2x4xf32>
    %c2_i32_212 = arith.constant 2 : i32
    %308 = vector.broadcast %c2_i32_212 : i32 to vector<2x4xi32>
    %309 = arith.muli %308, %301 : vector<2x4xi32>
    %c1_i32_213 = arith.constant 1 : i32
    %310 = vector.broadcast %c1_i32_213 : i32 to vector<2x4xi32>
    %311 = arith.addi %309, %310 : vector<2x4xi32>
    %312 = arith.cmpi eq, %302, %311 : vector<2x4xi32>
    %313 = arith.extui %312 : vector<2x4xi1> to vector<2x4xi32>
    %314 = arith.sitofp %313 : vector<2x4xi32> to vector<2x4xf32>
    %cst_214 = arith.constant dense<0.000000e+00> : vector<2x32xf32>
    %315 = tpu.matmul %307, %300, %cst_214 {dimension_numbers = #tpu.dot_dimension_numbers<[1], [0], [0], [1], [0, 0, 1, 1], [], []>} : vector<2x4xf32>, vector<4x32xf32>, vector<2x32xf32> -> vector<2x32xf32>
    %cst_215 = arith.constant dense<0.000000e+00> : vector<2x32xf32>
    %316 = tpu.matmul %314, %300, %cst_215 {dimension_numbers = #tpu.dot_dimension_numbers<[1], [0], [0], [1], [0, 0, 1, 1], [], []>} : vector<2x4xf32>, vector<4x32xf32>, vector<2x32xf32> -> vector<2x32xf32>
    %317 = arith.maximumf %315, %316 : vector<2x32xf32>
    %cst_216 = arith.constant 0.000000e+00 : f32
    %318 = vector.broadcast %cst_216 : f32 to vector<1x96xf32>
    %c3_217 = arith.constant 3 : index
    %c0_218 = arith.constant 0 : index
    %319 = vector.load %arg7[%c3_217, %c0_218] : memref<34x96xf32, #tpu.memory_space<vmem>>, vector<1x96xf32>
    tpu.vector_store %arg7[%c3_217, %c0_218], %318 {strides = array<i32>} : memref<34x96xf32, #tpu.memory_space<vmem>>, vector<1x96xf32>,
    %c1_219 = arith.constant 1 : index
    %c0_220 = arith.constant 0 : index
    %320 = vector.load %arg7[%c1_219, %c0_220] : memref<34x96xf32, #tpu.memory_space<vmem>>, vector<2x32xf32>
    tpu.vector_store %arg7[%c1_219, %c0_220], %317 {strides = array<i32>} : memref<34x96xf32, #tpu.memory_space<vmem>>, vector<2x32xf32>,
    %c0_221 = arith.constant 0 : index
    %c0_222 = arith.constant 0 : index
    %321 = vector.load %arg7[%c0_221, %c0_222] : memref<34x96xf32, #tpu.memory_space<vmem>>, vector<2x32xf32>
    %322 = arith.truncf %321 : vector<2x32xf32> to vector<2x32xbf16>
    %323 = arith.truncf %317 : vector<2x32xf32> to vector<2x32xbf16>
    %c2_223 = arith.constant 2 : index
    %c0_224 = arith.constant 0 : index
    %324 = vector.load %arg7[%c2_223, %c0_224] : memref<34x96xf32, #tpu.memory_space<vmem>>, vector<2x32xf32>
    %325 = arith.truncf %324 : vector<2x32xf32> to vector<2x32xbf16>
    %c2496 = arith.constant 2496 : index
    %c0_225 = arith.constant 0 : index
    %326 = vector.load %arg2[%c2496, %c0_225] : memref<2880x64xbf16, #tpu.memory_space<vmem>>, vector<32x32xbf16>
    %cst_226 = arith.constant dense<0.000000e+00> : vector<2x32xf32>
    %327 = tpu.matmul %322, %326, %cst_226 {dimension_numbers = #tpu.dot_dimension_numbers<[1], [0], [0], [1], [0, 0, 1, 1], [], []>} : vector<2x32xbf16>, vector<32x32xbf16>, vector<2x32xf32> -> vector<2x32xf32>
    %c2528 = arith.constant 2528 : index
    %c0_227 = arith.constant 0 : index
    %328 = vector.load %arg2[%c2528, %c0_227] : memref<2880x64xbf16, #tpu.memory_space<vmem>>, vector<32x32xbf16>
    %cst_228 = arith.constant dense<0.000000e+00> : vector<2x32xf32>
    %329 = tpu.matmul %323, %328, %cst_228 {dimension_numbers = #tpu.dot_dimension_numbers<[1], [0], [0], [1], [0, 0, 1, 1], [], []>} : vector<2x32xbf16>, vector<32x32xbf16>, vector<2x32xf32> -> vector<2x32xf32>
    %330 = arith.addf %327, %329 : vector<2x32xf32>
    %c2560 = arith.constant 2560 : index
    %c0_229 = arith.constant 0 : index
    %331 = vector.load %arg2[%c2560, %c0_229] : memref<2880x64xbf16, #tpu.memory_space<vmem>>, vector<32x32xbf16>
    %cst_230 = arith.constant dense<0.000000e+00> : vector<2x32xf32>
    %332 = tpu.matmul %325, %331, %cst_230 {dimension_numbers = #tpu.dot_dimension_numbers<[1], [0], [0], [1], [0, 0, 1, 1], [], []>} : vector<2x32xbf16>, vector<32x32xbf16>, vector<2x32xf32> -> vector<2x32xf32>
    %333 = arith.addf %330, %332 : vector<2x32xf32>
    %c10 = arith.constant 10 : index
    %c0_231 = arith.constant 0 : index
    %334 = vector.load %arg3[%c10, %c0_231] : memref<13x64xf32, #tpu.memory_space<vmem>>, vector<1x32xf32>
    %335 = vector.broadcast %334 : vector<1x32xf32> to vector<2x32xf32>
    %336 = arith.addf %333, %335 : vector<2x32xf32>
    %cst_232 = arith.constant 0.000000e+00 : f32
    %337 = vector.broadcast %cst_232 : f32 to vector<2x32xf32>
    %338 = arith.maximumf %336, %337 : vector<2x32xf32>
    %cst_233 = arith.constant 0.000000e+00 : f32
    %339 = vector.broadcast %cst_233 : f32 to vector<1x96xf32>
    %c3_234 = arith.constant 3 : index
    %c0_235 = arith.constant 0 : index
    %340 = vector.load %arg7[%c3_234, %c0_235] : memref<34x96xf32, #tpu.memory_space<vmem>>, vector<1x96xf32>
    tpu.vector_store %arg7[%c3_234, %c0_235], %339 {strides = array<i32>} : memref<34x96xf32, #tpu.memory_space<vmem>>, vector<1x96xf32>,
    %c1_236 = arith.constant 1 : index
    %c0_237 = arith.constant 0 : index
    %341 = vector.load %arg7[%c1_236, %c0_237] : memref<34x96xf32, #tpu.memory_space<vmem>>, vector<2x32xf32>
    tpu.vector_store %arg7[%c1_236, %c0_237], %338 {strides = array<i32>} : memref<34x96xf32, #tpu.memory_space<vmem>>, vector<2x32xf32>,
    %c0_238 = arith.constant 0 : index
    %c0_239 = arith.constant 0 : index
    %342 = vector.load %arg7[%c0_238, %c0_239] : memref<34x96xf32, #tpu.memory_space<vmem>>, vector<2x32xf32>
    %343 = arith.truncf %342 : vector<2x32xf32> to vector<2x32xbf16>
    %344 = arith.truncf %338 : vector<2x32xf32> to vector<2x32xbf16>
    %c2_240 = arith.constant 2 : index
    %c0_241 = arith.constant 0 : index
    %345 = vector.load %arg7[%c2_240, %c0_241] : memref<34x96xf32, #tpu.memory_space<vmem>>, vector<2x32xf32>
    %346 = arith.truncf %345 : vector<2x32xf32> to vector<2x32xbf16>
    %c2592 = arith.constant 2592 : index
    %c0_242 = arith.constant 0 : index
    %347 = vector.load %arg2[%c2592, %c0_242] : memref<2880x64xbf16, #tpu.memory_space<vmem>>, vector<32x32xbf16>
    %cst_243 = arith.constant dense<0.000000e+00> : vector<2x32xf32>
    %348 = tpu.matmul %343, %347, %cst_243 {dimension_numbers = #tpu.dot_dimension_numbers<[1], [0], [0], [1], [0, 0, 1, 1], [], []>} : vector<2x32xbf16>, vector<32x32xbf16>, vector<2x32xf32> -> vector<2x32xf32>
    %c2624 = arith.constant 2624 : index
    %c0_244 = arith.constant 0 : index
    %349 = vector.load %arg2[%c2624, %c0_244] : memref<2880x64xbf16, #tpu.memory_space<vmem>>, vector<32x32xbf16>
    %cst_245 = arith.constant dense<0.000000e+00> : vector<2x32xf32>
    %350 = tpu.matmul %344, %349, %cst_245 {dimension_numbers = #tpu.dot_dimension_numbers<[1], [0], [0], [1], [0, 0, 1, 1], [], []>} : vector<2x32xbf16>, vector<32x32xbf16>, vector<2x32xf32> -> vector<2x32xf32>
    %351 = arith.addf %348, %350 : vector<2x32xf32>
    %c2656 = arith.constant 2656 : index
    %c0_246 = arith.constant 0 : index
    %352 = vector.load %arg2[%c2656, %c0_246] : memref<2880x64xbf16, #tpu.memory_space<vmem>>, vector<32x32xbf16>
    %cst_247 = arith.constant dense<0.000000e+00> : vector<2x32xf32>
    %353 = tpu.matmul %346, %352, %cst_247 {dimension_numbers = #tpu.dot_dimension_numbers<[1], [0], [0], [1], [0, 0, 1, 1], [], []>} : vector<2x32xbf16>, vector<32x32xbf16>, vector<2x32xf32> -> vector<2x32xf32>
    %354 = arith.addf %351, %353 : vector<2x32xf32>
    %c11 = arith.constant 11 : index
    %c0_248 = arith.constant 0 : index
    %355 = vector.load %arg3[%c11, %c0_248] : memref<13x64xf32, #tpu.memory_space<vmem>>, vector<1x32xf32>
    %356 = vector.broadcast %355 : vector<1x32xf32> to vector<2x32xf32>
    %357 = arith.addf %354, %356 : vector<2x32xf32>
    %cst_249 = arith.constant 0.000000e+00 : f32
    %358 = vector.broadcast %cst_249 : f32 to vector<2x32xf32>
    %359 = arith.maximumf %357, %358 : vector<2x32xf32>
    %cst_250 = arith.constant 0.000000e+00 : f32
    %360 = vector.broadcast %cst_250 : f32 to vector<1x96xf32>
    %c3_251 = arith.constant 3 : index
    %c0_252 = arith.constant 0 : index
    %361 = vector.load %arg7[%c3_251, %c0_252] : memref<34x96xf32, #tpu.memory_space<vmem>>, vector<1x96xf32>
    tpu.vector_store %arg7[%c3_251, %c0_252], %360 {strides = array<i32>} : memref<34x96xf32, #tpu.memory_space<vmem>>, vector<1x96xf32>,
    %c1_253 = arith.constant 1 : index
    %c0_254 = arith.constant 0 : index
    %362 = vector.load %arg7[%c1_253, %c0_254] : memref<34x96xf32, #tpu.memory_space<vmem>>, vector<2x32xf32>
    tpu.vector_store %arg7[%c1_253, %c0_254], %359 {strides = array<i32>} : memref<34x96xf32, #tpu.memory_space<vmem>>, vector<2x32xf32>,
    %c0_255 = arith.constant 0 : index
    %c0_256 = arith.constant 0 : index
    %363 = vector.load %arg7[%c0_255, %c0_256] : memref<34x96xf32, #tpu.memory_space<vmem>>, vector<2x32xf32>
    %364 = arith.truncf %363 : vector<2x32xf32> to vector<2x32xbf16>
    %365 = arith.truncf %359 : vector<2x32xf32> to vector<2x32xbf16>
    %c2_257 = arith.constant 2 : index
    %c0_258 = arith.constant 0 : index
    %366 = vector.load %arg7[%c2_257, %c0_258] : memref<34x96xf32, #tpu.memory_space<vmem>>, vector<2x32xf32>
    %367 = arith.truncf %366 : vector<2x32xf32> to vector<2x32xbf16>
    %c2688 = arith.constant 2688 : index
    %c0_259 = arith.constant 0 : index
    %368 = vector.load %arg2[%c2688, %c0_259] : memref<2880x64xbf16, #tpu.memory_space<vmem>>, vector<32x16xbf16>
    %cst_260 = arith.constant dense<0.000000e+00> : vector<2x16xf32>
    %369 = tpu.matmul %364, %368, %cst_260 {dimension_numbers = #tpu.dot_dimension_numbers<[1], [0], [0], [1], [0, 0, 1, 1], [], []>} : vector<2x32xbf16>, vector<32x16xbf16>, vector<2x16xf32> -> vector<2x16xf32>
    %c2720 = arith.constant 2720 : index
    %c0_261 = arith.constant 0 : index
    %370 = vector.load %arg2[%c2720, %c0_261] : memref<2880x64xbf16, #tpu.memory_space<vmem>>, vector<32x16xbf16>
    %cst_262 = arith.constant dense<0.000000e+00> : vector<2x16xf32>
    %371 = tpu.matmul %365, %370, %cst_262 {dimension_numbers = #tpu.dot_dimension_numbers<[1], [0], [0], [1], [0, 0, 1, 1], [], []>} : vector<2x32xbf16>, vector<32x16xbf16>, vector<2x16xf32> -> vector<2x16xf32>
    %372 = arith.addf %369, %371 : vector<2x16xf32>
    %c2752 = arith.constant 2752 : index
    %c0_263 = arith.constant 0 : index
    %373 = vector.load %arg2[%c2752, %c0_263] : memref<2880x64xbf16, #tpu.memory_space<vmem>>, vector<32x16xbf16>
    %cst_264 = arith.constant dense<0.000000e+00> : vector<2x16xf32>
    %374 = tpu.matmul %367, %373, %cst_264 {dimension_numbers = #tpu.dot_dimension_numbers<[1], [0], [0], [1], [0, 0, 1, 1], [], []>} : vector<2x32xbf16>, vector<32x16xbf16>, vector<2x16xf32> -> vector<2x16xf32>
    %375 = arith.addf %372, %374 : vector<2x16xf32>
    %c2784 = arith.constant 2784 : index
    %c0_265 = arith.constant 0 : index
    %376 = vector.load %arg2[%c2784, %c0_265] : memref<2880x64xbf16, #tpu.memory_space<vmem>>, vector<32x16xbf16>
    %cst_266 = arith.constant dense<0.000000e+00> : vector<2x16xf32>
    %377 = tpu.matmul %364, %376, %cst_266 {dimension_numbers = #tpu.dot_dimension_numbers<[1], [0], [0], [1], [0, 0, 1, 1], [], []>} : vector<2x32xbf16>, vector<32x16xbf16>, vector<2x16xf32> -> vector<2x16xf32>
    %c2816 = arith.constant 2816 : index
    %c0_267 = arith.constant 0 : index
    %378 = vector.load %arg2[%c2816, %c0_267] : memref<2880x64xbf16, #tpu.memory_space<vmem>>, vector<32x16xbf16>
    %cst_268 = arith.constant dense<0.000000e+00> : vector<2x16xf32>
    %379 = tpu.matmul %365, %378, %cst_268 {dimension_numbers = #tpu.dot_dimension_numbers<[1], [0], [0], [1], [0, 0, 1, 1], [], []>} : vector<2x32xbf16>, vector<32x16xbf16>, vector<2x16xf32> -> vector<2x16xf32>
    %380 = arith.addf %377, %379 : vector<2x16xf32>
    %c2848 = arith.constant 2848 : index
    %c0_269 = arith.constant 0 : index
    %381 = vector.load %arg2[%c2848, %c0_269] : memref<2880x64xbf16, #tpu.memory_space<vmem>>, vector<32x16xbf16>
    %cst_270 = arith.constant dense<0.000000e+00> : vector<2x16xf32>
    %382 = tpu.matmul %367, %381, %cst_270 {dimension_numbers = #tpu.dot_dimension_numbers<[1], [0], [0], [1], [0, 0, 1, 1], [], []>} : vector<2x32xbf16>, vector<32x16xbf16>, vector<2x16xf32> -> vector<2x16xf32>
    %383 = arith.addf %380, %382 : vector<2x16xf32>
    %384 = arith.maximumf %375, %383 : vector<2x16xf32>
    %c12 = arith.constant 12 : index
    %c0_271 = arith.constant 0 : index
    %385 = vector.load %arg3[%c12, %c0_271] : memref<13x64xf32, #tpu.memory_space<vmem>>, vector<1x16xf32>
    %386 = vector.broadcast %385 : vector<1x16xf32> to vector<2x16xf32>
    %387 = arith.addf %384, %386 : vector<2x16xf32>
    %cst_272 = arith.constant 0.000000e+00 : f32
    %388 = vector.broadcast %cst_272 : f32 to vector<2x16xf32>
    %389 = arith.maximumf %387, %388 : vector<2x16xf32>
    %390 = tpu.iota {dimensions = array<i32: 0>} : vector<1x2xi32>
    %391 = tpu.iota {dimensions = array<i32: 1>} : vector<1x2xi32>
    %c2_i32_273 = arith.constant 2 : i32
    %392 = vector.broadcast %c2_i32_273 : i32 to vector<1x2xi32>
    %393 = arith.muli %392, %390 : vector<1x2xi32>
    %394 = arith.cmpi eq, %391, %393 : vector<1x2xi32>
    %395 = arith.extui %394 : vector<1x2xi1> to vector<1x2xi32>
    %396 = arith.sitofp %395 : vector<1x2xi32> to vector<1x2xf32>
    %c2_i32_274 = arith.constant 2 : i32
    %397 = vector.broadcast %c2_i32_274 : i32 to vector<1x2xi32>
    %398 = arith.muli %397, %390 : vector<1x2xi32>
    %c1_i32_275 = arith.constant 1 : i32
    %399 = vector.broadcast %c1_i32_275 : i32 to vector<1x2xi32>
    %400 = arith.addi %398, %399 : vector<1x2xi32>
    %401 = arith.cmpi eq, %391, %400 : vector<1x2xi32>
    %402 = arith.extui %401 : vector<1x2xi1> to vector<1x2xi32>
    %403 = arith.sitofp %402 : vector<1x2xi32> to vector<1x2xf32>
    %cst_276 = arith.constant dense<0.000000e+00> : vector<1x16xf32>
    %404 = tpu.matmul %396, %389, %cst_276 {dimension_numbers = #tpu.dot_dimension_numbers<[1], [0], [0], [1], [0, 0, 1, 1], [], []>} : vector<1x2xf32>, vector<2x16xf32>, vector<1x16xf32> -> vector<1x16xf32>
    %cst_277 = arith.constant dense<0.000000e+00> : vector<1x16xf32>
    %405 = tpu.matmul %403, %389, %cst_277 {dimension_numbers = #tpu.dot_dimension_numbers<[1], [0], [0], [1], [0, 0, 1, 1], [], []>} : vector<1x2xf32>, vector<2x16xf32>, vector<1x16xf32> -> vector<1x16xf32>
    %406 = arith.maximumf %404, %405 : vector<1x16xf32>
    %407 = arith.truncf %406 : vector<1x16xf32> to vector<1x16xbf16>
    %c0_278 = arith.constant 0 : index
    %c0_279 = arith.constant 0 : index
    %408 = vector.load %arg4[%c0_278, %c0_279] : memref<528x256xbf16, #tpu.memory_space<vmem>>, vector<16x256xbf16>
    %cst_280 = arith.constant dense<0.000000e+00> : vector<1x256xf32>
    %409 = tpu.matmul %407, %408, %cst_280 {dimension_numbers = #tpu.dot_dimension_numbers<[1], [0], [0], [1], [0, 0, 1, 1], [], []>} : vector<1x16xbf16>, vector<16x256xbf16>, vector<1x256xf32> -> vector<1x256xf32>
    %c0_281 = arith.constant 0 : index
    %c0_282 = arith.constant 0 : index
    %410 = vector.load %arg5[%c0_281, %c0_282] : memref<3x256xf32, #tpu.memory_space<vmem>>, vector<1x256xf32>
    %411 = arith.addf %409, %410 : vector<1x256xf32>
    %cst_283 = arith.constant 0.000000e+00 : f32
    %412 = vector.broadcast %cst_283 : f32 to vector<1x256xf32>
    %413 = arith.maximumf %411, %412 : vector<1x256xf32>
    %414 = arith.truncf %413 : vector<1x256xf32> to vector<1x256xbf16>
    %c16 = arith.constant 16 : index
    %c0_284 = arith.constant 0 : index
    %415 = vector.load %arg4[%c16, %c0_284] : memref<528x256xbf16, #tpu.memory_space<vmem>>, vector<256x256xbf16>
    %cst_285 = arith.constant dense<0.000000e+00> : vector<1x256xf32>
    %416 = tpu.matmul %414, %415, %cst_285 {dimension_numbers = #tpu.dot_dimension_numbers<[1], [0], [0], [1], [0, 0, 1, 1], [], []>} : vector<1x256xbf16>, vector<256x256xbf16>, vector<1x256xf32> -> vector<1x256xf32>
    %c1_286 = arith.constant 1 : index
    %c0_287 = arith.constant 0 : index
    %417 = vector.load %arg5[%c1_286, %c0_287] : memref<3x256xf32, #tpu.memory_space<vmem>>, vector<1x256xf32>
    %418 = arith.addf %416, %417 : vector<1x256xf32>
    %cst_288 = arith.constant 0.000000e+00 : f32
    %419 = vector.broadcast %cst_288 : f32 to vector<1x256xf32>
    %420 = arith.maximumf %418, %419 : vector<1x256xf32>
    %421 = arith.truncf %420 : vector<1x256xf32> to vector<1x256xbf16>
    %c272 = arith.constant 272 : index
    %c0_289 = arith.constant 0 : index
    %422 = vector.load %arg4[%c272, %c0_289] : memref<528x256xbf16, #tpu.memory_space<vmem>>, vector<256x128xbf16>
    %cst_290 = arith.constant dense<0.000000e+00> : vector<1x128xf32>
    %423 = tpu.matmul %421, %422, %cst_290 {dimension_numbers = #tpu.dot_dimension_numbers<[1], [0], [0], [1], [0, 0, 1, 1], [], []>} : vector<1x256xbf16>, vector<256x128xbf16>, vector<1x128xf32> -> vector<1x128xf32>
    %c2_291 = arith.constant 2 : index
    %c0_292 = arith.constant 0 : index
    %424 = vector.load %arg5[%c2_291, %c0_292] : memref<3x256xf32, #tpu.memory_space<vmem>>, vector<1x128xf32>
    %425 = arith.addf %423, %424 : vector<1x128xf32>
    %426 = vector.shape_cast %425 : vector<1x128xf32> to vector<1x128xf32>
    %427 = vector.broadcast %426 : vector<1x128xf32> to vector<8x128xf32>
    %c0_293 = arith.constant 0 : index
    %c0_294 = arith.constant 0 : index
    %c0_295 = arith.constant 0 : index
    %428 = vector.load %arg6[%c0_293, %c0_294, %c0_295] : memref<1x8x128xf32, #tpu.memory_space<vmem>>, vector<1x8x128xf32>
    %429 = vector.shape_cast %428 : vector<1x8x128xf32> to vector<8x128xf32>
    %430 = vector.shape_cast %427 : vector<8x128xf32> to vector<1x8x128xf32>
    tpu.vector_store %arg6[%c0_293, %c0_294, %c0_295], %430 {strides = array<i32>} : memref<1x8x128xf32, #tpu.memory_space<vmem>>, vector<1x8x128xf32>,
    return
  }
  func.func @transform_0(%arg0: i32) -> (i32, i32, i32) {
    %c0_i32 = arith.constant 0 : i32
    %c0_i32_0 = arith.constant 0 : i32
    %c0_i32_1 = arith.constant 0 : i32
    return %arg0, %c0_i32, %c0_i32_0 : i32, i32, i32
  }
  func.func @transform_1(%arg0: i32) -> (i32, i32) {
    %c0_i32 = arith.constant 0 : i32
    %c0_i32_0 = arith.constant 0 : i32
    %c0_i32_1 = arith.constant 0 : i32
    return %c0_i32, %c0_i32_0 : i32, i32
  }
  func.func @transform_2(%arg0: i32) -> (i32, i32) {
    %c0_i32 = arith.constant 0 : i32
    %c0_i32_0 = arith.constant 0 : i32
    %c0_i32_1 = arith.constant 0 : i32
    return %c0_i32, %c0_i32_0 : i32, i32
  }
  func.func @transform_3(%arg0: i32) -> (i32, i32) {
    %c0_i32 = arith.constant 0 : i32
    %c0_i32_0 = arith.constant 0 : i32
    %c0_i32_1 = arith.constant 0 : i32
    return %c0_i32, %c0_i32_0 : i32, i32
  }
  func.func @transform_4(%arg0: i32) -> (i32, i32) {
    %c0_i32 = arith.constant 0 : i32
    %c0_i32_0 = arith.constant 0 : i32
    %c0_i32_1 = arith.constant 0 : i32
    return %c0_i32, %c0_i32_0 : i32, i32
  }
  func.func @transform_5(%arg0: i32) -> (i32, i32, i32) {
    %c0_i32 = arith.constant 0 : i32
    %c0_i32_0 = arith.constant 0 : i32
    %c0_i32_1 = arith.constant 0 : i32
    return %arg0, %c0_i32, %c0_i32_0 : i32, i32, i32
  }
}

</mosaic_0001>

<bundles_post_ra>
// kernel: vgg_forward.1
= control target key start
LH: loop header
LB: loop body
LE: loop exit
PB: predicated region body
PF: predicated region fallthrough
CT: control target
= control target key end

     0   :  { %s7342_s18 = smov 0   ;;  %s8494_s0 = inlined_call_operand.vmem [shape: f32[2,32,96], index: 0, kind: input, shape index: {}]   ;;  %s8495_s1 = inlined_call_operand.vmem [shape: bf16[2880,64], index: 1, kind: input, shape index: {}]   ;;  %s8496_s2 = inlined_call_operand.vmem [shape: f32[13,64], index: 2, kind: input, shape index: {}]   ;;  %s8497_s3 = inlined_call_operand.vmem [shape: bf16[528,256], index: 3, kind: input, shape index: {}]   ;;  %s8498_s4 = inlined_call_operand.vmem [shape: f32[3,256], index: 4, kind: input, shape index: {}]   ;;  %s8499_s5 = inlined_call_operand.vmem [shape: f32[2,8,128], index: 5, kind: output, shape index: {}]  }
   0x1 LB: > { %s5655_s19 = sadd.s32 4294967295, %s7306_s18   ;;  %p5659_p0 = scmp.ge.s32.totalorder %s7306_s18, 1  ;;  %s7306_s18 = sphi %s7342_s18, %s15_s18  }
   0x2   : > { %p187_p1 = scmp.lt.s32.totalorder %s7306_s18, 3 }
   0x4   : > { %p188_p2 = pnand %p5659_p0, %p187_p1 }
   0x5   : > { %v7053_v0 = vld [vmem:[%s8495_s1 + $0x30] sm:$0xff] (!%p188_p2)   ;;  %p214_p3 = scmp.lt.s32.totalorder (!%p188_p2), %s5655_s19, 1  ;;  %v7054_v1 = vld [vmem:[%s8495_s1 + $0x38] sm:$0xff] (!%p188_p2)   ;;  %vm228_vm0 = vcmask (!%p188_p2), 778240   ;;  %v7055_v2 = vld [vmem:[%s8495_s1 + $0x40] sm:$0xff] (!%p188_p2)   ;;  %v7308_v3 = vmov (!%p188_p2), 0.0  }
   0x6   : > { %191 = sbr.rel (%p188_p2) target bundleno = 4987 (0x137b), region = 40  ;;  %6289 = vmatprep.subr.bf16.mxu0 (!%p188_p2), %v7053_v0  ;;  %229 = vst.msk [vmem:[#allocation2] sm:$0x1] (!%p188_p2), %vm228_vm0, %v7308_v3  ;;  %230 = vst.msk [vmem:[#allocation2 + $0x21] sm:$0x1] (!%p188_p2), %vm228_vm0, %v7308_v3  ;;  %vm231_vm1 = vcmask (!%p188_p2), 785408  }
   0x7   : > { %6290 = vmatpush3.bf16.msra.mxu0 (!%p188_p2), %v7053_v0  ;;  %v7056_v6 = vld [vmem:[%s8495_s1 + $0x48] sm:$0xff] (!%p188_p2)   ;;  %v7057_v10 = vld [vmem:[%s8495_s1 + $0x50] sm:$0xff] (!%p188_p2)   ;;  %v7058_v11 = vld [vmem:[%s8495_s1 + $0x58] sm:$0xff] (!%p188_p2)   ;;  %vm577_vm2 = vcmask (!%p188_p2), 523264   ;;  %vm1146_vm4 = vcmask (!%p188_p2), 261120   ;;  %vm7309_vm8 = vmmov (!%p188_p2), 0  }
   0x8   : > { %6291 = vmatprep.subr.bf16.mxu0 (!%p188_p2), %v7054_v1  ;;  %v7059_v12 = vld [vmem:[%s8495_s1] sm:$0xff] (!%p188_p2)   ;;  %v7060_v17 = vld [vmem:[%s8495_s1 + $0x8] sm:$0xff] (!%p188_p2)   ;;  %v7061_v19 = vld [vmem:[%s8495_s1 + $0x10] sm:$0xff] (!%p188_p2)   ;;  %vm1984_vm9 = vcmask (!%p188_p2), 130048   ;;  %vm3020_vm10 = vcmask (!%p188_p2), 64512   ;;  %vm3167_vm11 = vcmask (!%p188_p2), 257024  }
   0x9   : > { %v7062_v20 = vld [vmem:[%s8495_s1 + $0x18] sm:$0xff] (!%p188_p2)   ;;  %v7063_v21 = vld [vmem:[%s8495_s1 + $0x20] sm:$0xff] (!%p188_p2)   ;;  %v7064_v22 = vld [vmem:[%s8495_s1 + $0x28] sm:$0xff] (!%p188_p2)   ;;  %vm3360_vm12 = vcmask (!%p188_p2), 519168   ;;  %vm4061_vm13 = vcmask (!%p188_p2), 1043456   ;;  %vm4058_vm14 = vcmask (!%p188_p2), 31744  }
   0xa   : > { %v7065_v26 = vld [vmem:[%s8495_s1 + $0x60] sm:$0xff] (!%p188_p2)   ;;  %v7066_v29 = vld [vmem:[%s8495_s1 + $0x68] sm:$0xff] (!%p188_p2)   ;;  %v7067_v31 = vld [vmem:[%s8495_s1 + $0x70] sm:$0xff] (!%p188_p2)   ;;  %vm4209_vm15 = vcmask (!%p188_p2), 254976  }
   0xb   : > { %6292 = vmatpush3.bf16.msra.mxu0 (!%p188_p2), %v7054_v1  ;;  %v7068_v32 = vld [vmem:[%s8495_s1 + $0x78] sm:$0xff] (!%p188_p2)   ;;  %v7069_v33 = vld [vmem:[%s8495_s1 + $0x80] sm:$0xff] (!%p188_p2)   ;;  %v7070_v34 = vld [vmem:[%s8495_s1 + $0x88] sm:$0xff] (!%p188_p2)  }
   0xc   : > { %6293 = vmatprep.subr.bf16.mxu0 (!%p188_p2), %v7055_v2  ;;  %v7071_v36 = vld [vmem:[%s8495_s1 + $0xb0] sm:$0xff] (!%p188_p2)   ;;  %v7072_v38 = vld [vmem:[%s8495_s1 + $0xb8] sm:$0xff] (!%p188_p2)   ;;  %v7074_v40 = vld [vmem:[%s8495_s1 + $0xc0] sm:$0xff] (!%p188_p2)  }
   0xd   : > { %s8501_s19 = smov (!%p214_p3, %s5655_s19), 1  ;;  %v7073_v39 = vld [vmem:[%s8495_s1 + $0x90] sm:$0xff]   ;;  %v7075_v41 = vld [vmem:[%s8495_s1 + $0x98] sm:$0xff]   ;;  %v7076_v42 = vld [vmem:[%s8495_s1 + $0xc8] sm:$0xff]  }
   0xe   : > { %s5993_s26 = sshll.u32 %s8501_s19, 5  ;;  %6349 = vmatprep.subr.bf16.mxu1 %v7073_v39  ;;  %v7077_v43 = vld [vmem:[%s8495_s1 + $0xa0] sm:$0xff]   ;;  %v7078_v44 = vld [vmem:[%s8495_s1 + $0xa8] sm:$0xff]   ;;  %v7079_v45 = vld [vmem:[%s8495_s1 + $0xd0] sm:$0xff]   ;;  %s5662_s8 = sshll.u32 %s8501_s19, 3 }
   0xf   : > { %s218_s29 = scalar_lea.vmem %s8494_s0, %s5993_s26  ;;  %6294 = vmatpush3.bf16.msra.mxu0 %v7055_v2  ;;  %6350 = vmatpush3.bf16.msra.mxu1 %v7073_v39  ;;  %v5687_v46 = vld [vmem:[%s8496_s2] ss:$0 sm:$0xff]  ;;  %s222_s11 = scalar_lea.vmem %s8499_s5, %s5662_s8 }
  0x10   : > { %v224_v4 = vld [vmem:[%s218_s29] sm:$0xff]  ;;  %v225_v5 = vld [vmem:[%s218_s29 + $0x8] sm:$0xff]  ;;  %v226_v8 = vld [vmem:[%s218_s29 + $0x10] sm:$0xff]  ;;  %6295 = vmatprep.subr.bf16.mxu0 %v7056_v6  ;;  %6351 = vmatprep.subr.bf16.mxu1 %v7075_v41 }
  0x11   : > { %232 = vst.msk [vmem:[#allocation2 + $0x1] sm:$0xff] %vm231_vm1, %v224_v4  ;;  %233 = vst.msk [vmem:[#allocation2 + $0x9] sm:$0xff] %vm231_vm1, %v225_v5  ;;  %v242_v7 = vpack.c.bf16 %v225_v5, %v224_v4  ;;  %v227_v9 = vld [vmem:[%s218_s29 + $0x18] sm:$0xff] }
  0x12   : > { %234 = vst.msk [vmem:[#allocation2 + $0x11] sm:$0xff] %vm231_vm1, %v226_v8  ;;  %235 = vst.msk [vmem:[#allocation2 + $0x19] sm:$0xff] %vm231_vm1, %v227_v9  ;;  %v243_v16 = vpack.c.bf16 %v227_v9, %v226_v8  ;;  %v7081_v8 = vld [vmem:[%s8495_s1 + $0xe0] sm:$0xff]   ;;  %v7082_v9 = vld [vmem:[%s8495_s1 + $0xe8] sm:$0xff]  }
  0x13   : > { %6301 = vmatprep.mubr.msk.bf16.mxu0 %vm231_vm1, %v242_v7  ;;  %6296 = vmatpush3.bf16.msra.mxu0 %v7056_v6  ;;  %v7080_v6 = vld [vmem:[%s8495_s1 + $0xd8] sm:$0xff]  }
  0x14   : > { %6297 = vmatprep.subr.bf16.mxu0 %v7057_v10  ;;  %6352 = vmatpush3.bf16.msra.mxu1 %v7075_v41 }
  0x15   : > { %6353 = vmatprep.subr.bf16.mxu1 %v7077_v43 }
  0x17   : > { %6298 = vmatpush3.bf16.msra.mxu0 %v7057_v10  ;;  %v7083_v10 = vld [vmem:[%s8495_s1 + $0x110] sm:$0xff]  }
  0x18   : > { %v236_v13 = vld [vmem:[#allocation2] sm:$0xff]  ;;  %6299 = vmatprep.subr.bf16.mxu0 %v7058_v11  ;;  %v237_v14 = vld [vmem:[#allocation2 + $0x8] sm:$0xff]  ;;  %6354 = vmatpush3.bf16.msra.mxu1 %v7077_v43 }
  0x19   : > { %v247_v15 = vld [vmem:[#allocation2 + $0x1a] sm:$0xff]  ;;  %v240_v18 = vpack.c.bf16 %v237_v14, %v236_v13  ;;  %v238_v23 = vld [vmem:[#allocation2 + $0x10] sm:$0xff]  ;;  %v244_v25 = vld [vmem:[#allocation2 + $0x2] sm:$0xff]  ;;  %6355 = vmatprep.subr.bf16.mxu1 %v7078_v44 }
  0x1a   : > { %576 = vst.msk [vmem:[#allocation2 + $0x21] sm:$0x1] %vm228_vm0, %v7308_v3  ;;  %v239_v24 = vld [vmem:[#allocation2 + $0x18] sm:$0xff]  ;;  %v245_v27 = vld [vmem:[#allocation2 + $0xa] sm:$0xff] }
  0x1b   : > { %6300 = vmatpush3.bf16.msra.mxu0 %v7058_v11  ;;  %v241_v28 = vpack.c.bf16 %v239_v24, %v238_v23  ;;  %v248_v30 = vpack.c.bf16 %v245_v27, %v244_v25  ;;  %v246_v35 = vld [vmem:[#allocation2 + $0x12] sm:$0xff]  ;;  %v7093_v23 = vld [vmem:[%s8495_s1 + $0x140] sm:$0xff]   ;;  %v7094_v24 = vld [vmem:[%s8495_s1 + $0x148] sm:$0xff]   ;;  %v1125_v25 = vlaneseq }
  0x1c   : > { %6305 = vmatprep.subr.bf16.mxu0 %v7059_v12  ;;  %v249_v37 = vpack.c.bf16 %v247_v15, %v246_v35  ;;  %6356 = vmatpush3.bf16.msra.mxu1 %v7078_v44  ;;  %v7084_v14 = vld [vmem:[%s8495_s1 + $0x118] sm:$0xff]   ;;  %v7085_v15 = vld [vmem:[%s8495_s1 + $0x120] sm:$0xff]  }
  0x1d   : > { %6361 = vmatprep.subr.bf16.mxu1 %v7079_v45  ;;  %v1129_v27 = vand.u32 127, %v1125_v25  ;;  %v5724_v44 = vld [vmem:[%s8496_s2 + $0x1] ss:$0 sm:$0xff] }
  0x1e   : > { %6302 = vmatmul.mubr.msk.bf16.vlgmr.msra.gmra.mrb[0].mxu0 %vm231_vm1, %v243_v16  ;;  %v7086_v16 = vld [vmem:[%s8495_s1 + $0x128] sm:$0xff]  }
  0x1f   : > { %6306 = vmatpush3.bf16.msra.mxu0 %v7059_v12  ;;  %6317 = vmatprep.mubr.msk.bf16.mxu0 %vm231_vm1, %v240_v18  ;;  %v7088_v18 = vld [vmem:[%s8495_s1 + $0xf8] sm:$0xff]  }
  0x20   : > { %6307 = vmatprep.subr.bf16.mxu0 %v7060_v17 }
  0x23   : > { %6308 = vmatpush3.bf16.msra.mxu0 %v7060_v17  ;;  %v7087_v17 = vld [vmem:[%s8495_s1 + $0xf0] sm:$0xff]  }
  0x24   : > { %6309 = vmatprep.subr.bf16.mxu0 %v7061_v19 }
  0x27   : > { %6310 = vmatpush3.bf16.msra.mxu0 %v7061_v19  ;;  %v7089_v19 = vld [vmem:[%s8495_s1 + $0x100] sm:$0xff]  }
  0x28   : > { %6311 = vmatprep.subr.bf16.mxu0 %v7062_v20 }
  0x2b   : > { %6312 = vmatpush3.bf16.msra.mxu0 %v7062_v20  ;;  %v7090_v20 = vld [vmem:[%s8495_s1 + $0x108] sm:$0xff]  }
  0x2c   : > { %6313 = vmatprep.subr.bf16.mxu0 %v7063_v21 }
  0x2f   : > { %6314 = vmatpush3.bf16.msra.mxu0 %v7063_v21  ;;  %v7091_v21 = vld [vmem:[%s8495_s1 + $0x130] sm:$0xff]  }
  0x30   : > { %6315 = vmatprep.subr.bf16.mxu0 %v7064_v22 }
  0x33   : > { %6316 = vmatpush3.bf16.msra.mxu0 %v7064_v22  ;;  %v7092_v22 = vld [vmem:[%s8495_s1 + $0x138] sm:$0xff]  }
  0x34   : > { %6321 = vmatprep.subr.bf16.mxu0 %v7065_v26 }
  0x36   : > { %6318 = vmatmul.mubr.msk.bf16.vlgmr.msra.gmra.mrb[0].mxu0 %vm231_vm1, %v241_v28 }
  0x37   : > { %6322 = vmatpush3.bf16.msra.mxu0 %v7065_v26  ;;  %6333 = vmatprep.mubr.msk.bf16.mxu0 %vm231_vm1, %v248_v30  ;;  %v7520_v26 = vshrl.u32 %v1125_v25, 7  ;;  %v7102_v25 = vld [vmem:[%s8495_s1 + $0x200] sm:$0xff]  }
  0x38   : > { %6323 = vmatprep.subr.bf16.mxu0 %v7066_v29 }
  0x39   : > { %v1130_v28 = vmul.u32 2, %v7520_v26 }
  0x3b   : > { %6324 = vmatpush3.bf16.msra.mxu0 %v7066_v29  ;;  %vm1132_vm3 = vcmp.eq.s32.totalorder %v1129_v27, %v1130_v28  ;;  %v1138_v30 = vadd.s32 1, %v1130_v28  ;;  %v7104_v28 = vld [vmem:[%s8495_s1 + $0x208] sm:$0xff]  }
  0x3c   : > { %6325 = vmatprep.subr.bf16.mxu0 %v7067_v31  ;;  %v7524_v29 = vsel %vm1132_vm3, 1.0, %v7308_v3 }
  0x3d   : > { %vm1140_vm5 = vcmp.eq.s32.totalorder %v1129_v27, %v1138_v30  ;;  %v7105_v30 = vld [vmem:[%s8495_s1 + $0x1b0] sm:$0xff]  }
  0x3f   : > { %6326 = vmatpush3.bf16.msra.mxu0 %v7067_v31 }
  0x40   : > { %6327 = vmatprep.subr.bf16.mxu0 %v7068_v32 }
  0x43   : > { %6328 = vmatpush3.bf16.msra.mxu0 %v7068_v32 }
  0x44   : > { %6329 = vmatprep.subr.bf16.mxu0 %v7069_v33 }
  0x47   : > { %6330 = vmatpush3.bf16.msra.mxu0 %v7069_v33 }
  0x48   : > { %6331 = vmatprep.subr.bf16.mxu0 %v7070_v34 }
  0x4b   : > { %6332 = vmatpush3.bf16.msra.mxu0 %v7070_v34 }
  0x4c   : > { %6337 = vmatprep.subr.bf16.mxu0 %v7071_v36 }
  0x4e   : > { %6334 = vmatmul.mubr.msk.bf16.vlgmr.msra.gmra.mrb[0].mxu0 %vm231_vm1, %v249_v37  ;;  %vm4955_vm1 = vcmask 15360  }
  0x4f   : > { %6338 = vmatpush3.bf16.msra.mxu0 %v7071_v36 }
  0x50   : > { %6339 = vmatprep.subr.bf16.mxu0 %v7072_v38 }
  0x53   : > { %6340 = vmatpush3.bf16.msra.mxu0 %v7072_v38 }
  0x54   : > { %6341 = vmatprep.subr.bf16.mxu0 %v7074_v40 }
  0x57   : > { %6342 = vmatpush3.bf16.msra.mxu0 %v7074_v40 }
  0x58   : > { %6343 = vmatprep.subr.bf16.mxu0 %v7076_v42 }
  0x5b   : > { %6344 = vmatpush3.bf16.msra.mxu0 %v7076_v42 }
 0x121   : > { %v6335_v47 = vpop.f32.mrb[0].mxu0 }
 0x122   : > { %v570_v48 = vadd.f32 %v6335_v47, %v5687_v46  ;;  %v544_v49 = vpop.f32.mrb[1].mxu0 }
 0x123   : > { %v568_v50 = vadd.f32 %v5687_v46, %v544_v49  ;;  %v6336_v51 = vpop.f32.mrb[2].mxu0 }
 0x124   : > { %v574_v52 = vmax.f32 %v570_v48, 0.0  ;;  %v571_v53 = vadd.f32 %v6336_v51, %v5687_v46  ;;  %v547_v54 = vpop.f32.mrb[3].mxu0 }
 0x125   : > { %v572_v55 = vmax.f32 %v568_v50, 0.0  ;;  %v569_v56 = vadd.f32 %v5687_v46, %v547_v54 }
 0x126   : > { %580 = vst.msk [vmem:[#allocation2 + $0x11] sm:$0xff] %vm577_vm2, %v574_v52  ;;  %v575_v57 = vmax.f32 %v571_v53, 0.0 }
 0x127   : > { %578 = vst.msk [vmem:[#allocation2 + $0x1] sm:$0xff] %vm577_vm2, %v572_v55  ;;  %v573_v58 = vmax.f32 %v569_v56, 0.0  ;;  %v1127_v56 = vadd.s32 8, %v7520_v26 }
 0x128   : > { %581 = vst.msk [vmem:[#allocation2 + $0x19] sm:$0xff] %vm577_vm2, %v575_v57  ;;  %v589_v59 = vpack.c.bf16 %v575_v57, %v574_v52 }
 0x129   : > { %579 = vst.msk [vmem:[#allocation2 + $0x9] sm:$0xff] %vm577_vm2, %v573_v58  ;;  %v588_v60 = vpack.c.bf16 %v573_v58, %v572_v55 }
 0x12b   : > { %6345 = vmatprep.mubr.msk.bf16.mxu0 %vm577_vm2, %v588_v60 }
 0x12c   : > { %6346 = vmatmul.mubr.msk.bf16.vlgmr.msra.gmra.mrb[4].mxu0 %vm577_vm2, %v589_v59 }
 0x12d   : > { %6417 = vmatprep.mubr.msk.f32.mxu0 %vm1146_vm4, %v7524_v29 }
 0x12e   : > { %v582_v61 = vld [vmem:[#allocation2] sm:$0xff] }
 0x12f   : > { %v585_v62 = vld [vmem:[#allocation2 + $0x18] sm:$0xff] }
 0x130   : > { %v590_v63 = vld [vmem:[#allocation2 + $0x2] sm:$0xff]  ;;  %v584_v1 = vld [vmem:[#allocation2 + $0x10] sm:$0xff]  ;;  %v593_v12 = vld [vmem:[#allocation2 + $0x1a] sm:$0xff] }
 0x131   : > { %v583_v0 = vld [vmem:[#allocation2 + $0x8] sm:$0xff]  ;;  %v587_v4 = vpack.c.bf16 %v585_v62, %v584_v1  ;;  %v592_v11 = vld [vmem:[#allocation2 + $0x12] sm:$0xff]  ;;  %v7535_v1 = vsel %vm1140_vm5, 1.0, %v7308_v3 }
 0x132   : > { %v586_v2 = vpack.c.bf16 %v583_v0, %v582_v61  ;;  %v591_v5 = vld [vmem:[#allocation2 + $0xa] sm:$0xff]  ;;  %v595_v13 = vpack.c.bf16 %v593_v12, %v592_v11 }
 0x133   : > { %1311 = vst.msk [vmem:[#allocation2 + $0x11] sm:$0x1] %vm228_vm0, %v7308_v3  ;;  %v594_v7 = vpack.c.bf16 %v591_v5, %v590_v63  ;;  %v1131_v63 = vmul.u32 2, %v1127_v56  ;;  %v7095_v5 = vld [vmem:[%s8495_s1 + $0x160] sm:$0xff]  }
 0x134   : > { %6357 = vmatprep.mubr.msk.bf16.mxu1 %vm577_vm2, %v586_v2  ;;  %v7110_v56 = vld [vmem:[%s8495_s1 + $0x1e0] sm:$0xff]  }
 0x135   : > { %6358 = vmatmul.mubr.msk.bf16.vlgmr.msra.gmra.mrb[0].mxu1 %vm577_vm2, %v587_v4  ;;  %vm1133_vm6 = vcmp.eq.s32.totalorder %v1129_v27, %v1131_v63 }
 0x136   : > { %6362 = vmatpush3.bf16.msra.mxu1 %v7079_v45  ;;  %6369 = vmatprep.mubr.msk.bf16.mxu1 %vm577_vm2, %v594_v7  ;;  %v5726_v0 = vsel %vm1133_vm6, 1.0, %v7308_v3 }
 0x137   : > { %6363 = vmatprep.subr.bf16.mxu1 %v7080_v6 }
 0x13a   : > { %6364 = vmatpush3.bf16.msra.mxu1 %v7080_v6  ;;  %v7096_v6 = vld [vmem:[%s8495_s1 + $0x168] sm:$0xff]  }
 0x13b   : > { %6365 = vmatprep.subr.bf16.mxu1 %v7081_v8 }
 0x13e   : > { %6366 = vmatpush3.bf16.msra.mxu1 %v7081_v8  ;;  %v7100_v8 = vld [vmem:[%s8495_s1 + $0x178] sm:$0xff]  }
 0x13f   : > { %6367 = vmatprep.subr.bf16.mxu1 %v7082_v9 }
 0x142   : > { %6368 = vmatpush3.bf16.msra.mxu1 %v7082_v9 }
 0x143   : > { %6373 = vmatprep.subr.bf16.mxu1 %v7083_v10 }
 0x145   : > { %6370 = vmatmul.mubr.msk.bf16.vlgmr.msra.gmra.mrb[0].mxu1 %vm577_vm2, %v595_v13 }
 0x146   : > { %6374 = vmatpush3.bf16.msra.mxu1 %v7083_v10  ;;  %6381 = vmatprep.mubr.msk.bf16.mxu1 %vm577_vm2, %v588_v60 }
 0x147   : > { %6375 = vmatprep.subr.bf16.mxu1 %v7084_v14 }
 0x14a   : > { %6376 = vmatpush3.bf16.msra.mxu1 %v7084_v14 }
 0x14b   : > { %6377 = vmatprep.subr.bf16.mxu1 %v7085_v15 }
 0x14e   : > { %6378 = vmatpush3.bf16.msra.mxu1 %v7085_v15  ;;  %v7097_v15 = vld [vmem:[%s8495_s1 + $0x150] sm:$0xff]  }
 0x14f   : > { %6379 = vmatprep.subr.bf16.mxu1 %v7086_v16 }
 0x152   : > { %6380 = vmatpush3.bf16.msra.mxu1 %v7086_v16 }
 0x153   : > { %6385 = vmatprep.subr.bf16.mxu1 %v7087_v17 }
 0x155   : > { %6382 = vmatmul.mubr.msk.bf16.vlgmr.msra.gmra.mrb[4].mxu1 %vm577_vm2, %v589_v59 }
 0x156   : > { %6386 = vmatpush3.bf16.msra.mxu1 %v7087_v17  ;;  %6393 = vmatprep.mubr.msk.bf16.mxu1 %vm577_vm2, %v586_v2  ;;  %v1139_v2 = vadd.s32 1, %v1131_v63  ;;  %v7099_v17 = vld [vmem:[%s8495_s1 + $0x158] sm:$0xff]  }
 0x157   : > { %6387 = vmatprep.subr.bf16.mxu1 %v7088_v18 }
 0x158   : > { %vm1141_vm7 = vcmp.eq.s32.totalorder %v1129_v27, %v1139_v2  ;;  %v7103_v27 = vld [vmem:[%s8495_s1 + $0x1a8] sm:$0xff]   ;;  %v7116_v2 = vld [vmem:[%s8495_s1 + $0x1f8] sm:$0xff]  }
 0x15a   : > { %6388 = vmatpush3.bf16.msra.mxu1 %v7088_v18 }
 0x15b   : > { %6389 = vmatprep.subr.bf16.mxu1 %v7089_v19 }
 0x15e   : > { %6390 = vmatpush3.bf16.msra.mxu1 %v7089_v19 }
 0x15f   : > { %6391 = vmatprep.subr.bf16.mxu1 %v7090_v20 }
 0x162   : > { %6392 = vmatpush3.bf16.msra.mxu1 %v7090_v20 }
 0x163   : > { %6397 = vmatprep.subr.bf16.mxu1 %v7091_v21 }
 0x165   : > { %6394 = vmatmul.mubr.msk.bf16.vlgmr.msra.gmra.mrb[4].mxu1 %vm577_vm2, %v587_v4  ;;  %v5728_v4 = vsel %vm1141_vm7, 1.0, %v7308_v3 }
 0x166   : > { %6398 = vmatpush3.bf16.msra.mxu1 %v7091_v21  ;;  %6405 = vmatprep.mubr.msk.bf16.mxu1 %vm577_vm2, %v594_v7  ;;  %v7098_v7 = vld [vmem:[%s8495_s1 + $0x170] sm:$0xff]  }
 0x167   : > { %6399 = vmatprep.subr.bf16.mxu1 %v7092_v22 }
 0x16a   : > { %6400 = vmatpush3.bf16.msra.mxu1 %v7092_v22 }
 0x16b   : > { %6401 = vmatprep.subr.bf16.mxu1 %v7093_v23 }
 0x16e   : > { %6402 = vmatpush3.bf16.msra.mxu1 %v7093_v23 }
 0x16f   : > { %6403 = vmatprep.subr.bf16.mxu1 %v7094_v24 }
 0x172   : > { %6404 = vmatpush3.bf16.msra.mxu1 %v7094_v24  ;;  %v7101_v24 = vld [vmem:[%s8495_s1 + $0x1a0] sm:$0xff]  }
 0x173   : > { %6447 = vmatprep.subr.bf16.mxu1 %v7308_v3 }
 0x175   : > { %6406 = vmatmul.mubr.msk.bf16.vlgmr.msra.gmra.mrb[4].mxu1 %vm577_vm2, %v595_v13 }
 0x176   : > { %6451 = vmatprep.mubr.msk.bf16.mxu1 %vm7309_vm8, %v7308_v3  ;;  %6448 = vmatpush3.bf16.msra.mxu1 %v7098_v7 }
 0x177   : > { %6449 = vmatprep.subr.bf16.mxu1 %v7308_v3 }
 0x17a   : > { %6450 = vmatpush3.bf16.msra.mxu1 %v7100_v8  ;;  %v7119_v8 = vld [vmem:[%s8495_s1 + $0x1c8] sm:$0xff]  }
 0x17b   : > { %6491 = vmatprep.subr.bf16.mxu1 %v7308_v3 }
 0x1ff   : > { %v6347_v31 = vpop.f32.mrb[4].mxu0 }
 0x200   : > { %v676_v32 = vpop.f32.mrb[5].mxu0 }
 0x201   : > { %v6348_v33 = vpop.f32.mrb[6].mxu0 }
 0x202   : > { %v679_v34 = vpop.f32.mrb[7].mxu0 }
 0x218   : > { %v6371_v35 = vpop.f32.mrb[0].mxu1 }
 0x219   : > { %v6953_v36 = vadd.f32 %v6371_v35, %v6347_v31  ;;  %v842_v37 = vpop.f32.mrb[1].mxu1  ;;  %v7106_v31 = vld [vmem:[%s8495_s1 + $0x210] sm:$0xff]  }
 0x21a   : > { %v6954_v38 = vadd.f32 %v842_v37, %v676_v32  ;;  %v6372_v39 = vpop.f32.mrb[2].mxu1  ;;  %v7107_v32 = vld [vmem:[%s8495_s1 + $0x1b8] sm:$0xff]  }
 0x21b   : > { %v6955_v40 = vadd.f32 %v6372_v39, %v6348_v33  ;;  %v845_v41 = vpop.f32.mrb[3].mxu1  ;;  %v7108_v33 = vld [vmem:[%s8495_s1 + $0x218] sm:$0xff]  }
 0x21c   : > { %v6956_v42 = vadd.f32 %v845_v41, %v679_v34 }
 0x248   : > { %v6407_v43 = vpop.f32.mrb[4].mxu1 }
 0x249   : > { %v1110_v45 = vmax.f32 %v6953_v36, %v6407_v43  ;;  %v1089_v46 = vpop.f32.mrb[5].mxu1  ;;  %v5742_v43 = vld [vmem:[%s8496_s2 + $0x2] ss:$0 sm:$0xff] }
 0x24a   : > { %v1108_v47 = vmax.f32 %v6954_v38, %v1089_v46  ;;  %v6408_v48 = vpop.f32.mrb[6].mxu1 }
 0x24b   : > { %v1119_v49 = vadd.f32 %v5724_v44, %v1110_v45  ;;  %v1111_v50 = vmax.f32 %v6955_v40, %v6408_v48  ;;  %v1092_v51 = vpop.f32.mrb[7].mxu1 }
 0x24c   : > { %v1117_v52 = vadd.f32 %v5724_v44, %v1108_v47  ;;  %v1109_v53 = vmax.f32 %v6956_v42, %v1092_v51 }
 0x24d   : > { %v1120_v54 = vadd.f32 %v5724_v44, %v1111_v50  ;;  %v1123_v57 = vmax.f32 %v1119_v49, 0.0 }
 0x24e   : > { %v1118_v55 = vadd.f32 %v5724_v44, %v1109_v53  ;;  %v1121_v59 = vmax.f32 %v1117_v52, 0.0 }
 0x24f   : > { %v1124_v58 = vmax.f32 %v1120_v54, 0.0 }
 0x250   : > { %v1122_v60 = vmax.f32 %v1118_v55, 0.0  ;;  %v7109_v55 = vld [vmem:[%s8495_s1 + $0x180] sm:$0xff]  }
 0x251   : > { %v6935_v61 = vpack.c.bf16 %v1124_v58, %v1123_v57  ;;  %v7111_v58 = vld [vmem:[%s8495_s1 + $0x188] sm:$0xff]  }
 0x252   : > { %v6931_v62 = vpack.c.bf16 %v1122_v60, %v1121_v59  ;;  %v7112_v59 = vld [vmem:[%s8495_s1 + $0x1e8] sm:$0xff]   ;;  %v7113_v60 = vld [vmem:[%s8495_s1 + $0x190] sm:$0xff]  }
 0x254   : > { %6932 = vmatprep.subr.bf16.mxu0 %v6931_v62 }
 0x255   : > { %6934 = vmatpush3.bf16.msra.mxu0 %v6931_v62 }
 0x256   : > { %6936 = vmatprep.subr.bf16.mxu0 %v6935_v61 }
 0x259   : > { %6938 = vmatpush3.bf16.msra.mxu0 %v6935_v61 }
 0x25a   : > { %6940 = vmatprep.subr.bf16.mxu0 %v6931_v62 }
 0x25c   : > { %6418 = vmatmul.mubr.msk.f32.vlgmr.msra.gmra.mrb[8].mxu0 %vm1146_vm4, %v5726_v0  ;;  %v7115_v0 = vld [vmem:[%s8495_s1 + $0x198] sm:$0xff]  }
 0x25d   : > { %6942 = vmatpush3.bf16.msra.mxu0 %v6931_v62  ;;  %6428 = vmatprep.mubr.msk.f32.mxu0 %vm1146_vm4, %v7535_v1 }
 0x25e   : > { %6944 = vmatprep.subr.bf16.mxu0 %v6935_v61 }
 0x261   : > { %6946 = vmatpush3.bf16.msra.mxu0 %v6935_v61  ;;  %v7114_v61 = vld [vmem:[%s8495_s1 + $0x1f0] sm:$0xff]  }
 0x262   : > { %6431 = vmatprep.subr.bf16.mxu0 %v7308_v3 }
 0x264   : > { %6429 = vmatmul.mubr.msk.f32.vlgmr.msra.gmra.mrb[10].mxu0 %vm1146_vm4, %v5728_v4 }
 0x265   : > { %6432 = vmatpush3.bf16.msra.mxu0 %v7095_v5  ;;  %6435 = vmatprep.mubr.msk.bf16.mxu0 %vm7309_vm8, %v7308_v3  ;;  %v7117_v5 = vld [vmem:[%s8495_s1 + $0x1c0] sm:$0xff]  }
 0x266   : > { %6433 = vmatprep.subr.bf16.mxu0 %v7308_v3 }
 0x269   : > { %6434 = vmatpush3.bf16.msra.mxu0 %v7096_v6  ;;  %v7118_v6 = vld [vmem:[%s8495_s1 + $0x220] sm:$0xff]  }
 0x26a   : > { %6439 = vmatprep.subr.bf16.mxu0 %v7308_v3 }
 0x32f   : > { %v6419_v9 = vpop.f32.mrb[8].mxu0 }
 0x330   : > { %v1219_v10 = vpop.f32.mrb[9].mxu0 }
 0x337   : > { %v6430_v11 = vpop.f32.mrb[10].mxu0 }
 0x338   : > { %v1310_v12 = vmax.f32 %v6419_v9, %v6430_v11  ;;  %v1300_v13 = vpop.f32.mrb[11].mxu0  ;;  %v7120_v9 = vld [vmem:[%s8495_s1 + $0x228] sm:$0xff]   ;;  %v7122_v11 = vld [vmem:[%s8495_s1 + $0x230] sm:$0xff]  }
 0x339   : > { %v1309_v14 = vmax.f32 %v1219_v10, %v1300_v13  ;;  %v7121_v10 = vld [vmem:[%s8495_s1 + $0x1d0] sm:$0xff]   ;;  %v7124_v13 = vld [vmem:[%s8495_s1 + $0x238] sm:$0xff]  }
 0x33a   : > { %1313 = vst.msk [vmem:[#allocation2 + $0x9] sm:$0xff] %vm1146_vm4, %v1310_v12 }
 0x33b   : > { %1312 = vst.msk [vmem:[#allocation2 + $0x1] sm:$0xff] %vm1146_vm4, %v1309_v14  ;;  %v1317_v16 = vpack.c.bf16 %v1310_v12, %v1309_v14  ;;  %v7123_v12 = vld [vmem:[%s8495_s1 + $0x1d8] sm:$0xff]  }
 0x33d   : > { %6436 = vmatmul.mubr.msk.bf16.vlgmr.msra.gmra.mrb[12].mxu0 %vm1146_vm4, %v1317_v16  ;;  %v7310_v16 = vmov 0.0|0.0  }
 0x33e   : > { %6440 = vmatpush3.bf16.msra.mxu0 %v7097_v15  ;;  %6443 = vmatprep.mubr.msk.bf16.mxu0 %vm7309_vm8, %v7308_v3 }
 0x33f   : > { %6441 = vmatprep.subr.bf16.mxu0 %v7308_v3 }
 0x341   : > { %v1319_v18 = vld [vmem:[#allocation2 + $0xa] sm:$0xff] }
 0x342   : > { %v1314_v19 = vld [vmem:[#allocation2] sm:$0xff]  ;;  %6442 = vmatpush3.bf16.msra.mxu0 %v7099_v17  ;;  %v1315_v21 = vld [vmem:[#allocation2 + $0x8] sm:$0xff]  ;;  %1512 = vst.msk [vmem:[#allocation2 + $0x11] sm:$0x1] %vm228_vm0, %v7308_v3 }
 0x343   : > { %v1318_v20 = vld [vmem:[#allocation2 + $0x2] sm:$0xff]  ;;  %v1316_v22 = vpack.c.bf16 %v1315_v21, %v1314_v19  ;;  %6455 = vmatprep.subr.bf16.mxu0 %v7308_v3 }
 0x344   : > { %v1320_v23 = vpack.c.bf16 %v1319_v18, %v1318_v20  ;;  %v5773_v19 = vld [vmem:[%s8496_s2 + $0x3] ss:$0 sm:$0xff] }
 0x345   : > { %6444 = vmatmul.mubr.msk.bf16.vlgmr.msra.gmra.mrb[16].mxu0 %vm1146_vm4, %v1316_v22 }
 0x346   : > { %6452 = vmatmul.mubr.msk.bf16.vlgmr.msra.gmra.mrb[8].mxu1 %vm1146_vm4, %v1320_v23  ;;  %6463 = vmatprep.mubr.msk.bf16.mxu0 %vm7309_vm8, %v7308_v3 }
 0x347   : > { %6499 = vmatprep.mubr.msk.bf16.mxu1 %vm7309_vm8, %v7308_v3  ;;  %6456 = vmatpush3.bf16.msra.mxu0 %v7101_v24 }
 0x348   : > { %6492 = vmatpush3.bf16.msra.mxu1 %v7102_v25  ;;  %6457 = vmatprep.subr.bf16.mxu0 %v7308_v3 }
 0x349   : > { %6493 = vmatprep.subr.bf16.mxu1 %v7308_v3 }
 0x34b   : > { %6458 = vmatpush3.bf16.msra.mxu0 %v7103_v27 }
 0x34c   : > { %6494 = vmatpush3.bf16.msra.mxu1 %v7104_v28  ;;  %6459 = vmatprep.subr.bf16.mxu0 %v7308_v3 }
 0x34d   : > { %6495 = vmatprep.subr.bf16.mxu1 %v7308_v3 }
 0x34f   : > { %6460 = vmatpush3.bf16.msra.mxu0 %v7105_v30 }
 0x350   : > { %6496 = vmatpush3.bf16.msra.mxu1 %v7106_v31  ;;  %6461 = vmatprep.subr.bf16.mxu0 %v7308_v3 }
 0x351   : > { %6497 = vmatprep.subr.bf16.mxu1 %v7308_v3 }
 0x353   : > { %6462 = vmatpush3.bf16.msra.mxu0 %v7107_v32 }
 0x354   : > { %6498 = vmatpush3.bf16.msra.mxu1 %v7108_v33  ;;  %6467 = vmatprep.subr.bf16.mxu0 %v7308_v3 }
 0x355   : > { %6503 = vmatprep.subr.bf16.mxu1 %v7308_v3 }
 0x410   : > { %v1378_v34 = vpop.f32.mrb[12].mxu0 }
 0x411   : > { %v6437_v35 = vpop.f32.mrb[13].mxu0 }
 0x412   : > { %v1381_v36 = vpop.f32.mrb[14].mxu0  ;;  %v7125_v35 = vld [vmem:[%s8495_s1 + $0x250] sm:$0xff]  }
 0x413   : > { %v6438_v37 = vpop.f32.mrb[15].mxu0 }
 0x414   : > { %v7127_v37 = vld [vmem:[%s8495_s1 + $0x240] sm:$0xff]  }
 0x418   : > { %v1434_v38 = vpop.f32.mrb[16].mxu0 }
 0x419   : > { %v1494_v39 = vpop.f32.mrb[8].mxu1  ;;  %v1435_v40 = vadd.f32 %v1434_v38, %v1378_v34  ;;  %v6445_v41 = vpop.f32.mrb[17].mxu0  ;;  %v7129_v38 = vld [vmem:[%s8495_s1 + $0x248] sm:$0xff]  }
 0x41a   : > { %v6453_v42 = vpop.f32.mrb[9].mxu1  ;;  %v1437_v44 = vpop.f32.mrb[18].mxu0 }
 0x41b   : > { %v1497_v45 = vpop.f32.mrb[10].mxu1  ;;  %v1501_v46 = vadd.f32 %v1494_v39, %v1435_v40  ;;  %v1438_v47 = vadd.f32 %v1437_v44, %v1381_v36  ;;  %v6446_v48 = vpop.f32.mrb[19].mxu0  ;;  %v7126_v36 = vld [vmem:[%s8495_s1 + $0x258] sm:$0xff]   ;;  %v7128_v44 = vld [vmem:[%s8495_s1 + $0x260] sm:$0xff]  }
 0x41c   : > { %v6454_v49 = vpop.f32.mrb[11].mxu1 }
 0x41d   : > { %v1508_v50 = vadd.f32 %v5742_v43, %v1501_v46  ;;  %v1502_v51 = vadd.f32 %v1497_v45, %v1438_v47  ;;  %v7130_v46 = vld [vmem:[%s8495_s1 + $0x268] sm:$0xff]  }
 0x41f   : > { %v1510_v52 = vmax.f32 %v1508_v50, 0.0  ;;  %v1509_v53 = vadd.f32 %v5742_v43, %v1502_v51  ;;  %v7131_v51 = vld [vmem:[%s8495_s1 + $0x290] sm:$0xff]  }
 0x421   : > { %1513 = vst.msk [vmem:[#allocation2 + $0x1] sm:$0xff] %vm577_vm2, %v1510_v52  ;;  %v1511_v54 = vmax.f32 %v1509_v53, 0.0  ;;  %v7133_v53 = vld [vmem:[%s8495_s1 + $0x2a0] sm:$0xff]  }
 0x423   : > { %v1518_v57 = vpack.c.bf16 %v1511_v54, %v1510_v52  ;;  %1514 = vst.msk [vmem:[#allocation2 + $0x9] sm:$0xff] %vm577_vm2, %v1511_v54  ;;  %v7132_v52 = vld [vmem:[%s8495_s1 + $0x298] sm:$0xff]   ;;  %v7134_v54 = vld [vmem:[%s8495_s1 + $0x270] sm:$0xff]  }
 0x425   : > { %6464 = vmatmul.mubr.msk.bf16.vlgmr.msra.gmra.mrb[20].mxu0 %vm577_vm2, %v1518_v57  ;;  %6500 = vmatmul.mubr.msk.bf16.vlgmr.msra.gmra.mrb[12].mxu1 %vm577_vm2, %v1518_v57  ;;  %v7138_v57 = vld [vmem:[%s8495_s1 + $0x280] sm:$0xff]  }
 0x426   : > { %6468 = vmatpush3.bf16.msra.mxu0 %v7109_v55  ;;  %6504 = vmatpush3.bf16.msra.mxu1 %v7110_v56  ;;  %v7135_v55 = vld [vmem:[%s8495_s1 + $0x2a8] sm:$0xff]   ;;  %v7136_v56 = vld [vmem:[%s8495_s1 + $0x278] sm:$0xff]  }
 0x427   : > { %6469 = vmatprep.subr.bf16.mxu0 %v7308_v3  ;;  %6505 = vmatprep.subr.bf16.mxu1 %v7308_v3 }
 0x428   : > { %6475 = vmatprep.mubr.msk.bf16.mxu0 %vm7309_vm8, %v7308_v3  ;;  %6511 = vmatprep.mubr.msk.bf16.mxu1 %vm7309_vm8, %v7308_v3  ;;  %v1515_v4 = vld [vmem:[#allocation2] sm:$0xff] }
 0x42a   : > { %6470 = vmatpush3.bf16.msra.mxu0 %v7111_v58  ;;  %6506 = vmatpush3.bf16.msra.mxu1 %v7112_v59  ;;  %v1516_v62 = vld [vmem:[#allocation2 + $0x8] sm:$0xff] }
 0x42b   : > { %v1519_v63 = vld [vmem:[#allocation2 + $0x2] sm:$0xff]  ;;  %6471 = vmatprep.subr.bf16.mxu0 %v7308_v3  ;;  %6507 = vmatprep.subr.bf16.mxu1 %v7308_v3  ;;  %v1517_v7 = vpack.c.bf16 %v1516_v62, %v1515_v4  ;;  %v1520_v14 = vld [vmem:[#allocation2 + $0xa] sm:$0xff] }
 0x42c   : > { %2130 = vst.msk [vmem:[#allocation2 + $0x9] sm:$0x1] %vm228_vm0, %v7308_v3  ;;  %v1521_v15 = vpack.c.bf16 %v1520_v14, %v1519_v63  ;;  %v7140_v58 = vld [vmem:[%s8495_s1 + $0x288] sm:$0xff]   ;;  %v7137_v14 = vld [vmem:[%s8495_s1 + $0x2b0] sm:$0xff]  }
 0x42e   : > { %6472 = vmatpush3.bf16.msra.mxu0 %v7113_v60  ;;  %6508 = vmatpush3.bf16.msra.mxu1 %v7114_v61 }
 0x42f   : > { %6473 = vmatprep.subr.bf16.mxu0 %v7308_v3  ;;  %6509 = vmatprep.subr.bf16.mxu1 %v7308_v3 }
 0x432   : > { %6474 = vmatpush3.bf16.msra.mxu0 %v7115_v0  ;;  %6510 = vmatpush3.bf16.msra.mxu1 %v7116_v2 }
 0x433   : > { %6479 = vmatprep.subr.bf16.mxu0 %v7308_v3  ;;  %6515 = vmatprep.subr.bf16.mxu1 %v7308_v3 }
 0x435   : > { %6476 = vmatmul.mubr.msk.bf16.vlgmr.msra.gmra.mrb[20].mxu0 %vm577_vm2, %v1517_v7  ;;  %6512 = vmatmul.mubr.msk.bf16.vlgmr.msra.gmra.mrb[12].mxu1 %vm577_vm2, %v1517_v7 }
 0x436   : > { %6480 = vmatpush3.bf16.msra.mxu0 %v7117_v5  ;;  %6516 = vmatpush3.bf16.msra.mxu1 %v7118_v6  ;;  %v5785_v6 = vld [vmem:[%s8496_s2 + $0x4] ss:$0 sm:$0xff] }
 0x437   : > { %6481 = vmatprep.subr.bf16.mxu0 %v7308_v3  ;;  %6517 = vmatprep.subr.bf16.mxu1 %v7308_v3 }
 0x438   : > { %6487 = vmatprep.mubr.msk.bf16.mxu0 %vm7309_vm8, %v7308_v3  ;;  %6523 = vmatprep.mubr.msk.bf16.mxu1 %vm7309_vm8, %v7308_v3 }
 0x43a   : > { %6482 = vmatpush3.bf16.msra.mxu0 %v7119_v8  ;;  %6518 = vmatpush3.bf16.msra.mxu1 %v7120_v9 }
 0x43b   : > { %6483 = vmatprep.subr.bf16.mxu0 %v7308_v3  ;;  %6519 = vmatprep.subr.bf16.mxu1 %v7308_v3 }
 0x43e   : > { %6484 = vmatpush3.bf16.msra.mxu0 %v7121_v10  ;;  %6520 = vmatpush3.bf16.msra.mxu1 %v7122_v11 }
 0x43f   : > { %6485 = vmatprep.subr.bf16.mxu0 %v7308_v3  ;;  %6521 = vmatprep.subr.bf16.mxu1 %v7308_v3 }
 0x442   : > { %6486 = vmatpush3.bf16.msra.mxu0 %v7123_v12  ;;  %6522 = vmatpush3.bf16.msra.mxu1 %v7124_v13 }
 0x443   : > { %6947 = vmatprep.subr.bf16.mxu0 %v7310_v16  ;;  %6950 = vmatprep.subr.bf16.mxu1 %v7310_v16  ;;  %v7139_v16 = vld [vmem:[%s8495_s1 + $0x2b8] sm:$0xff]  }
 0x445   : > { %6488 = vmatmul.mubr.msk.bf16.vlgmr.msra.gmra.mrb[20].mxu0 %vm577_vm2, %v1521_v15  ;;  %6524 = vmatmul.mubr.msk.bf16.vlgmr.msra.gmra.mrb[12].mxu1 %vm577_vm2, %v1521_v15 }
 0x446   : > { %6531 = vmatprep.mubr.msk.f32.mxu0 %vm7309_vm8, %v7308_v3  ;;  %6538 = vmatprep.mubr.msk.f32.mxu1 %vm7309_vm8, %v7308_v3 }
 0x518   : > { %v1743_v17 = vpop.f32.mrb[20].mxu0  ;;  %v1964_v18 = vpop.f32.mrb[12].mxu1 }
 0x519   : > { %v1973_v20 = vmax.f32 %v1743_v17, %v1964_v18  ;;  %v6489_v21 = vpop.f32.mrb[21].mxu0  ;;  %v6525_v22 = vpop.f32.mrb[13].mxu1  ;;  %v7141_v18 = vld [vmem:[%s8495_s1 + $0x2c0] sm:$0xff]  }
 0x51a   : > { %v1746_v23 = vpop.f32.mrb[22].mxu0  ;;  %v1967_v24 = vpop.f32.mrb[14].mxu1  ;;  %v7142_v21 = vld [vmem:[%s8495_s1 + $0x2c8] sm:$0xff]  }
 0x51b   : > { %v1980_v25 = vadd.f32 %v5773_v19, %v1973_v20  ;;  %v1974_v27 = vmax.f32 %v1746_v23, %v1967_v24  ;;  %v6490_v28 = vpop.f32.mrb[23].mxu0  ;;  %v6526_v30 = vpop.f32.mrb[15].mxu1  ;;  %v7143_v23 = vld [vmem:[%s8495_s1 + $0x2f0] sm:$0xff]  }
 0x51c   : > { %v7144_v24 = vld [vmem:[%s8495_s1 + $0x350] sm:$0xff]   ;;  %v7147_v28 = vld [vmem:[%s8495_s1 + $0x300] sm:$0xff]  }
 0x51d   : > { %v1981_v31 = vadd.f32 %v5773_v19, %v1974_v27  ;;  %v1982_v32 = vmax.f32 %v1980_v25, 0.0  ;;  %v7145_v25 = vld [vmem:[%s8495_s1 + $0x2f8] sm:$0xff]   ;;  %v7148_v30 = vld [vmem:[%s8495_s1 + $0x360] sm:$0xff]  }
 0x51e   : > { %v7146_v27 = vld [vmem:[%s8495_s1 + $0x358] sm:$0xff]  }
 0x51f   : > { %v1983_v33 = vmax.f32 %v1981_v31, 0.0  ;;  %v7149_v31 = vld [vmem:[%s8495_s1 + $0x308] sm:$0xff]  }
 0x521   : > { %v6948_v34 = vpack.c.bf16 %v1983_v33, %v1982_v32  ;;  %v7150_v32 = vld [vmem:[%s8495_s1 + $0x368] sm:$0xff]  }
 0x523   : > { %6949 = vmatpush3.bf16.msra.mxu0 %v6948_v34  ;;  %6952 = vmatpush3.bf16.msra.mxu1 %v6948_v34 }
 0x524   : > { %6541 = vmatprep.subr.bf16.mxu0 %v7308_v3  ;;  %6549 = vmatprep.subr.bf16.mxu1 %v7308_v3 }
 0x526   : > { %6532 = vmatmul.mubr.msk.f32.vlgmr.msra.gmra.mrb[24].mxu0 %vm1984_vm9, %v7524_v29  ;;  %6539 = vmatmul.mubr.msk.f32.vlgmr.msra.gmra.mrb[16].mxu1 %vm1984_vm9, %v7535_v1 }
 0x527   : > { %6542 = vmatpush3.bf16.msra.mxu0 %v7125_v35  ;;  %6545 = vmatprep.mubr.msk.bf16.mxu0 %vm7309_vm8, %v7308_v3 }
 0x528   : > { %6543 = vmatprep.subr.bf16.mxu0 %v7308_v3  ;;  %6553 = vmatprep.mubr.msk.bf16.mxu1 %vm7309_vm8, %v7308_v3 }
 0x529   : > { %6550 = vmatpush3.bf16.msra.mxu1 %v7127_v37 }
 0x52a   : > { %6551 = vmatprep.subr.bf16.mxu1 %v7308_v3 }
 0x52b   : > { %6544 = vmatpush3.bf16.msra.mxu0 %v7126_v36 }
 0x52c   : > { %6557 = vmatprep.subr.bf16.mxu0 %v7308_v3 }
 0x52d   : > { %6552 = vmatpush3.bf16.msra.mxu1 %v7129_v38 }
 0x52e   : > { %6565 = vmatprep.subr.bf16.mxu1 %v7308_v3 }
 0x5f9   : > { %v2053_v39 = vpop.f32.mrb[24].mxu0  ;;  %v2125_v40 = vpop.f32.mrb[16].mxu1 }
 0x5fa   : > { %v2129_v41 = vmax.f32 %v2053_v39, %v2125_v40  ;;  %v6533_v42 = vpop.f32.mrb[25].mxu0  ;;  %v6540_v43 = vpop.f32.mrb[17].mxu1 }
 0x5fb   : > { %v5801_v43 = vld [vmem:[%s8496_s2 + $0x5] ss:$0 sm:$0xff] }
 0x5fc   : > { %v2134_v45 = vpack.c.bf16 %v2129_v41, %v2129_v41  ;;  %2131 = vst.msk [vmem:[#allocation2 + $0x1] sm:$0xff] %vm1146_vm4, %v2129_v41 }
 0x5fe   : > { %6546 = vmatmul.mubr.msk.bf16.vlgmr.msra.gmra.mrb[28].mxu0 %vm1146_vm4, %v2134_v45 }
 0x5ff   : > { %6558 = vmatpush3.bf16.msra.mxu0 %v7128_v44  ;;  %6561 = vmatprep.mubr.msk.bf16.mxu0 %vm7309_vm8, %v7308_v3 }
 0x600   : > { %6559 = vmatprep.subr.bf16.mxu0 %v7308_v3 }
 0x603   : > { %6560 = vmatpush3.bf16.msra.mxu0 %v7130_v46  ;;  %v2132_v47 = vld [vmem:[#allocation2] sm:$0xff] }
 0x604   : > { %v2135_v48 = vld [vmem:[#allocation2 + $0x2] sm:$0xff]  ;;  %v2133_v49 = vpack.c.bf16 %v2132_v47, %v2132_v47  ;;  %6577 = vmatprep.subr.bf16.mxu0 %v7308_v3 }
 0x605   : > { %v2136_v50 = vpack.c.bf16 %v2135_v48, %v2135_v48  ;;  %2322 = vst.msk [vmem:[#allocation2 + $0x9] sm:$0x1] %vm228_vm0, %v7308_v3 }
 0x606   : > { %6554 = vmatmul.mubr.msk.bf16.vlgmr.msra.gmra.mrb[20].mxu1 %vm1146_vm4, %v2133_v49 }
 0x607   : > { %6562 = vmatmul.mubr.msk.bf16.vlgmr.msra.gmra.mrb[32].mxu0 %vm1146_vm4, %v2136_v50  ;;  %6573 = vmatprep.mubr.msk.bf16.mxu1 %vm7309_vm8, %v7308_v3  ;;  %v7151_v50 = vld [vmem:[%s8495_s1 + $0x2d0] sm:$0xff]  }
 0x608   : > { %6585 = vmatprep.mubr.msk.bf16.mxu0 %vm7309_vm8, %v7308_v3  ;;  %6566 = vmatpush3.bf16.msra.mxu1 %v7131_v51  ;;  %v7152_v51 = vld [vmem:[%s8495_s1 + $0x330] sm:$0xff]  }
 0x609   : > { %6567 = vmatprep.subr.bf16.mxu1 %v7308_v3  ;;  %6578 = vmatpush3.bf16.msra.mxu0 %v7134_v54  ;;  %v7154_v54 = vld [vmem:[%s8495_s1 + $0x338] sm:$0xff]  }
 0x60a   : > { %6579 = vmatprep.subr.bf16.mxu0 %v7308_v3 }
 0x60c   : > { %6568 = vmatpush3.bf16.msra.mxu1 %v7132_v52 }
 0x60d   : > { %6569 = vmatprep.subr.bf16.mxu1 %v7308_v3  ;;  %6580 = vmatpush3.bf16.msra.mxu0 %v7136_v56  ;;  %v7156_v56 = vld [vmem:[%s8495_s1 + $0x340] sm:$0xff]  }
 0x60e   : > { %6581 = vmatprep.subr.bf16.mxu0 %v7308_v3 }
 0x610   : > { %6570 = vmatpush3.bf16.msra.mxu1 %v7133_v53  ;;  %v7153_v53 = vld [vmem:[%s8495_s1 + $0x2d8] sm:$0xff]  }
 0x611   : > { %6571 = vmatprep.subr.bf16.mxu1 %v7308_v3  ;;  %6582 = vmatpush3.bf16.msra.mxu0 %v7138_v57 }
 0x612   : > { %6583 = vmatprep.subr.bf16.mxu0 %v7308_v3 }
 0x614   : > { %6572 = vmatpush3.bf16.msra.mxu1 %v7135_v55  ;;  %v7155_v55 = vld [vmem:[%s8495_s1 + $0x2e0] sm:$0xff]  }
 0x615   : > { %6589 = vmatprep.subr.bf16.mxu1 %v7308_v3  ;;  %6584 = vmatpush3.bf16.msra.mxu0 %v7140_v58 }
 0x616   : > { %6601 = vmatprep.subr.bf16.mxu0 %v7308_v3 }
 0x6d1   : > { %v2194_v59 = vpop.f32.mrb[28].mxu0 }
 0x6d2   : > { %v6547_v60 = vpop.f32.mrb[29].mxu0 }
 0x6d3   : > { %v2197_v61 = vpop.f32.mrb[30].mxu0  ;;  %v7158_v60 = vld [vmem:[%s8495_s1 + $0x348] sm:$0xff]  }
 0x6d4   : > { %v6548_v62 = vpop.f32.mrb[31].mxu0  ;;  %v7159_v61 = vld [vmem:[%s8495_s1 + $0x310] sm:$0xff]  }
 0x6d5   : > { %v7160_v62 = vld [vmem:[%s8495_s1 + $0x370] sm:$0xff]  }
 0x6d9   : > { %v2249_v63 = vpop.f32.mrb[20].mxu1 }
 0x6da   : > { %v2308_v0 = vpop.f32.mrb[32].mxu0  ;;  %v2250_v2 = vadd.f32 %v2249_v63, %v2194_v59  ;;  %v6555_v4 = vpop.f32.mrb[21].mxu1  ;;  %v7157_v59 = vld [vmem:[%s8495_s1 + $0x2e8] sm:$0xff]  }
 0x6db   : > { %v6563_v5 = vpop.f32.mrb[33].mxu0  ;;  %v2252_v7 = vpop.f32.mrb[22].mxu1  ;;  %v7163_v4 = vld [vmem:[%s8495_s1 + $0x320] sm:$0xff]  }
 0x6dc   : > { %v2311_v8 = vpop.f32.mrb[34].mxu0  ;;  %v2314_v9 = vadd.f32 %v2308_v0, %v2250_v2  ;;  %v6556_v10 = vpop.f32.mrb[23].mxu1  ;;  %v7161_v0 = vld [vmem:[%s8495_s1 + $0x318] sm:$0xff]   ;;  %v7164_v5 = vld [vmem:[%s8495_s1 + $0x380] sm:$0xff]   ;;  %v7166_v7 = vld [vmem:[%s8495_s1 + $0x388] sm:$0xff]  }
 0x6dd   : > { %v6564_v11 = vpop.f32.mrb[35].mxu0  ;;  %v7162_v2 = vld [vmem:[%s8495_s1 + $0x378] sm:$0xff]  }
 0x6de   : > { %v2320_v12 = vadd.f32 %v5785_v6, %v2314_v9  ;;  %v7165_v6 = vld [vmem:[%s8495_s1 + $0x328] sm:$0xff]   ;;  %v5832_v11 = vld [vmem:[%s8496_s2 + $0x6] ss:$0 sm:$0xff] }
 0x6e0   : > { %v2321_v13 = vmax.f32 %v2320_v12, 0.0 }
 0x6e2   : > { %v2326_v15 = vpack.c.bf16 %v2321_v13, %v2321_v13  ;;  %2323 = vst.msk [vmem:[#allocation2 + $0x1] sm:$0xff] %vm577_vm2, %v2321_v13 }
 0x6e4   : > { %6574 = vmatmul.mubr.msk.bf16.vlgmr.msra.gmra.mrb[24].mxu1 %vm577_vm2, %v2326_v15 }
 0x6e5   : > { %6590 = vmatpush3.bf16.msra.mxu1 %v7137_v14  ;;  %6597 = vmatprep.mubr.msk.bf16.mxu1 %vm7309_vm8, %v7308_v3 }
 0x6e6   : > { %6591 = vmatprep.subr.bf16.mxu1 %v7308_v3 }
 0x6e9   : > { %6592 = vmatpush3.bf16.msra.mxu1 %v7139_v16  ;;  %v2324_v17 = vld [vmem:[#allocation2] sm:$0xff] }
 0x6ea   : > { %v2327_v19 = vld [vmem:[#allocation2 + $0x2] sm:$0xff]  ;;  %6593 = vmatprep.subr.bf16.mxu1 %v7308_v3  ;;  %v2325_v20 = vpack.c.bf16 %v2324_v17, %v2324_v17 }
 0x6eb   : > { %2562 = vst.msk [vmem:[#allocation2 + $0x9] sm:$0x1] %vm228_vm0, %v7308_v3  ;;  %v2328_v22 = vpack.c.bf16 %v2327_v19, %v2327_v19 }
 0x6ec   : > { %6586 = vmatmul.mubr.msk.bf16.vlgmr.msra.gmra.mrb[36].mxu0 %vm577_vm2, %v2325_v20 }
 0x6ed   : > { %6594 = vmatpush3.bf16.msra.mxu1 %v7141_v18  ;;  %6609 = vmatprep.mubr.msk.bf16.mxu0 %vm7309_vm8, %v7308_v3 }
 0x6ee   : > { %6595 = vmatprep.subr.bf16.mxu1 %v7308_v3  ;;  %6602 = vmatpush3.bf16.msra.mxu0 %v7143_v23  ;;  %v7169_v23 = vld [vmem:[%s8495_s1 + $0x390] sm:$0xff]  }
 0x6ef   : > { %6603 = vmatprep.subr.bf16.mxu0 %v7308_v3 }
 0x6f1   : > { %6596 = vmatpush3.bf16.msra.mxu1 %v7142_v21  ;;  %v7167_v21 = vld [vmem:[%s8495_s1 + $0x3a0] sm:$0xff]  }
 0x6f2   : > { %6637 = vmatprep.subr.bf16.mxu1 %v7308_v3  ;;  %6604 = vmatpush3.bf16.msra.mxu0 %v7145_v25 }
 0x6f3   : > { %6605 = vmatprep.subr.bf16.mxu0 %v7308_v3 }
 0x6f4   : > { %6598 = vmatmul.mubr.msk.bf16.vlgmr.msra.gmra.mrb[28].mxu1 %vm577_vm2, %v2328_v22  ;;  %v7168_v22 = vld [vmem:[%s8495_s1 + $0x3a8] sm:$0xff]  }
 0x6f5   : > { %6645 = vmatprep.mubr.msk.bf16.mxu1 %vm7309_vm8, %v7308_v3  ;;  %6638 = vmatpush3.bf16.msra.mxu1 %v7144_v24  ;;  %v7171_v24 = vld [vmem:[%s8495_s1 + $0x398] sm:$0xff]  }
 0x6f6   : > { %6639 = vmatprep.subr.bf16.mxu1 %v7308_v3  ;;  %6606 = vmatpush3.bf16.msra.mxu0 %v7147_v28 }
 0x6f7   : > { %6607 = vmatprep.subr.bf16.mxu0 %v7308_v3 }
 0x6f9   : > { %6640 = vmatpush3.bf16.msra.mxu1 %v7146_v27 }
 0x6fa   : > { %6641 = vmatprep.subr.bf16.mxu1 %v7308_v3  ;;  %6608 = vmatpush3.bf16.msra.mxu0 %v7149_v31 }
 0x6fb   : > { %6613 = vmatprep.subr.bf16.mxu0 %v7308_v3 }
 0x6fd   : > { %6642 = vmatpush3.bf16.msra.mxu1 %v7148_v30 }
 0x6fe   : > { %6643 = vmatprep.subr.bf16.mxu1 %v7308_v3 }
 0x701   : > { %6644 = vmatpush3.bf16.msra.mxu1 %v7150_v32  ;;  %v7170_v32 = vld [vmem:[%s8495_s1 + $0x3b0] sm:$0xff]  }
 0x702   : > { %6649 = vmatprep.subr.bf16.mxu1 %v7308_v3 }
 0x7b7   : > { %v2406_v33 = vpop.f32.mrb[24].mxu1 }
 0x7b8   : > { %v6575_v34 = vpop.f32.mrb[25].mxu1 }
 0x7b9   : > { %v2409_v35 = vpop.f32.mrb[26].mxu1  ;;  %v7172_v34 = vld [vmem:[%s8495_s1 + $0x3b8] sm:$0xff]  }
 0x7ba   : > { %v6576_v36 = vpop.f32.mrb[27].mxu1 }
 0x7bf   : > { %v2473_v37 = vpop.f32.mrb[36].mxu0 }
 0x7c0   : > { %v2474_v38 = vadd.f32 %v2473_v37, %v2406_v33  ;;  %v6587_v39 = vpop.f32.mrb[37].mxu0 }
 0x7c1   : > { %v2476_v40 = vpop.f32.mrb[38].mxu0  ;;  %v7173_v39 = vld [vmem:[%s8495_s1 + $0x3e0] sm:$0xff]  }
 0x7c2   : > { %v6588_v41 = vpop.f32.mrb[39].mxu0  ;;  %v7174_v40 = vld [vmem:[%s8495_s1 + $0x3e8] sm:$0xff]  }
 0x7c3   : > { %v7175_v41 = vld [vmem:[%s8495_s1 + $0x3f0] sm:$0xff]  }
 0x7c7   : > { %v2548_v42 = vpop.f32.mrb[28].mxu1 }
 0x7c8   : > { %v2554_v44 = vadd.f32 %v2548_v42, %v2474_v38  ;;  %v6599_v45 = vpop.f32.mrb[29].mxu1  ;;  %v7176_v42 = vld [vmem:[%s8495_s1 + $0x3c0] sm:$0xff]  }
 0x7c9   : > { %v2551_v46 = vpop.f32.mrb[30].mxu1  ;;  %v7180_v45 = vld [vmem:[%s8495_s1 + $0x3d0] sm:$0xff]  }
 0x7ca   : > { %v2560_v47 = vadd.f32 %v5801_v43, %v2554_v44  ;;  %v6600_v48 = vpop.f32.mrb[31].mxu1  ;;  %v7177_v43 = vld [vmem:[%s8495_s1 + $0x3f8] sm:$0xff]   ;;  %v7178_v44 = vld [vmem:[%s8495_s1 + $0x3c8] sm:$0xff]  }
 0x7cb   : > { %v7182_v46 = vld [vmem:[%s8495_s1 + $0x3d8] sm:$0xff]  }
 0x7cc   : > { %v2561_v49 = vmax.f32 %v2560_v47, 0.0 }
 0x7ce   : > { %v2566_v52 = vpack.c.bf16 %v2561_v49, %v2561_v49  ;;  %2563 = vst.msk [vmem:[#allocation2 + $0x1] sm:$0xff] %vm577_vm2, %v2561_v49 }
 0x7d0   : > { %6610 = vmatmul.mubr.msk.bf16.vlgmr.msra.gmra.mrb[40].mxu0 %vm577_vm2, %v2566_v52  ;;  %6646 = vmatmul.mubr.msk.bf16.vlgmr.msra.gmra.mrb[32].mxu1 %vm577_vm2, %v2566_v52 }
 0x7d1   : > { %6614 = vmatpush3.bf16.msra.mxu0 %v7151_v50  ;;  %6650 = vmatpush3.bf16.msra.mxu1 %v7152_v51 }
 0x7d2   : > { %6615 = vmatprep.subr.bf16.mxu0 %v7308_v3  ;;  %6651 = vmatprep.subr.bf16.mxu1 %v7308_v3 }
 0x7d3   : > { %6621 = vmatprep.mubr.msk.bf16.mxu0 %vm7309_vm8, %v7308_v3  ;;  %6657 = vmatprep.mubr.msk.bf16.mxu1 %vm7309_vm8, %v7308_v3 }
 0x7d5   : > { %6616 = vmatpush3.bf16.msra.mxu0 %v7153_v53  ;;  %6652 = vmatpush3.bf16.msra.mxu1 %v7154_v54  ;;  %v2564_v57 = vld [vmem:[#allocation2] sm:$0xff] }
 0x7d6   : > { %v2567_v58 = vld [vmem:[#allocation2 + $0x2] sm:$0xff]  ;;  %6617 = vmatprep.subr.bf16.mxu0 %v7308_v3  ;;  %6653 = vmatprep.subr.bf16.mxu1 %v7308_v3  ;;  %v2565_v63 = vpack.c.bf16 %v2564_v57, %v2564_v57 }
 0x7d7   : > { %3166 = vst.msk [vmem:[#allocation2 + $0x5] sm:$0x1] %vm228_vm0, %v7308_v3  ;;  %v2568_v8 = vpack.c.bf16 %v2567_v58, %v2567_v58 }
 0x7d9   : > { %6618 = vmatpush3.bf16.msra.mxu0 %v7155_v55  ;;  %6654 = vmatpush3.bf16.msra.mxu1 %v7156_v56  ;;  %v5844_v56 = vld [vmem:[%s8496_s2 + $0x7] ss:$0 sm:$0xff] }
 0x7da   : > { %6619 = vmatprep.subr.bf16.mxu0 %v7308_v3  ;;  %6655 = vmatprep.subr.bf16.mxu1 %v7308_v3 }
 0x7dd   : > { %6620 = vmatpush3.bf16.msra.mxu0 %v7157_v59  ;;  %6656 = vmatpush3.bf16.msra.mxu1 %v7158_v60 }
 0x7de   : > { %6625 = vmatprep.subr.bf16.mxu0 %v7308_v3  ;;  %6661 = vmatprep.subr.bf16.mxu1 %v7308_v3 }
 0x7e0   : > { %6622 = vmatmul.mubr.msk.bf16.vlgmr.msra.gmra.mrb[40].mxu0 %vm577_vm2, %v2565_v63  ;;  %6658 = vmatmul.mubr.msk.bf16.vlgmr.msra.gmra.mrb[32].mxu1 %vm577_vm2, %v2565_v63 }
 0x7e1   : > { %6626 = vmatpush3.bf16.msra.mxu0 %v7159_v61  ;;  %6662 = vmatpush3.bf16.msra.mxu1 %v7160_v62 }
 0x7e2   : > { %6627 = vmatprep.subr.bf16.mxu0 %v7308_v3  ;;  %6663 = vmatprep.subr.bf16.mxu1 %v7308_v3 }
 0x7e3   : > { %6633 = vmatprep.mubr.msk.bf16.mxu0 %vm7309_vm8, %v7308_v3  ;;  %6669 = vmatprep.mubr.msk.bf16.mxu1 %vm7309_vm8, %v7308_v3 }
 0x7e5   : > { %6628 = vmatpush3.bf16.msra.mxu0 %v7161_v0  ;;  %6664 = vmatpush3.bf16.msra.mxu1 %v7162_v2  ;;  %v7179_v0 = vld [vmem:[%s8495_s1 + $0x400] sm:$0xff]  }
 0x7e6   : > { %6629 = vmatprep.subr.bf16.mxu0 %v7308_v3  ;;  %6665 = vmatprep.subr.bf16.mxu1 %v7308_v3 }
 0x7e9   : > { %6630 = vmatpush3.bf16.msra.mxu0 %v7163_v4  ;;  %6666 = vmatpush3.bf16.msra.mxu1 %v7164_v5  ;;  %v7181_v4 = vld [vmem:[%s8495_s1 + $0x408] sm:$0xff]  }
 0x7ea   : > { %6631 = vmatprep.subr.bf16.mxu0 %v7308_v3  ;;  %6667 = vmatprep.subr.bf16.mxu1 %v7308_v3 }
 0x7ed   : > { %6632 = vmatpush3.bf16.msra.mxu0 %v7165_v6  ;;  %6668 = vmatpush3.bf16.msra.mxu1 %v7166_v7  ;;  %v7183_v6 = vld [vmem:[%s8495_s1 + $0x410] sm:$0xff]  }
 0x7ee   : > { %6673 = vmatprep.subr.mxu0 %v7308_v3  ;;  %6683 = vmatprep.subr.bf16.mxu1 %v7308_v3 }
 0x7f0   : > { %6634 = vmatmul.mubr.msk.bf16.vlgmr.msra.gmra.mrb[40].mxu0 %vm577_vm2, %v2568_v8  ;;  %6670 = vmatmul.mubr.msk.bf16.vlgmr.msra.gmra.mrb[32].mxu1 %vm577_vm2, %v2568_v8 }
 0x7f1   : > { %6675 = vmatprep.mubr.msk.f32.mxu0 %vm7309_vm8, %v7308_v3  ;;  %6687 = vmatprep.mubr.msk.bf16.mxu1 %vm7309_vm8, %v7308_v3 }
 0x7f2   : > { %6684 = vmatpush3.bf16.msra.mxu1 %v7167_v21 }
 0x7f3   : > { %6685 = vmatprep.subr.bf16.mxu1 %v7308_v3 }
 0x7f6   : > { %6686 = vmatpush3.bf16.msra.mxu1 %v7168_v22 }
 0x7f7   : > { %6699 = vmatprep.subr.bf16.mxu1 %v7308_v3 }
 0x8c3   : > { %v2788_v9 = vpop.f32.mrb[40].mxu0  ;;  %v3005_v10 = vpop.f32.mrb[32].mxu1 }
 0x8c4   : > { %v3012_v12 = vmax.f32 %v2788_v9, %v3005_v10  ;;  %v6635_v13 = vpop.f32.mrb[41].mxu0  ;;  %v6671_v14 = vpop.f32.mrb[33].mxu1  ;;  %v7184_v9 = vld [vmem:[%s8495_s1 + $0x418] sm:$0xff]  }
 0x8c5   : > { %v2791_v15 = vpop.f32.mrb[42].mxu0  ;;  %v3008_v16 = vpop.f32.mrb[34].mxu1  ;;  %v7187_v13 = vld [vmem:[%s8495_s1 + $0x448] sm:$0xff]  }
 0x8c6   : > { %v3018_v17 = vadd.f32 %v5832_v11, %v3012_v12  ;;  %v6636_v18 = vpop.f32.mrb[43].mxu0  ;;  %v6672_v19 = vpop.f32.mrb[35].mxu1  ;;  %v7185_v11 = vld [vmem:[%s8495_s1 + $0x440] sm:$0xff]   ;;  %v7188_v14 = vld [vmem:[%s8495_s1 + $0x4a8] sm:$0xff]   ;;  %v7189_v15 = vld [vmem:[%s8495_s1 + $0x450] sm:$0xff]  }
 0x8c7   : > { %v7186_v12 = vld [vmem:[%s8495_s1 + $0x4a0] sm:$0xff]   ;;  %v7190_v16 = vld [vmem:[%s8495_s1 + $0x4b0] sm:$0xff]   ;;  %v7192_v18 = vld [vmem:[%s8495_s1 + $0x4b8] sm:$0xff]  }
 0x8c8   : > { %v3019_v20 = vmax.f32 %v3018_v17, 0.0  ;;  %v7191_v17 = vld [vmem:[%s8495_s1 + $0x458] sm:$0xff]  }
 0x8ca   : > { %6674 = vmatpush3.msra.mxu0 %v3019_v20 }
 0x8cb   : > { %6676 = vmatmul.mubr.msk.f32.vlgmr.msra.gmra.mrb[26].mxu0 %vm3020_vm10, %v7524_v29  ;;  %6678 = vmatprep.subr.mxu0 %v7308_v3 }
 0x8cc   : > { %6679 = vmatpush3.msra.mxu0 %v3019_v20  ;;  %6680 = vmatprep.mubr.msk.f32.mxu0 %vm7309_vm8, %v7308_v3 }
 0x8cd   : > { %6691 = vmatprep.subr.bf16.mxu0 %v7308_v3 }
 0x8cf   : > { %6681 = vmatmul.mubr.msk.f32.vlgmr.msra.gmra.mrb[44].mxu0 %vm3020_vm10, %v7535_v1 }
 0x8d0   : > { %6695 = vmatprep.mubr.msk.bf16.mxu0 %vm7309_vm8, %v7308_v3  ;;  %6692 = vmatpush3.bf16.msra.mxu0 %v7169_v23 }
 0x8d1   : > { %6693 = vmatprep.subr.bf16.mxu0 %v7308_v3 }
 0x8d4   : > { %6694 = vmatpush3.bf16.msra.mxu0 %v7171_v24 }
 0x8d5   : > { %6707 = vmatprep.subr.bf16.mxu0 %v7308_v3 }
 0x99e   : > { %v3089_v25 = vpop.f32.mrb[26].mxu0 }
 0x99f   : > { %v6677_v27 = vpop.f32.mrb[27].mxu0 }
 0x9a2   : > { %v3161_v28 = vpop.f32.mrb[44].mxu0 }
 0x9a3   : > { %v3165_v30 = vmax.f32 %v3089_v25, %v3161_v28  ;;  %v6682_v31 = vpop.f32.mrb[45].mxu0 }
 0x9a4   : > { %v5860_v31 = vld [vmem:[%s8496_s2 + $0x8] ss:$0 sm:$0xff] }
 0x9a5   : > { %v3171_v33 = vpack.c.bf16 %v3165_v30, %v3165_v30  ;;  %3168 = vst.msk [vmem:[#allocation2 + $0x1] sm:$0xf] %vm3167_vm11, %v3165_v30 }
 0x9a7   : > { %6688 = vmatmul.mubr.msk.bf16.vlgmr.msra.gmra.mrb[36].mxu1 %vm1146_vm4, %v3171_v33 }
 0x9a8   : > { %6700 = vmatpush3.bf16.msra.mxu1 %v7170_v32  ;;  %6703 = vmatprep.mubr.msk.bf16.mxu1 %vm7309_vm8, %v7308_v3 }
 0x9a9   : > { %6701 = vmatprep.subr.bf16.mxu1 %v7308_v3 }
 0x9ac   : > { %6702 = vmatpush3.bf16.msra.mxu1 %v7172_v34  ;;  %v3169_v35 = vld [vmem:[#allocation2] sm:$0xf] }
 0x9ad   : > { %v3172_v36 = vld [vmem:[#allocation2 + $0x2] sm:$0xf]  ;;  %v3170_v37 = vpack.c.bf16 %v3169_v35, %v3169_v35  ;;  %6719 = vmatprep.subr.bf16.mxu1 %v7308_v3 }
 0x9ae   : > { %v3173_v38 = vpack.c.bf16 %v3172_v36, %v3172_v36  ;;  %3359 = vst.msk [vmem:[#allocation2 + $0x5] sm:$0x1] %vm228_vm0, %v7308_v3 }
 0x9af   : > { %6696 = vmatmul.mubr.msk.bf16.vlgmr.msra.gmra.mrb[48].mxu0 %vm1146_vm4, %v3170_v37 }
 0x9b0   : > { %6704 = vmatmul.mubr.msk.bf16.vlgmr.msra.gmra.mrb[40].mxu1 %vm1146_vm4, %v3173_v38  ;;  %6715 = vmatprep.mubr.msk.bf16.mxu0 %vm7309_vm8, %v7308_v3  ;;  %v7193_v38 = vld [vmem:[%s8495_s1 + $0x420] sm:$0xff]  }
 0x9b1   : > { %6727 = vmatprep.mubr.msk.bf16.mxu1 %vm7309_vm8, %v7308_v3  ;;  %6708 = vmatpush3.bf16.msra.mxu0 %v7173_v39  ;;  %v7194_v39 = vld [vmem:[%s8495_s1 + $0x480] sm:$0xff]  }
 0x9b2   : > { %6709 = vmatprep.subr.bf16.mxu0 %v7308_v3  ;;  %6720 = vmatpush3.bf16.msra.mxu1 %v7176_v42  ;;  %v7196_v42 = vld [vmem:[%s8495_s1 + $0x488] sm:$0xff]  }
 0x9b3   : > { %6721 = vmatprep.subr.bf16.mxu1 %v7308_v3 }
 0x9b5   : > { %6710 = vmatpush3.bf16.msra.mxu0 %v7174_v40 }
 0x9b6   : > { %6711 = vmatprep.subr.bf16.mxu0 %v7308_v3  ;;  %6722 = vmatpush3.bf16.msra.mxu1 %v7178_v44  ;;  %v7198_v44 = vld [vmem:[%s8495_s1 + $0x490] sm:$0xff]  }
 0x9b7   : > { %6723 = vmatprep.subr.bf16.mxu1 %v7308_v3 }
 0x9b9   : > { %6712 = vmatpush3.bf16.msra.mxu0 %v7175_v41  ;;  %v7195_v41 = vld [vmem:[%s8495_s1 + $0x428] sm:$0xff]  }
 0x9ba   : > { %6713 = vmatprep.subr.bf16.mxu0 %v7308_v3  ;;  %6724 = vmatpush3.bf16.msra.mxu1 %v7180_v45 }
 0x9bb   : > { %6725 = vmatprep.subr.bf16.mxu1 %v7308_v3 }
 0x9bd   : > { %6714 = vmatpush3.bf16.msra.mxu0 %v7177_v43  ;;  %v7197_v43 = vld [vmem:[%s8495_s1 + $0x430] sm:$0xff]  }
 0x9be   : > { %6731 = vmatprep.subr.bf16.mxu0 %v7308_v3  ;;  %6726 = vmatpush3.bf16.msra.mxu1 %v7182_v46 }
 0x9bf   : > { %6743 = vmatprep.subr.bf16.mxu1 %v7308_v3 }
 0xa7a   : > { %v3231_v47 = vpop.f32.mrb[36].mxu1 }
 0xa7b   : > { %v6689_v48 = vpop.f32.mrb[37].mxu1 }
 0xa7c   : > { %v3234_v49 = vpop.f32.mrb[38].mxu1  ;;  %v7200_v48 = vld [vmem:[%s8495_s1 + $0x498] sm:$0xff]  }
 0xa7d   : > { %v6690_v50 = vpop.f32.mrb[39].mxu1  ;;  %v7201_v49 = vld [vmem:[%s8495_s1 + $0x460] sm:$0xff]  }
 0xa7e   : > { %v7202_v50 = vld [vmem:[%s8495_s1 + $0x4c0] sm:$0xff]  }
 0xa82   : > { %v3286_v51 = vpop.f32.mrb[48].mxu0 }
 0xa83   : > { %v3345_v52 = vpop.f32.mrb[40].mxu1  ;;  %v3287_v53 = vadd.f32 %v3286_v51, %v3231_v47  ;;  %v6697_v54 = vpop.f32.mrb[49].mxu0  ;;  %v7199_v47 = vld [vmem:[%s8495_s1 + $0x438] sm:$0xff]  }
 0xa84   : > { %v6705_v55 = vpop.f32.mrb[41].mxu1  ;;  %v3289_v57 = vpop.f32.mrb[50].mxu0  ;;  %v7205_v54 = vld [vmem:[%s8495_s1 + $0x470] sm:$0xff]  }
 0xa85   : > { %v3348_v58 = vpop.f32.mrb[42].mxu1  ;;  %v3351_v59 = vadd.f32 %v3345_v52, %v3287_v53  ;;  %v6698_v60 = vpop.f32.mrb[51].mxu0  ;;  %v7203_v52 = vld [vmem:[%s8495_s1 + $0x468] sm:$0xff]   ;;  %v7206_v55 = vld [vmem:[%s8495_s1 + $0x4d0] sm:$0xff]   ;;  %v7208_v57 = vld [vmem:[%s8495_s1 + $0x4d8] sm:$0xff]  }
 0xa86   : > { %v6706_v61 = vpop.f32.mrb[43].mxu1  ;;  %v7204_v53 = vld [vmem:[%s8495_s1 + $0x4c8] sm:$0xff]  }
 0xa87   : > { %v3357_v62 = vadd.f32 %v5844_v56, %v3351_v59  ;;  %v7207_v56 = vld [vmem:[%s8495_s1 + $0x478] sm:$0xff]   ;;  %v5891_v61 = vld [vmem:[%s8496_s2 + $0x9] ss:$0 sm:$0xff] }
 0xa89   : > { %v3358_v63 = vmax.f32 %v3357_v62, 0.0 }
 0xa8b   : > { %v3364_v2 = vpack.c.bf16 %v3358_v63, %v3358_v63  ;;  %3361 = vst.msk [vmem:[#allocation2 + $0x1] sm:$0xf] %vm3360_vm12, %v3358_v63 }
 0xa8d   : > { %6716 = vmatmul.mubr.msk.bf16.vlgmr.msra.gmra.mrb[52].mxu0 %vm577_vm2, %v3364_v2 }
 0xa8e   : > { %6732 = vmatpush3.bf16.msra.mxu0 %v7179_v0  ;;  %6739 = vmatprep.mubr.msk.bf16.mxu0 %vm7309_vm8, %v7308_v3 }
 0xa8f   : > { %6733 = vmatprep.subr.bf16.mxu0 %v7308_v3 }
 0xa92   : > { %6734 = vmatpush3.bf16.msra.mxu0 %v7181_v4  ;;  %v3362_v5 = vld [vmem:[#allocation2] sm:$0xf] }
 0xa93   : > { %v3365_v7 = vld [vmem:[#allocation2 + $0x2] sm:$0xf]  ;;  %6735 = vmatprep.subr.bf16.mxu0 %v7308_v3  ;;  %v3363_v8 = vpack.c.bf16 %v3362_v5, %v3362_v5 }
 0xa94   : > { %3600 = vst.msk [vmem:[#allocation2 + $0x5] sm:$0x1] %vm228_vm0, %v7308_v3  ;;  %v3366_v10 = vpack.c.bf16 %v3365_v7, %v3365_v7 }
 0xa95   : > { %6728 = vmatmul.mubr.msk.bf16.vlgmr.msra.gmra.mrb[44].mxu1 %vm577_vm2, %v3363_v8 }
 0xa96   : > { %6736 = vmatpush3.bf16.msra.mxu0 %v7183_v6  ;;  %6751 = vmatprep.mubr.msk.bf16.mxu1 %vm7309_vm8, %v7308_v3 }
 0xa97   : > { %6737 = vmatprep.subr.bf16.mxu0 %v7308_v3  ;;  %6744 = vmatpush3.bf16.msra.mxu1 %v7185_v11  ;;  %v7211_v11 = vld [vmem:[%s8495_s1 + $0x4e0] sm:$0xff]  }
 0xa98   : > { %6745 = vmatprep.subr.bf16.mxu1 %v7308_v3 }
 0xa9a   : > { %6738 = vmatpush3.bf16.msra.mxu0 %v7184_v9  ;;  %v7209_v9 = vld [vmem:[%s8495_s1 + $0x4f0] sm:$0xff]  }
 0xa9b   : > { %6779 = vmatprep.subr.bf16.mxu0 %v7308_v3  ;;  %6746 = vmatpush3.bf16.msra.mxu1 %v7187_v13 }
 0xa9c   : > { %6747 = vmatprep.subr.bf16.mxu1 %v7308_v3 }
 0xa9d   : > { %6740 = vmatmul.mubr.msk.bf16.vlgmr.msra.gmra.mrb[56].mxu0 %vm577_vm2, %v3366_v10  ;;  %v7210_v10 = vld [vmem:[%s8495_s1 + $0x4f8] sm:$0xff]  }
 0xa9e   : > { %6787 = vmatprep.mubr.msk.bf16.mxu0 %vm7309_vm8, %v7308_v3  ;;  %6780 = vmatpush3.bf16.msra.mxu0 %v7186_v12  ;;  %v7213_v12 = vld [vmem:[%s8495_s1 + $0x4e8] sm:$0xff]  }
 0xa9f   : > { %6781 = vmatprep.subr.bf16.mxu0 %v7308_v3  ;;  %6748 = vmatpush3.bf16.msra.mxu1 %v7189_v15 }
 0xaa0   : > { %6749 = vmatprep.subr.bf16.mxu1 %v7308_v3 }
 0xaa2   : > { %6782 = vmatpush3.bf16.msra.mxu0 %v7188_v14 }
 0xaa3   : > { %6783 = vmatprep.subr.bf16.mxu0 %v7308_v3  ;;  %6750 = vmatpush3.bf16.msra.mxu1 %v7191_v17 }
 0xaa4   : > { %6755 = vmatprep.subr.bf16.mxu1 %v7308_v3 }
 0xaa6   : > { %6784 = vmatpush3.bf16.msra.mxu0 %v7190_v16 }
 0xaa7   : > { %6785 = vmatprep.subr.bf16.mxu0 %v7308_v3 }
 0xaaa   : > { %6786 = vmatpush3.bf16.msra.mxu0 %v7192_v18  ;;  %v7212_v18 = vld [vmem:[%s8495_s1 + $0x500] sm:$0xff]  }
 0xaab   : > { %6791 = vmatprep.subr.bf16.mxu0 %v7308_v3 }
 0xb60   : > { %v3444_v19 = vpop.f32.mrb[52].mxu0 }
 0xb61   : > { %v6717_v20 = vpop.f32.mrb[53].mxu0 }
 0xb62   : > { %v3447_v21 = vpop.f32.mrb[54].mxu0  ;;  %v7214_v20 = vld [vmem:[%s8495_s1 + $0x508] sm:$0xff]  }
 0xb63   : > { %v6718_v22 = vpop.f32.mrb[55].mxu0 }
 0xb68   : > { %v3511_v23 = vpop.f32.mrb[44].mxu1 }
 0xb69   : > { %v3512_v24 = vadd.f32 %v3511_v23, %v3444_v19  ;;  %v6729_v25 = vpop.f32.mrb[45].mxu1 }
 0xb6a   : > { %v3514_v27 = vpop.f32.mrb[46].mxu1  ;;  %v7215_v25 = vld [vmem:[%s8495_s1 + $0x520] sm:$0xff]  }
 0xb6b   : > { %v6730_v28 = vpop.f32.mrb[47].mxu1  ;;  %v7216_v27 = vld [vmem:[%s8495_s1 + $0x528] sm:$0xff]  }
 0xb6c   : > { %v7217_v28 = vld [vmem:[%s8495_s1 + $0x510] sm:$0xff]  }
 0xb70   : > { %v3586_v30 = vpop.f32.mrb[56].mxu0 }
 0xb71   : > { %v3592_v32 = vadd.f32 %v3586_v30, %v3512_v24  ;;  %v6741_v33 = vpop.f32.mrb[57].mxu0  ;;  %v7219_v30 = vld [vmem:[%s8495_s1 + $0x518] sm:$0xff]  }
 0xb72   : > { %v3589_v34 = vpop.f32.mrb[58].mxu0 }
 0xb73   : > { %v3598_v35 = vadd.f32 %v5860_v31, %v3592_v32  ;;  %v6742_v36 = vpop.f32.mrb[59].mxu0 }
 0xb75   : > { %v3599_v37 = vmax.f32 %v3598_v35, 0.0 }
 0xb77   : > { %v3604_v40 = vpack.c.bf16 %v3599_v37, %v3599_v37  ;;  %3601 = vst.msk [vmem:[#allocation2 + $0x1] sm:$0xf] %vm3360_vm12, %v3599_v37 }
 0xb79   : > { %6752 = vmatmul.mubr.msk.bf16.vlgmr.msra.gmra.mrb[48].mxu1 %vm577_vm2, %v3604_v40  ;;  %6788 = vmatmul.mubr.msk.bf16.vlgmr.msra.gmra.mrb[60].mxu0 %vm577_vm2, %v3604_v40  ;;  %v5905_v40 = vld [vmem:[%s8496_s2 + $0xa] ss:$0 sm:$0xff] }
 0xb7a   : > { %6756 = vmatpush3.bf16.msra.mxu1 %v7193_v38  ;;  %6792 = vmatpush3.bf16.msra.mxu0 %v7194_v39 }
 0xb7b   : > { %6757 = vmatprep.subr.bf16.mxu1 %v7308_v3  ;;  %6793 = vmatprep.subr.bf16.mxu0 %v7308_v3 }
 0xb7c   : > { %6763 = vmatprep.mubr.msk.bf16.mxu1 %vm7309_vm8, %v7308_v3  ;;  %6799 = vmatprep.mubr.msk.bf16.mxu0 %vm7309_vm8, %v7308_v3 }
 0xb7e   : > { %6758 = vmatpush3.bf16.msra.mxu1 %v7195_v41  ;;  %6794 = vmatpush3.bf16.msra.mxu0 %v7196_v42  ;;  %v3602_v45 = vld [vmem:[#allocation2] sm:$0xf] }
 0xb7f   : > { %v3605_v46 = vld [vmem:[#allocation2 + $0x2] sm:$0xf]  ;;  %6759 = vmatprep.subr.bf16.mxu1 %v7308_v3  ;;  %6795 = vmatprep.subr.bf16.mxu0 %v7308_v3  ;;  %v3603_v51 = vpack.c.bf16 %v3602_v45, %v3602_v45 }
 0xb80   : > { %4208 = vst.msk [vmem:[#allocation2 + $0x3] sm:$0x1] %vm228_vm0, %v7308_v3  ;;  %v3606_v58 = vpack.c.bf16 %v3605_v46, %v3605_v46 }
 0xb82   : > { %6760 = vmatpush3.bf16.msra.mxu1 %v7197_v43  ;;  %6796 = vmatpush3.bf16.msra.mxu0 %v7198_v44 }
 0xb83   : > { %6761 = vmatprep.subr.bf16.mxu1 %v7308_v3  ;;  %6797 = vmatprep.subr.bf16.mxu0 %v7308_v3 }
 0xb86   : > { %6762 = vmatpush3.bf16.msra.mxu1 %v7199_v47  ;;  %6798 = vmatpush3.bf16.msra.mxu0 %v7200_v48  ;;  %v7218_v48 = vld [vmem:[%s8495_s1 + $0x530] sm:$0xff]  }
 0xb87   : > { %6767 = vmatprep.subr.bf16.mxu1 %v7308_v3  ;;  %6803 = vmatprep.subr.bf16.mxu0 %v7308_v3 }
 0xb89   : > { %6764 = vmatmul.mubr.msk.bf16.vlgmr.msra.gmra.mrb[48].mxu1 %vm577_vm2, %v3603_v51  ;;  %6800 = vmatmul.mubr.msk.bf16.vlgmr.msra.gmra.mrb[60].mxu0 %vm577_vm2, %v3603_v51 }
 0xb8a   : > { %6768 = vmatpush3.bf16.msra.mxu1 %v7201_v49  ;;  %6804 = vmatpush3.bf16.msra.mxu0 %v7202_v50  ;;  %v7220_v50 = vld [vmem:[%s8495_s1 + $0x538] sm:$0xff]  }
 0xb8b   : > { %6769 = vmatprep.subr.bf16.mxu1 %v7308_v3  ;;  %6805 = vmatprep.subr.bf16.mxu0 %v7308_v3 }
 0xb8c   : > { %6775 = vmatprep.mubr.msk.bf16.mxu1 %vm7309_vm8, %v7308_v3  ;;  %6811 = vmatprep.mubr.msk.bf16.mxu0 %vm7309_vm8, %v7308_v3 }
 0xb8e   : > { %6770 = vmatpush3.bf16.msra.mxu1 %v7203_v52  ;;  %6806 = vmatpush3.bf16.msra.mxu0 %v7204_v53 }
 0xb8f   : > { %6771 = vmatprep.subr.bf16.mxu1 %v7308_v3  ;;  %6807 = vmatprep.subr.bf16.mxu0 %v7308_v3 }
 0xb92   : > { %6772 = vmatpush3.bf16.msra.mxu1 %v7205_v54  ;;  %6808 = vmatpush3.bf16.msra.mxu0 %v7206_v55  ;;  %v7221_v55 = vld [vmem:[%s8495_s1 + $0x550] sm:$0xff]  }
 0xb93   : > { %6773 = vmatprep.subr.bf16.mxu1 %v7308_v3  ;;  %6809 = vmatprep.subr.bf16.mxu0 %v7308_v3 }
 0xb96   : > { %6774 = vmatpush3.bf16.msra.mxu1 %v7207_v56  ;;  %6810 = vmatpush3.bf16.msra.mxu0 %v7208_v57  ;;  %v7222_v56 = vld [vmem:[%s8495_s1 + $0x580] sm:$0xff]   ;;  %v7223_v57 = vld [vmem:[%s8495_s1 + $0x558] sm:$0xff]  }
 0xb97   : > { %6815 = vmatprep.subr.mxu1 %v7308_v3  ;;  %6825 = vmatprep.subr.bf16.mxu0 %v7308_v3 }
 0xb99   : > { %6776 = vmatmul.mubr.msk.bf16.vlgmr.msra.gmra.mrb[48].mxu1 %vm577_vm2, %v3606_v58  ;;  %6812 = vmatmul.mubr.msk.bf16.vlgmr.msra.gmra.mrb[60].mxu0 %vm577_vm2, %v3606_v58  ;;  %v7224_v58 = vld [vmem:[%s8495_s1 + $0x588] sm:$0xff]  }
 0xb9a   : > { %6817 = vmatprep.mubr.msk.f32.mxu1 %vm7309_vm8, %v7308_v3  ;;  %6829 = vmatprep.mubr.msk.bf16.mxu0 %vm7309_vm8, %v7308_v3 }
 0xb9b   : > { %6826 = vmatpush3.bf16.msra.mxu0 %v7209_v9 }
 0xb9c   : > { %6827 = vmatprep.subr.bf16.mxu0 %v7308_v3 }
 0xb9f   : > { %6828 = vmatpush3.bf16.msra.mxu0 %v7210_v10 }
 0xba0   : > { %6841 = vmatprep.subr.bf16.mxu0 %v7308_v3 }
 0xc6c   : > { %v3826_v59 = vpop.f32.mrb[48].mxu1  ;;  %v4043_v60 = vpop.f32.mrb[60].mxu0 }
 0xc6d   : > { %v4050_v62 = vmax.f32 %v3826_v59, %v4043_v60  ;;  %v6777_v63 = vpop.f32.mrb[49].mxu1  ;;  %v6813_v0 = vpop.f32.mrb[61].mxu0 }
 0xc6e   : > { %v3829_v2 = vpop.f32.mrb[50].mxu1  ;;  %v4046_v4 = vpop.f32.mrb[62].mxu0 }
 0xc6f   : > { %v4056_v5 = vadd.f32 %v5891_v61, %v4050_v62  ;;  %v6778_v6 = vpop.f32.mrb[51].mxu1  ;;  %v6814_v7 = vpop.f32.mrb[63].mxu0 }
 0xc70   : > { %v5915_v6 = vld [vmem:[%s8496_s2 + $0xb] ss:$0 sm:$0xff] }
 0xc71   : > { %v4057_v8 = vmax.f32 %v4056_v5, 0.0 }
 0xc73   : > { %6816 = vmatpush3.msk.msra.mxu1 %vm4061_vm13, %v4057_v8 }
 0xc74   : > { %6818 = vmatmul.mubr.msk.f32.vlgmr.msra.gmra.mrb[18].mxu1 %vm4058_vm14, %v7524_v29  ;;  %6820 = vmatprep.subr.mxu1 %v7308_v3 }
 0xc75   : > { %6821 = vmatpush3.msk.msra.mxu1 %vm4061_vm13, %v4057_v8  ;;  %6822 = vmatprep.mubr.msk.f32.mxu1 %vm7309_vm8, %v7308_v3 }
 0xc76   : > { %6833 = vmatprep.subr.bf16.mxu1 %v7308_v3 }
 0xc78   : > { %6823 = vmatmul.mubr.msk.f32.vlgmr.msra.gmra.mrb[52].mxu1 %vm4058_vm14, %v7535_v1 }
 0xc79   : > { %6837 = vmatprep.mubr.msk.bf16.mxu1 %vm7309_vm8, %v7308_v3  ;;  %6834 = vmatpush3.bf16.msra.mxu1 %v7211_v11 }
 0xc7a   : > { %6835 = vmatprep.subr.bf16.mxu1 %v7308_v3 }
 0xc7d   : > { %6836 = vmatpush3.bf16.msra.mxu1 %v7213_v12 }
 0xc7e   : > { %6849 = vmatprep.subr.bf16.mxu1 %v7308_v3 }
 0xd47   : > { %v4131_v13 = vpop.f32.mrb[18].mxu1 }
 0xd48   : > { %v6819_v14 = vpop.f32.mrb[19].mxu1 }
 0xd49   : > { %v7225_v14 = vld [vmem:[%s8495_s1 + $0x540] sm:$0xff]  }
 0xd4b   : > { %v4203_v15 = vpop.f32.mrb[52].mxu1 }
 0xd4c   : > { %v4207_v16 = vmax.f32 %v4131_v13, %v4203_v15  ;;  %v6824_v17 = vpop.f32.mrb[53].mxu1  ;;  %v7226_v15 = vld [vmem:[%s8495_s1 + $0x570] sm:$0xff]  }
 0xd4d   : > { %v7227_v17 = vld [vmem:[%s8495_s1 + $0x548] sm:$0xff]  }
 0xd4e   : > { %v4213_v19 = vpack.c.bf16 %v4207_v16, %v4207_v16  ;;  %4210 = vst.msk [vmem:[#allocation2 + $0x1] sm:$0x3] %vm4209_vm15, %v4207_v16 }
 0xd50   : > { %6830 = vmatmul.mubr.msk.bf16.vlgmr.msra.gmra.mrb[64].mxu0 %vm1146_vm4, %v4213_v19 }
 0xd51   : > { %6842 = vmatpush3.bf16.msra.mxu0 %v7212_v18  ;;  %6845 = vmatprep.mubr.msk.bf16.mxu0 %vm7309_vm8, %v7308_v3  ;;  %v7228_v18 = vld [vmem:[%s8495_s1 + $0x578] sm:$0xff]  }
 0xd52   : > { %6843 = vmatprep.subr.bf16.mxu0 %v7308_v3 }
 0xd55   : > { %6844 = vmatpush3.bf16.msra.mxu0 %v7214_v20  ;;  %v4211_v21 = vld [vmem:[#allocation2] sm:$0x3]  ;;  %v4214_v22 = vld [vmem:[#allocation2 + $0x2] sm:$0x3] }
 0xd56   : > { %v4212_v23 = vpack.c.bf16 %v4211_v21, %v4211_v21  ;;  %v4215_v24 = vpack.c.bf16 %v4214_v22, %v4214_v22  ;;  %4401 = vst.msk [vmem:[#allocation2 + $0x3] sm:$0x1] %vm228_vm0, %v7308_v3  ;;  %6857 = vmatprep.subr.bf16.mxu0 %v7308_v3  ;;  %v7229_v20 = vld [vmem:[%s8495_s1 + $0x560] sm:$0xff]   ;;  %v7230_v21 = vld [vmem:[%s8495_s1 + $0x590] sm:$0xff]  }
 0xd58   : > { %6838 = vmatmul.mubr.msk.bf16.vlgmr.msra.gmra.mrb[56].mxu1 %vm1146_vm4, %v4212_v23  ;;  %6846 = vmatmul.mubr.msk.bf16.vlgmr.msra.gmra.mrb[68].mxu0 %vm1146_vm4, %v4215_v24  ;;  %v7231_v23 = vld [vmem:[%s8495_s1 + $0x568] sm:$0xff]   ;;  %v7232_v24 = vld [vmem:[%s8495_s1 + $0x598] sm:$0xff]  }
 0xd59   : > { %6853 = vmatprep.mubr.msk.bf16.mxu1 %vm7309_vm8, %v7308_v3  ;;  %6861 = vmatprep.mubr.msk.bf16.mxu0 %vm7309_vm8, %v7308_v3 }
 0xd5a   : > { %6850 = vmatpush3.bf16.msra.mxu1 %v7215_v25  ;;  %6858 = vmatpush3.bf16.msra.mxu0 %v7217_v28 }
 0xd5b   : > { %6851 = vmatprep.subr.bf16.mxu1 %v7308_v3  ;;  %6859 = vmatprep.subr.bf16.mxu0 %v7308_v3 }
 0xd5e   : > { %6852 = vmatpush3.bf16.msra.mxu1 %v7216_v27  ;;  %6860 = vmatpush3.bf16.msra.mxu0 %v7219_v30 }
 0xd5f   : > { %6865 = vmatprep.subr.bf16.mxu1 %v7308_v3  ;;  %6873 = vmatprep.subr.bf16.mxu0 %v7308_v3 }
 0xe23   : > { %v4273_v31 = vpop.f32.mrb[64].mxu0 }
 0xe24   : > { %v6831_v32 = vpop.f32.mrb[65].mxu0 }
 0xe25   : > { %v4276_v33 = vpop.f32.mrb[66].mxu0 }
 0xe26   : > { %v6832_v34 = vpop.f32.mrb[67].mxu0 }
 0xe2b   : > { %v4328_v35 = vpop.f32.mrb[56].mxu1  ;;  %v4387_v36 = vpop.f32.mrb[68].mxu0 }
 0xe2c   : > { %v4329_v37 = vadd.f32 %v4328_v35, %v4273_v31  ;;  %v6839_v38 = vpop.f32.mrb[57].mxu1  ;;  %v6847_v39 = vpop.f32.mrb[69].mxu0  ;;  %v5934_v31 = vld [vmem:[%s8496_s2 + $0xc] ss:$0 sm:$0xff] }
 0xe2d   : > { %v4331_v41 = vpop.f32.mrb[58].mxu1  ;;  %v4390_v42 = vpop.f32.mrb[70].mxu0 }
 0xe2e   : > { %v4393_v43 = vadd.f32 %v4387_v36, %v4329_v37  ;;  %v6840_v44 = vpop.f32.mrb[59].mxu1  ;;  %v6848_v45 = vpop.f32.mrb[71].mxu0  ;;  %v7233_v41 = vld [vmem:[%s8497_s3] ss:$8 sps:$4 sm:$0xff]   ;;  %v7311_v42 = vmov 0  }
 0xe2f   : > { %v7239_v44 = vld [vmem:[%s8497_s3 + $0x20] ss:$8 sps:$4 sm:$0xff]   ;;  %v7244_v45 = vld [vmem:[%s8497_s3 + $0x34] ss:$8 sps:$4 sm:$0xff]  }
 0xe30   : > { %v4399_v46 = vadd.f32 %v5905_v40, %v4393_v43  ;;  %v7236_v43 = vld [vmem:[%s8497_s3 + $0x10] ss:$8 sps:$4 sm:$0xff]  }
 0xe32   : > { %v4400_v47 = vmax.f32 %v4399_v46, 0.0  ;;  %v7242_v46 = vld [vmem:[%s8497_s3 + $0x30] ss:$8 sps:$4 sm:$0xff]  }
 0xe34   : > { %v4405_v49 = vpack.c.bf16 %v4400_v47, %v4400_v47  ;;  %4402 = vst.msk [vmem:[#allocation2 + $0x1] sm:$0x3] %vm4209_vm15, %v4400_v47  ;;  %v7247_v47 = vld [vmem:[%s8497_s3 + $0x44] ss:$8 sps:$4 sm:$0xff]  }
 0xe36   : > { %6854 = vmatmul.mubr.msk.bf16.vlgmr.msra.gmra.mrb[60].mxu1 %vm1146_vm4, %v4405_v49  ;;  %v7250_v49 = vld [vmem:[%s8497_s3 + $0x54] ss:$8 sps:$4 sm:$0xff]  }
 0xe37   : > { %6866 = vmatpush3.bf16.msra.mxu1 %v7218_v48  ;;  %6869 = vmatprep.mubr.msk.bf16.mxu1 %vm7309_vm8, %v7308_v3  ;;  %v7245_v48 = vld [vmem:[%s8497_s3 + $0x40] ss:$8 sps:$4 sm:$0xff]  }
 0xe38   : > { %6867 = vmatprep.subr.bf16.mxu1 %v7308_v3 }
 0xe3b   : > { %6868 = vmatpush3.bf16.msra.mxu1 %v7220_v50  ;;  %v4403_v51 = vld [vmem:[#allocation2] sm:$0x3]  ;;  %v4406_v52 = vld [vmem:[#allocation2 + $0x2] sm:$0x3]  ;;  %v7248_v50 = vld [vmem:[%s8497_s3 + $0x50] ss:$8 sps:$4 sm:$0xff]  }
 0xe3c   : > { %v4404_v53 = vpack.c.bf16 %v4403_v51, %v4403_v51  ;;  %v4407_v54 = vpack.c.bf16 %v4406_v52, %v4406_v52  ;;  %4593 = vst.msk [vmem:[#allocation2 + $0x3] sm:$0x1] %vm228_vm0, %v7308_v3  ;;  %6897 = vmatprep.subr.bf16.mxu1 %v7308_v3  ;;  %vm4958_vm0 = vcmask 1041408   ;;  %v7253_v51 = vld [vmem:[%s8497_s3 + $0x64] ss:$8 sps:$4 sm:$0xff]  }
 0xe3d   : > { %v7251_v52 = vld [vmem:[%s8497_s3 + $0x60] ss:$8 sps:$4 sm:$0xff]  }
 0xe3e   : > { %6862 = vmatmul.mubr.msk.bf16.vlgmr.msra.gmra.mrb[72].mxu0 %vm1146_vm4, %v4404_v53  ;;  %6870 = vmatmul.mubr.msk.bf16.vlgmr.msra.gmra.mrb[64].mxu1 %vm1146_vm4, %v4407_v54  ;;  %v7256_v53 = vld [vmem:[%s8497_s3 + $0x74] ss:$8 sps:$4 sm:$0xff]   ;;  %v7254_v54 = vld [vmem:[%s8497_s3 + $0x70] ss:$8 sps:$4 sm:$0xff]  }
 0xe3f   : > { %6877 = vmatprep.mubr.msk.bf16.mxu0 %vm7309_vm8, %v7308_v3  ;;  %6901 = vmatprep.mubr.msk.bf16.mxu1 %vm7309_vm8, %v7308_v3 }
 0xe40   : > { %6874 = vmatpush3.bf16.msra.mxu0 %v7221_v55  ;;  %6898 = vmatpush3.bf16.msra.mxu1 %v7222_v56  ;;  %v7259_v55 = vld [vmem:[%s8497_s3 + $0x84] ss:$8 sps:$4 sm:$0xff]   ;;  %v7257_v56 = vld [vmem:[%s8497_s3 + $0x80] ss:$8 sps:$4 sm:$0xff]  }
 0xe41   : > { %6875 = vmatprep.subr.bf16.mxu0 %v7308_v3  ;;  %6899 = vmatprep.subr.bf16.mxu1 %v7308_v3 }
 0xe44   : > { %6876 = vmatpush3.bf16.msra.mxu0 %v7223_v57  ;;  %6900 = vmatpush3.bf16.msra.mxu1 %v7224_v58  ;;  %v7262_v57 = vld [vmem:[%s8497_s3 + $0x94] ss:$8 sps:$4 sm:$0xff]   ;;  %v7260_v58 = vld [vmem:[%s8497_s3 + $0x90] ss:$8 sps:$4 sm:$0xff]  }
 0xe45   : > { %6881 = vmatprep.subr.bf16.mxu0 %v7308_v3  ;;  %6905 = vmatprep.subr.bf16.mxu1 %v7308_v3 }
 0xf09   : > { %v4465_v59 = vpop.f32.mrb[60].mxu1 }
 0xf0a   : > { %v6855_v60 = vpop.f32.mrb[61].mxu1 }
 0xf0b   : > { %v4468_v61 = vpop.f32.mrb[62].mxu1  ;;  %v7263_v60 = vld [vmem:[%s8497_s3 + $0xa0] ss:$8 sps:$4 sm:$0xff]  }
 0xf0c   : > { %v6856_v62 = vpop.f32.mrb[63].mxu1  ;;  %v7268_v61 = vld [vmem:[%s8497_s3 + $0xb4] ss:$8 sps:$4 sm:$0xff]  }
 0xf0d   : > { %v7266_v62 = vld [vmem:[%s8497_s3 + $0xb0] ss:$8 sps:$4 sm:$0xff]  }
 0xf11   : > { %v4520_v63 = vpop.f32.mrb[72].mxu0  ;;  %v4579_v0 = vpop.f32.mrb[64].mxu1 }
 0xf12   : > { %v4521_v2 = vadd.f32 %v4520_v63, %v4465_v59  ;;  %v6863_v4 = vpop.f32.mrb[73].mxu0  ;;  %v6871_v5 = vpop.f32.mrb[65].mxu1  ;;  %v7265_v59 = vld [vmem:[%s8497_s3 + $0xa4] ss:$8 sps:$4 sm:$0xff]  }
 0xf13   : > { %v4523_v7 = vpop.f32.mrb[74].mxu0  ;;  %v4582_v8 = vpop.f32.mrb[66].mxu1  ;;  %v7271_v63 = vld [vmem:[%s8497_s3 + $0xc4] ss:$8 sps:$4 sm:$0xff]   ;;  %v7272_v4 = vld [vmem:[%s8497_s3 + $0xd0] ss:$8 sps:$4 sm:$0xff]  }
 0xf14   : > { %v4585_v9 = vadd.f32 %v4579_v0, %v4521_v2  ;;  %v6864_v10 = vpop.f32.mrb[75].mxu0  ;;  %v6872_v11 = vpop.f32.mrb[67].mxu1  ;;  %v7269_v0 = vld [vmem:[%s8497_s3 + $0xc0] ss:$8 sps:$4 sm:$0xff]   ;;  %v7274_v2 = vld [vmem:[%s8497_s3 + $0xd4] ss:$8 sps:$4 sm:$0xff]  }
 0xf15   : > { %v7277_v5 = vld [vmem:[%s8497_s3 + $0xe4] ss:$8 sps:$4 sm:$0xff]  }
 0xf16   : > { %v4591_v12 = vadd.f32 %v5915_v6, %v4585_v9  ;;  %v7275_v6 = vld [vmem:[%s8497_s3 + $0xe0] ss:$8 sps:$4 sm:$0xff]  }
 0xf18   : > { %v4592_v13 = vmax.f32 %v4591_v12, 0.0 }
 0xf1a   : > { %v4597_v16 = vpack.c.bf16 %v4592_v13, %v4592_v13  ;;  %4594 = vst.msk [vmem:[#allocation2 + $0x1] sm:$0x3] %vm4209_vm15, %v4592_v13  ;;  %v7280_v13 = vld [vmem:[%s8497_s3 + $0xf4] ss:$8 sps:$4 sm:$0xff]  }
 0xf1c   : > { %6878 = vmatmul.mubr.msk.bf16.vlgmr.msra.gmra.mrb[76].mxu0 %vm1146_vm4, %v4597_v16  ;;  %6902 = vmatmul.mubr.msk.bf16.vlgmr.msra.gmra.mrb[68].mxu1 %vm1146_vm4, %v4597_v16  ;;  %v7281_v16 = vld [vmem:[%s8497_s3 + $0x100] ss:$8 sps:$4 sm:$0xff]  }
 0xf1d   : > { %6882 = vmatpush3.bf16.msra.mxu0 %v7225_v14  ;;  %6906 = vmatpush3.bf16.msra.mxu1 %v7226_v15  ;;  %v7278_v14 = vld [vmem:[%s8497_s3 + $0xf0] ss:$8 sps:$4 sm:$0xff]   ;;  %v7283_v15 = vld [vmem:[%s8497_s3 + $0x104] ss:$8 sps:$4 sm:$0xff]  }
 0xf1e   : > { %6883 = vmatprep.subr.bf16.mxu0 %v7308_v3  ;;  %6907 = vmatprep.subr.bf16.mxu1 %v7308_v3 }
 0xf1f   : > { %6885 = vmatprep.mubr.msk.bf16.mxu0 %vm7309_vm8, %v7308_v3  ;;  %6909 = vmatprep.mubr.msk.bf16.mxu1 %vm7309_vm8, %v7308_v3 }
 0xf21   : > { %6884 = vmatpush3.bf16.msra.mxu0 %v7227_v17  ;;  %6908 = vmatpush3.bf16.msra.mxu1 %v7228_v18  ;;  %v4595_v19 = vld [vmem:[#allocation2] sm:$0x3]  ;;  %v4598_v25 = vld [vmem:[#allocation2 + $0x2] sm:$0x3]  ;;  %v7284_v17 = vld [vmem:[%s8497_s3 + $0x190] ss:$8 sps:$4 sm:$0xff]  }
 0xf22   : > { %6889 = vmatprep.subr.bf16.mxu0 %v7308_v3  ;;  %6913 = vmatprep.subr.bf16.mxu1 %v7308_v3  ;;  %v4596_v22 = vpack.c.bf16 %v4595_v19, %v4595_v19  ;;  %v4599_v27 = vpack.c.bf16 %v4598_v25, %v4598_v25  ;;  %v7285_v18 = vld [vmem:[%s8497_s3 + $0x110] ss:$8 sps:$4 sm:$0xff]   ;;  %v7286_v19 = vld [vmem:[%s8497_s3 + $0x1a0] ss:$8 sps:$4 sm:$0xff]  }
 0xf23   : > { %v7292_v25 = vld [vmem:[%s8497_s3 + $0x1d0] ss:$8 sps:$4 sm:$0xff]  }
 0xf28   : > { %6886 = vmatmul.mubr.msk.bf16.vlgmr.msra.gmra.mrb[76].mxu0 %vm1146_vm4, %v4596_v22  ;;  %6910 = vmatmul.mubr.msk.bf16.vlgmr.msra.gmra.mrb[68].mxu1 %vm1146_vm4, %v4596_v22  ;;  %v7289_v22 = vld [vmem:[%s8497_s3 + $0x130] ss:$8 sps:$4 sm:$0xff]  }
 0xf29   : > { %6890 = vmatpush3.bf16.msra.mxu0 %v7229_v20  ;;  %6914 = vmatpush3.bf16.msra.mxu1 %v7230_v21  ;;  %v7287_v20 = vld [vmem:[%s8497_s3 + $0x120] ss:$8 sps:$4 sm:$0xff]   ;;  %v7288_v21 = vld [vmem:[%s8497_s3 + $0x1b0] ss:$8 sps:$4 sm:$0xff]  }
 0xf2a   : > { %6891 = vmatprep.subr.bf16.mxu0 %v7308_v3  ;;  %6915 = vmatprep.subr.bf16.mxu1 %v7308_v3 }
 0xf2b   : > { %6893 = vmatprep.mubr.msk.bf16.mxu0 %vm7309_vm8, %v7308_v3  ;;  %6917 = vmatprep.mubr.msk.bf16.mxu1 %vm7309_vm8, %v7308_v3 }
 0xf2d   : > { %6892 = vmatpush3.bf16.msra.mxu0 %v7231_v23  ;;  %6916 = vmatpush3.bf16.msra.mxu1 %v7232_v24  ;;  %v7290_v23 = vld [vmem:[%s8497_s3 + $0x1c0] ss:$8 sps:$4 sm:$0xff]  }
 0xf2e   : > { %6921 = vmatprep.subr.mxu0 %v7308_v3  ;;  %6926 = vmatprep.subr.mxu1 %v7308_v3  ;;  %v7291_v24 = vld [vmem:[%s8497_s3 + $0x140] ss:$8 sps:$4 sm:$0xff]  }
 0xf34   : > { %6894 = vmatmul.mubr.msk.bf16.vlgmr.msra.gmra.mrb[76].mxu0 %vm1146_vm4, %v4599_v27  ;;  %6918 = vmatmul.mubr.msk.bf16.vlgmr.msra.gmra.mrb[68].mxu1 %vm1146_vm4, %v4599_v27  ;;  %v7293_v27 = vld [vmem:[%s8497_s3 + $0x150] ss:$8 sps:$4 sm:$0xff]  }
 0xf35   : > { %6923 = vmatprep.mubr.msk.f32.mxu0 %vm7309_vm8, %v7308_v3  ;;  %6928 = vmatprep.mubr.msk.f32.mxu1 %vm7309_vm8, %v7308_v3  ;;  %v7235_v3 = vld [vmem:[%s8497_s3 + $0x4] ss:$8 sps:$4 sm:$0xff]  }
0x1007   : > { %v4771_v28 = vpop.f32.mrb[76].mxu0  ;;  %v4940_v30 = vpop.f32.mrb[68].mxu1 }
0x1008   : > { %v4947_v32 = vmax.f32 %v4771_v28, %v4940_v30  ;;  %v6895_v33 = vpop.f32.mrb[77].mxu0  ;;  %v6919_v34 = vpop.f32.mrb[69].mxu1  ;;  %v7294_v28 = vld [vmem:[%s8497_s3 + $0x1e0] ss:$8 sps:$4 sm:$0xff]  }
0x1009   : > { %v4774_v35 = vpop.f32.mrb[78].mxu0  ;;  %v4943_v36 = vpop.f32.mrb[70].mxu1  ;;  %v7295_v30 = vld [vmem:[%s8497_s3 + $0x160] ss:$8 sps:$4 sm:$0xff]   ;;  %v5126_v33 = vsub.s32 1, %v7520_v26 }
0x100a   : > { %v4953_v37 = vadd.f32 %v5934_v31, %v4947_v32  ;;  %v6896_v38 = vpop.f32.mrb[79].mxu0  ;;  %v6920_v39 = vpop.f32.mrb[71].mxu1  ;;  %v5122_v31 = vsub.s32 0, %v7520_v26  ;;  %v5108_v32 = vld [vmem:[%s8498_s4] ss:$4 sm:$0x3] }
0x100b   : > { %v5127_v35 = vrot.slane %v5108_v32, %v5126_v33  ;;  %v7297_v26 = vld [vmem:[%s8497_s3 + $0x170] ss:$8 sps:$4 sm:$0xff]  }
0x100c   : > { %v4954_v40 = vmax.f32 %v4953_v37, 0.0  ;;  %v5123_v34 = vrot.slane %v5108_v32, %v5122_v31 }
0x100e   : > { %6922 = vmatpush3.msk.msra.mxu0 %vm4958_vm0, %v4954_v40  ;;  %6927 = vmatpush3.msk.msra.mxu1 %vm4958_vm0, %v4954_v40 }
0x100f   : > { %6924 = vmatmul.mubr.msk.f32.vlgmr.msra.gmra.mrb[46].mxu0 %vm4955_vm1, %v7524_v29  ;;  %6929 = vmatmul.mubr.msk.f32.vlgmr.msra.gmra.mrb[54].mxu1 %vm4955_vm1, %v7535_v1  ;;  %v7238_v29 = vld [vmem:[%s8497_s3 + $0x14] ss:$8 sps:$4 sm:$0xff]   ;;  %v7241_v1 = vld [vmem:[%s8497_s3 + $0x24] ss:$8 sps:$4 sm:$0xff]  }
0x1010   : > { %5133 = vmatprep.subr.bf16.mxu0 %v7235_v3  ;;  %5165 = vmatprep.mubr.bf16.mxu0 %v7311_v42 }
0x1011   : > { %5134 = vmatpush1.bf16.msra.mxu0 %v7233_v41  ;;  %5383 = vmatprep.subr.bf16.mxu1 %v7238_v29 }
0x1012   : > { %5384 = vmatpush1.bf16.msra.mxu1 %v7236_v43  ;;  %6267 = vmatprep.subr.bf16.mxu0 %v7284_v17 }
0x1013   : > { %5385 = vmatprep.subr.bf16.mxu1 %v7241_v1  ;;  %v7296_v1 = vld [vmem:[%s8497_s3 + $0x1f0] ss:$8 sps:$4 sm:$0xff]  }
0x1016   : > { %5386 = vmatpush1.bf16.msra.mxu1 %v7239_v44  ;;  %v7298_v44 = vld [vmem:[%s8497_s3 + $0x200] ss:$8 sps:$4 sm:$0xff]  }
0x1017   : > { %5387 = vmatprep.subr.bf16.mxu1 %v7244_v45  ;;  %v7299_v45 = vld [vmem:[%s8497_s3 + $0x180] ss:$8 sps:$4 sm:$0xff]  }
0x101a   : > { %5388 = vmatpush1.bf16.msra.mxu1 %v7242_v46  ;;  %v5942_v46 = vld [vmem:[%s8498_s4 + $0x1] ss:$4 sm:$0x3] }
0x101b   : > { %5389 = vmatprep.subr.bf16.mxu1 %v7247_v47  ;;  %v5376_v47 = vrot.slane %v5942_v46, %v5122_v31 }
0x101e   : > { %5390 = vmatpush1.bf16.msra.mxu1 %v7245_v48  ;;  %v5380_v48 = vrot.slane %v5942_v46, %v5126_v33 }
0x101f   : > { %5391 = vmatprep.subr.bf16.mxu1 %v7250_v49 }
0x1022   : > { %5392 = vmatpush1.bf16.msra.mxu1 %v7248_v50 }
0x1023   : > { %5393 = vmatprep.subr.bf16.mxu1 %v7253_v51 }
0x1026   : > { %5394 = vmatpush1.bf16.msra.mxu1 %v7251_v52 }
0x1027   : > { %5395 = vmatprep.subr.bf16.mxu1 %v7256_v53 }
0x102a   : > { %5396 = vmatpush1.bf16.msra.mxu1 %v7254_v54 }
0x102b   : > { %5397 = vmatprep.subr.bf16.mxu1 %v7259_v55 }
0x102e   : > { %5398 = vmatpush1.bf16.msra.mxu1 %v7257_v56 }
0x102f   : > { %5399 = vmatprep.subr.bf16.mxu1 %v7262_v57 }
0x1032   : > { %5400 = vmatpush1.bf16.msra.mxu1 %v7260_v58 }
0x1033   : > { %5401 = vmatprep.subr.bf16.mxu1 %v7265_v59 }
0x1036   : > { %5402 = vmatpush1.bf16.msra.mxu1 %v7263_v60  ;;  %v5460_v60 = vld [vmem:[%s8498_s4 + $0x2] sm:$0x1] }
0x1037   : > { %5403 = vmatprep.subr.bf16.mxu1 %v7268_v61 }
0x103a   : > { %5404 = vmatpush1.bf16.msra.mxu1 %v7266_v62 }
0x103b   : > { %5405 = vmatprep.subr.bf16.mxu1 %v7271_v63 }
0x103e   : > { %5406 = vmatpush1.bf16.msra.mxu1 %v7269_v0 }
0x103f   : > { %5407 = vmatprep.subr.bf16.mxu1 %v7274_v2 }
0x1042   : > { %5408 = vmatpush1.bf16.msra.mxu1 %v7272_v4 }
0x1043   : > { %5409 = vmatprep.subr.bf16.mxu1 %v7277_v5 }
0x1046   : > { %5410 = vmatpush1.bf16.msra.mxu1 %v7275_v6 }
0x1047   : > { %5411 = vmatprep.subr.bf16.mxu1 %v7280_v13 }
0x104a   : > { %5412 = vmatpush1.bf16.msra.mxu1 %v7278_v14 }
0x104b   : > { %5413 = vmatprep.subr.bf16.mxu1 %v7283_v15 }
0x104e   : > { %5414 = vmatpush1.bf16.msra.mxu1 %v7281_v16 }
0x10e2   : > { %v5028_v7 = vpop.f32.mrb[46].mxu0  ;;  %v5100_v8 = vpop.f32.mrb[54].mxu1 }
0x10e3   : > { %v5104_v9 = vmax.f32 %v5028_v7, %v5100_v8  ;;  %v6925_v10 = vpop.f32.mrb[47].mxu0  ;;  %v6930_v11 = vpop.f32.mrb[55].mxu1 }
0x10e5   : > { %v5105_v12 = vpack.c.bf16 %v5104_v9, %v5104_v9 }
0x10e7   : > { %5941 = vmatmul.mubr.msk.bf16.vlgmr.msra.gmra.mrb[80].mxu0 %vm1984_vm9, %v5105_v12 }
0x10e8   : > { %6268 = vmatpush3.bf16.msra.mxu0 %v7285_v18 }
0x10e9   : > { %6269 = vmatprep.subr.bf16.mxu0 %v7286_v19 }
0x10ec   : > { %6270 = vmatpush3.bf16.msra.mxu0 %v7287_v20 }
0x10ed   : > { %6271 = vmatprep.subr.bf16.mxu0 %v7288_v21 }
0x10f0   : > { %6272 = vmatpush3.bf16.msra.mxu0 %v7289_v22 }
0x10f1   : > { %6273 = vmatprep.subr.bf16.mxu0 %v7290_v23 }
0x10f4   : > { %6274 = vmatpush3.bf16.msra.mxu0 %v7291_v24 }
0x10f5   : > { %6275 = vmatprep.subr.bf16.mxu0 %v7292_v25 }
0x10f8   : > { %6276 = vmatpush3.bf16.msra.mxu0 %v7293_v27 }
0x10f9   : > { %6277 = vmatprep.subr.bf16.mxu0 %v7294_v28 }
0x10fc   : > { %6278 = vmatpush3.bf16.msra.mxu0 %v7295_v30 }
0x10fd   : > { %6279 = vmatprep.subr.bf16.mxu0 %v7296_v1 }
0x1100   : > { %6280 = vmatpush3.bf16.msra.mxu0 %v7297_v26 }
0x1101   : > { %6281 = vmatprep.subr.bf16.mxu0 %v7298_v44 }
0x1104   : > { %6282 = vmatpush3.bf16.msra.mxu0 %v7299_v45 }
0x11ba   : > { %v5167_v36 = vpop.f32.mrb[80].mxu0 }
0x11bb   : > { %v5168_v37 = vadd.f32 %v5167_v36, %v5123_v34  ;;  %v5169_v38 = vpop.f32.mrb[81].mxu0 }
0x11bc   : > { %v5170_v39 = vadd.f32 %v5169_v38, %v5127_v35  ;;  %v5171_v40 = vpop.f32.mrb[82].mxu0 }
0x11bd   : > { %v5174_v3 = vmax.f32 %v5168_v37, 0.0  ;;  %v5172_v41 = vpop.f32.mrb[83].mxu0 }
0x11be   : > { %v5175_v42 = vmax.f32 %v5170_v39, 0.0 }
0x11bf   : > { %v5176_v29 = vpack.c.bf16 %v5174_v3, %v5174_v3 }
0x11c0   : > { %v5177_v43 = vpack.c.bf16 %v5175_v42, %v5175_v42 }
0x11c2   : > { %5415 = vmatprep.mubr.bf16.mxu1 %v5177_v43 }
0x11c3   : > { %5416 = vmatmul.mubr.bf16.vlgmr.msra.gmra.mrb[72].mxu1 %v5176_v29 }
0x1296   : > { %v5417_v49 = vpop.f32.mrb[72].mxu1 }
0x1297   : > { %v5418_v50 = vadd.f32 %v5417_v49, %v5376_v47  ;;  %v5419_v51 = vpop.f32.mrb[73].mxu1 }
0x1298   : > { %v5420_v52 = vadd.f32 %v5419_v51, %v5380_v48  ;;  %v5421_v53 = vpop.f32.mrb[74].mxu1 }
0x1299   : > { %v5424_v54 = vmax.f32 %v5418_v50, 0.0  ;;  %v5422_v55 = vpop.f32.mrb[75].mxu1 }
0x129a   : > { %v5425_v56 = vmax.f32 %v5420_v52, 0.0 }
0x129b   : > { %v5426_v58 = vpack.c.bf16 %v5424_v54, %v5424_v54 }
0x129c   : > { %v5427_v57 = vpack.c.bf16 %v5425_v56, %v5425_v56 }
0x129e   : > { %5589 = vmatprep.mubr.bf16.mxu0 %v5427_v57 }
0x129f   : > { %5590 = vmatmul.mubr.bf16.vlgmr.msra.gmra.mrb[84].mxu0 %v5426_v58 }
0x1372   : > { %v6283_v59 = vpop.f32.mrb[84].mxu0 }
0x1373   : > { %v6284_v61 = vpop.f32.mrb[85].mxu0 }
0x1374   : > { %v6285_v62 = vadd.f32 %v6284_v61, %v6283_v59  ;;  %v6286_v63 = vpop.f32.mrb[86].mxu0 }
0x1375   : > { %v6287_v0 = vpop.f32.mrb[87].mxu0 }
0x1376   : > { %v5592_v2 = vadd.f32 %v6285_v62, %v5460_v60 }
0x1378   : > { %v5600_v4 = vrot.slane %v5592_v2, %v5122_v31 }
0x137a   : > { %5601 = vst [vmem:[%s222_s11] sm:$0xff] %v5600_v4 }
0x137b PF: > { %s15_s18 = sadd.s32 1, %s7306_s18  }
0x137c   : > { %p12_p4 = scmp.ge.s32.totalorder %s15_s18, 4  }
0x137e   :  { %14 = sbr.rel (!%p12_p4) target bundleno = 1 (0x1), region = 71 }

</bundles_post_ra>
